<compile_context>
chip_gen: v7x
topology: tpu7x:2x2x1
jax: 0.10.0
libtpu: 0.0.40
codegen_flags: <defaults>
</compile_context>

<pallas_src>
import functools
import math

import jax
import jax.numpy as jnp
from jax import lax
from jax.experimental import pallas as pl
from jax.experimental.pallas import tpu as pltpu


def _layer_norm_f32(x, a, b, eps):
    """Annotated-Transformer LayerNorm: unbiased std (d-1), eps added to std."""
    d = x.shape[-1]
    mean = jnp.mean(x, axis=-1, keepdims=True)
    xc = x - mean
    var = jnp.sum(xc * xc, axis=-1, keepdims=True) * (1.0 / (d - 1))
    std = jnp.sqrt(var)
    return a * (xc / (std + eps)) + b       # exact division (correctness item)


def _encoder_layer_kernel(
        x_ref, kh_ref, vh_ref,
        ln1a_ref, ln1b_ref,
        wq_ref, bq_ref, wo_ref, bo_ref,
        ln2a_ref, ln2b_ref,
        w1_ref, b1_ref, w2_ref, b2_ref,
        o_ref,
        ctx_scratch,
        *, num_heads, eps, compute_dtype):
    """One (batch, q-row-tile) step of the fused cross-attention encoder layer.

    x_ref  : (1, TQ, D)        query-token tile
    kh_ref : (1, H, Skv, dk)   pre-projected keys   (head-major, compute dtype)
    vh_ref : (1, H, Skv, dk)   pre-projected values (head-major, compute dtype)
    o_ref  : (1, TQ, D)        output tile
    ctx_scratch : (TQ, D) VMEM, heads concatenated along the lane axis.
    """
    cd = compute_dtype
    x = x_ref[0].astype(jnp.float32)                       # (TQ, D)
    tq, d_model = x.shape
    dk = d_model // num_heads

    # ---- sublayer 0: x + cross_attn(LN1(x), kv, kv) -------------------------
    # (SublayerConnection norms only the query stream; kv stays raw.)
    y = _layer_norm_f32(x, ln1a_ref[...], ln1b_ref[...], eps).astype(cd)

    # Static head loop: per-head temporaries (scores / p / ctx) flow straight
    # into the VMEM ctx scratch, so the only cross-head state is in VMEM (not
    # vregs), and the static lane offsets keep ctx stores free of dynamic-lane
    # relayouts.
    for h in range(num_heads):
        lo = h * dk
        # 1/sqrt(dk) is already folded into wq/bq in the wrapper.
        qh = (jnp.dot(y, wq_ref[h], preferred_element_type=jnp.float32)
              + bq_ref[h]).astype(cd)                       # (TQ, dk)
        kh = kh_ref[0, h]                                   # (Skv, dk)
        vh = vh_ref[0, h]                                   # (Skv, dk)
        # scores = qh @ kh^T, contracting the last dim of both (no transpose).
        s = lax.dot_general(qh, kh, (((1,), (1,)), ((), ())),
                            preferred_element_type=jnp.float32)   # (TQ, Skv)
        s = s - jnp.max(s, axis=-1, keepdims=True)
        p = jnp.exp(s)
        denom = jnp.sum(p, axis=-1, keepdims=True)
        ctx = jnp.dot(p.astype(cd), vh, preferred_element_type=jnp.float32)
        ctx = ctx / denom                                   # exact normalization
        ctx_scratch[:, lo:lo + dk] = ctx.astype(cd)

    # Single K=D output projection over the lane-concatenated heads.
    attn = (jnp.dot(ctx_scratch[...], wo_ref[...],
                    preferred_element_type=jnp.float32) + bo_ref[...])
    # TODO(synk): dropout inside SublayerConnection is identity (eval mode).
    x1 = x + attn

    # ---- sublayer 1: x1 + FFN(LN2(x1)) ---------------------------------------
    z = _layer_norm_f32(x1, ln2a_ref[...], ln2b_ref[...], eps).astype(cd)
    n_ff_chunks = w1_ref.shape[0]

    def ffn_chunk(c, acc):
        h1 = (jnp.dot(z, w1_ref[c], preferred_element_type=jnp.float32)
              + b1_ref[c])
        h1 = jnp.maximum(h1, 0.0).astype(cd)
        return acc + jnp.dot(h1, w2_ref[c], preferred_element_type=jnp.float32)

    f = lax.fori_loop(0, n_ff_chunks, ffn_chunk,
                      jnp.zeros((tq, d_model), jnp.float32), unroll=True)

    o_ref[0] = (x1 + f + b2_ref[...]).astype(o_ref.dtype)


def _pick_tile_q(seq_q, batch, requested):
    """Largest sublane-aligned divisor of seq_q <= requested; keeps >=2 parallel
    grid steps when batch == 1 so both v7x TensorCores get work."""
    cands = [t for t in range(8, min(requested, seq_q) + 1, 8) if seq_q % t == 0]
    tq = max(cands) if cands else seq_q
    if batch == 1 and seq_q // tq < 2:
        smaller = [t for t in cands if seq_q // t >= 2]
        if smaller:
            tq = max(smaller)
    return tq


def _pick_ff_chunk(d_ff, requested):
    """Largest lane-aligned divisor of d_ff <= requested (bounds live h1 tile)."""
    cands = [c for c in range(128, min(requested, d_ff) + 1, 128) if d_ff % c == 0]
    return max(cands) if cands else d_ff


def cross_attention_encoder_layer(x, kv, params, *, num_heads, eps=1e-6,
                                  tile_q=256, ff_chunk=512, compute_dtype=None):
    """x: (B, Sq, D), kv: (B, Skv, D).  Returns (B, Sq, D)."""
    B, Sq, D = x.shape
    Bk, Skv, Dk = kv.shape
    assert (Bk, Dk) == (B, D)
    assert D % num_heads == 0
    dk = D // num_heads
    H = num_heads
    f32 = jnp.float32
    cd = x.dtype if compute_dtype is None else jnp.dtype(compute_dtype)

    tile_q = _pick_tile_q(Sq, B, tile_q)
    n_q = Sq // tile_q

    d_ff = params["w1"].shape[1]
    ffc = _pick_ff_chunk(d_ff, ff_chunk)
    n_ff = d_ff // ffc

    scale = 1.0 / math.sqrt(dk)

    # ---- weight packing (head-major / d_ff-chunked; MXU operands in `cd`) ----
    wq_h = (params["wq"] * scale).reshape(D, H, dk).transpose(1, 0, 2).astype(cd)
    bq_h = (params["bq"] * scale).reshape(H, 1, dk).astype(f32)
    wo = params["wo"].astype(cd)
    bo = params["bo"].reshape(1, D).astype(f32)
    w1_c = params["w1"].reshape(D, n_ff, ffc).transpose(1, 0, 2).astype(cd)
    b1_c = params["b1"].reshape(n_ff, 1, ffc).astype(f32)
    w2_c = params["w2"].reshape(n_ff, ffc, D).astype(cd)
    b2 = params["b2"].reshape(1, D).astype(f32)
    ln1a = params["ln1_a"].reshape(1, D).astype(f32)
    ln1b = params["ln1_b"].reshape(1, D).astype(f32)
    ln2a = params["ln2_a"].reshape(1, D).astype(f32)
    ln2b = params["ln2_b"].reshape(1, D).astype(f32)

    # ---- K/V projections: once per batch element (plain XLA), head-major -----
    # (Avoids redoing the 2*Skv*D^2 K/V FLOPs for every q-row tile.)
    kv_c = kv.astype(cd)
    wk_h = params["wk"].reshape(D, H, dk).astype(cd)
    wv_h = params["wv"].reshape(D, H, dk).astype(cd)
    k_heads = (jnp.einsum("bsd,dhk->bhsk", kv_c, wk_h,
                          preferred_element_type=f32)
               + params["bk"].reshape(H, 1, dk)).astype(cd)      # (B, H, Skv, dk)
    v_heads = (jnp.einsum("bsd,dhk->bhsk", kv_c, wv_h,
                          preferred_element_type=f32)
               + params["bv"].reshape(H, 1, dk)).astype(cd)      # (B, H, Skv, dk)

    args = (x, k_heads, v_heads,
            ln1a, ln1b, wq_h, bq_h, wo, bo, ln2a, ln2b,
            w1_c, b1_c, w2_c, b2)

    # Per-generation VMEM limit: ~75% of physical, capped at 100 MiB
    # (v7x -> ~48 MiB, v5e/v6e -> raised above the 16/32 MiB scoped defaults).
    try:
        vmem_cap = pltpu.get_tpu_info().vmem_capacity_bytes
    except Exception:
        vmem_cap = 128 * 1024 * 1024
    vmem_limit = min(int(0.75 * vmem_cap), 100 * 1024 * 1024)

    flops = (2 * B * Sq * D * D                 # Q projection
             + 2 * 2 * B * H * Sq * Skv * dk    # scores + context
             + 2 * B * Sq * D * D               # output projection
             + 2 * 2 * B * Sq * D * d_ff)       # FFN
    itemsize = jnp.dtype(cd).itemsize
    bytes_accessed = (2 * B * Sq * D * x.dtype.itemsize
                      + 2 * B * Skv * D * itemsize
                      + (2 * D * D + 2 * D * d_ff) * itemsize)
    cost = pl.CostEstimate(flops=flops,
                           transcendentals=B * H * Sq * Skv,
                           bytes_accessed=bytes_accessed)

    kernel = functools.partial(_encoder_layer_kernel,
                               num_heads=H, eps=eps, compute_dtype=cd)

    def _const(rank):
        return lambda b, i: (0,) * rank

    def _run(single_buffer_weights):
        if single_buffer_weights:
            def wspec(shape):
                # Constant-index resident weights: request no double buffering.
                return pl.BlockSpec(shape, _const(len(shape)),
                                    pipeline_mode=pl.Buffered(1))
        else:
            def wspec(shape):
                return pl.BlockSpec(shape, _const(len(shape)))

        in_specs = [
            pl.BlockSpec((1, tile_q, D), lambda b, i: (b, i, 0)),        # x tile
            pl.BlockSpec((1, H, Skv, dk), lambda b, i: (b, 0, 0, 0)),    # K heads
            pl.BlockSpec((1, H, Skv, dk), lambda b, i: (b, 0, 0, 0)),    # V heads
            wspec((1, D)), wspec((1, D)),                                # LN1 a, b
            wspec((H, D, dk)), wspec((H, 1, dk)),                        # Wq, bq
            wspec((D, D)), wspec((1, D)),                                # Wo, bo
            wspec((1, D)), wspec((1, D)),                                # LN2 a, b
            wspec((n_ff, D, ffc)), wspec((n_ff, 1, ffc)),                # W1, b1
            wspec((n_ff, ffc, D)), wspec((1, D)),                        # W2, b2
        ]
        return pl.pallas_call(
            kernel,
            out_shape=jax.ShapeDtypeStruct((B, Sq, D), x.dtype),
            grid=(B, n_q),
            in_specs=in_specs,
            out_specs=pl.BlockSpec((1, tile_q, D), lambda b, i: (b, i, 0)),
            scratch_shapes=[pltpu.VMEM((tile_q, D), cd)],
            compiler_params=pltpu.CompilerParams(
                dimension_semantics=("parallel", "parallel"),
                vmem_limit_bytes=vmem_limit),
            cost_estimate=cost,
        )(*args)

    try:
        return _run(True)
    except Exception:
        # pl.Buffered(1) rejected by this jax/Mosaic version -> default buffering.
        return _run(False)


def cross_attention_encoder_layer_reference(x, kv, p, *, num_heads, eps=1e-6):
    """Pure-JAX reference mirroring the PyTorch module (eval mode)."""
    def ln(t, a, b):
        d = t.shape[-1]
        mean = t.mean(-1, keepdims=True)
        var = jnp.sum((t - mean) ** 2, axis=-1, keepdims=True) / (d - 1)
        std = jnp.sqrt(var)
        return a * (t - mean) / (std + eps) + b

    B, Sq, D = x.shape
    Skv = kv.shape[1]
    dk = D // num_heads

    y = ln(x, p["ln1_a"], p["ln1_b"])
    q = y @ p["wq"] + p["bq"]
    k = kv @ p["wk"] + p["bk"]
    v = kv @ p["wv"] + p["bv"]
    q = q.reshape(B, Sq, num_heads, dk).transpose(0, 2, 1, 3)
    k = k.reshape(B, Skv, num_heads, dk).transpose(0, 2, 1, 3)
    v = v.reshape(B, Skv, num_heads, dk).transpose(0, 2, 1, 3)
    s = jnp.einsum("bhqd,bhkd->bhqk", q, k) / math.sqrt(dk)
    a = jax.nn.softmax(s, axis=-1)
    ctx = jnp.einsum("bhqk,bhkd->bhqd", a, v)
    ctx = ctx.transpose(0, 2, 1, 3).reshape(B, Sq, D)
    x1 = x + ctx @ p["wo"] + p["bo"]
    z = ln(x1, p["ln2_a"], p["ln2_b"])
    f = jnp.maximum(z @ p["w1"] + p["b1"], 0.0) @ p["w2"] + p["b2"]
    return x1 + f


if __name__ == "__main__":
    # Small shapes: batch=2, q-seq=8, kv-seq=16, d_model=128 (lane-dense),
    # heads=4, d_ff=256.
    B, Sq, Skv, D, H, Dff = 2, 8, 16, 128, 4, 256
    key = jax.random.PRNGKey(0)
    keys = jax.random.split(key, 12)

    x = jax.random.normal(keys[0], (B, Sq, D), dtype=jnp.float32)
    kv = jax.random.normal(keys[1], (B, Skv, D), dtype=jnp.float32)

    def w(k, shape, s):
        return jax.random.normal(k, shape, dtype=jnp.float32) * s

    s_d = 1.0 / math.sqrt(D)
    s_f = 1.0 / math.sqrt(Dff)
    params = dict(
        ln1_a=jnp.ones((D,), jnp.float32), ln1_b=jnp.zeros((D,), jnp.float32),
        wq=w(keys[2], (D, D), s_d), bq=w(keys[3], (D,), 0.02),
        wk=w(keys[4], (D, D), s_d), bk=w(keys[5], (D,), 0.02),
        wv=w(keys[6], (D, D), s_d), bv=w(keys[7], (D,), 0.02),
        wo=w(keys[8], (D, D), s_d), bo=jnp.zeros((D,), jnp.float32),
        ln2_a=jnp.ones((D,), jnp.float32), ln2_b=jnp.zeros((D,), jnp.float32),
        w1=w(keys[9], (D, Dff), s_d), b1=w(keys[10], (Dff,), 0.02),
        w2=w(keys[11], (Dff, D), s_f), b2=jnp.zeros((D,), jnp.float32),
    )

    ref = cross_attention_encoder_layer_reference(x, kv, params, num_heads=H)

    # f32 compute path (matches the f32 PyTorch module semantics).
    out = cross_attention_encoder_layer(x, kv, params, num_heads=H)
    out = jax.block_until_ready(out)
    assert out.shape == (B, Sq, D)
    err = float(jnp.max(jnp.abs(out - ref)))
    assert jnp.allclose(out, ref, atol=2e-3, rtol=2e-3), (
        f"f32 mismatch vs reference (max abs err={err})")

    # bf16 MXU-operand path (the fast path on v5e / v6e / v7x).
    out_bf16 = cross_attention_encoder_layer(x, kv, params, num_heads=H,
                                             compute_dtype=jnp.bfloat16)
    out_bf16 = jax.block_until_ready(out_bf16)
    err_bf16 = float(jnp.max(jnp.abs(out_bf16 - ref)))
    assert jnp.allclose(out_bf16, ref, atol=2.5e-1, rtol=1e-1), (
        f"bf16 mismatch vs reference (max abs err={err_bf16})")

    print("KERNEL_OK")
</pallas_src>

<mosaic_0001>
module attributes {stable_mosaic.version = 11 : i64} {
  func.func @_encoder_layer_kernel(%arg0: i32, %arg1: i32, %arg2: memref<1x8x128xf32, #tpu.memory_space<vmem>>, %arg3: memref<1x4x16x32xf32, #tpu.memory_space<vmem>>, %arg4: memref<1x4x16x32xf32, #tpu.memory_space<vmem>>, %arg5: memref<1x128xf32, #tpu.memory_space<vmem>>, %arg6: memref<1x128xf32, #tpu.memory_space<vmem>>, %arg7: memref<4x128x32xf32, #tpu.memory_space<vmem>>, %arg8: memref<4x1x32xf32, #tpu.memory_space<vmem>>, %arg9: memref<128x128xf32, #tpu.memory_space<vmem>>, %arg10: memref<1x128xf32, #tpu.memory_space<vmem>>, %arg11: memref<1x128xf32, #tpu.memory_space<vmem>>, %arg12: memref<1x128xf32, #tpu.memory_space<vmem>>, %arg13: memref<1x128x256xf32, #tpu.memory_space<vmem>>, %arg14: memref<1x1x256xf32, #tpu.memory_space<vmem>>, %arg15: memref<1x256x128xf32, #tpu.memory_space<vmem>>, %arg16: memref<1x128xf32, #tpu.memory_space<vmem>>, %arg17: memref<1x8x128xf32, #tpu.memory_space<vmem>>, %arg18: memref<8x128xf32, #tpu.memory_space<vmem>>) attributes {dimension_semantics = [#tpu.dimension_semantics<parallel>, #tpu.dimension_semantics<parallel>], iteration_bounds = array<i64: 2, 1>, scalar_prefetch = 0 : i64, scratch_operands = 1 : i64, tpu.core_type = #tpu.core_type<tc>, window_params = [{transform_indices = @transform_0, window_bounds = array<i64: 1, 8, 128>}, {transform_indices = @transform_1, window_bounds = array<i64: 1, 4, 16, 32>}, {transform_indices = @transform_2, window_bounds = array<i64: 1, 4, 16, 32>}, {pipeline_mode = #tpu.pipeline_mode<synchronous>, transform_indices = @transform_3, window_bounds = array<i64: 1, 128>}, {pipeline_mode = #tpu.pipeline_mode<synchronous>, transform_indices = @transform_4, window_bounds = array<i64: 1, 128>}, {pipeline_mode = #tpu.pipeline_mode<synchronous>, transform_indices = @transform_5, window_bounds = array<i64: 4, 128, 32>}, {pipeline_mode = #tpu.pipeline_mode<synchronous>, transform_indices = @transform_6, window_bounds = array<i64: 4, 1, 32>}, {pipeline_mode = #tpu.pipeline_mode<synchronous>, transform_indices = @transform_7, window_bounds = array<i64: 128, 128>}, {pipeline_mode = #tpu.pipeline_mode<synchronous>, transform_indices = @transform_8, window_bounds = array<i64: 1, 128>}, {pipeline_mode = #tpu.pipeline_mode<synchronous>, transform_indices = @transform_9, window_bounds = array<i64: 1, 128>}, {pipeline_mode = #tpu.pipeline_mode<synchronous>, transform_indices = @transform_10, window_bounds = array<i64: 1, 128>}, {pipeline_mode = #tpu.pipeline_mode<synchronous>, transform_indices = @transform_11, window_bounds = array<i64: 1, 128, 256>}, {pipeline_mode = #tpu.pipeline_mode<synchronous>, transform_indices = @transform_12, window_bounds = array<i64: 1, 1, 256>}, {pipeline_mode = #tpu.pipeline_mode<synchronous>, transform_indices = @transform_13, window_bounds = array<i64: 1, 256, 128>}, {pipeline_mode = #tpu.pipeline_mode<synchronous>, transform_indices = @transform_14, window_bounds = array<i64: 1, 128>}, {transform_indices = @transform_15, window_bounds = array<i64: 1, 8, 128>}]} {
    %c0 = arith.constant 0 : index
    %c0_0 = arith.constant 0 : index
    %c0_1 = arith.constant 0 : index
    %0 = vector.load %arg2[%c0, %c0_0, %c0_1] : memref<1x8x128xf32, #tpu.memory_space<vmem>>, vector<1x8x128xf32>
    %1 = vector.shape_cast %0 : vector<1x8x128xf32> to vector<8x128xf32>
    %c0_2 = arith.constant 0 : index
    %c0_3 = arith.constant 0 : index
    %2 = vector.load %arg5[%c0_2, %c0_3] : memref<1x128xf32, #tpu.memory_space<vmem>>, vector<1x128xf32>
    %c0_4 = arith.constant 0 : index
    %c0_5 = arith.constant 0 : index
    %3 = vector.load %arg6[%c0_4, %c0_5] : memref<1x128xf32, #tpu.memory_space<vmem>>, vector<1x128xf32>
    %cst = arith.constant dense<0.000000e+00> : vector<8xf32>
    %4 = vector.multi_reduction <add>, %1, %cst [1] : vector<8x128xf32> to vector<8xf32>
    %5 = vector.shape_cast %4 : vector<8xf32> to vector<8x1xf32>
    %cst_6 = arith.constant 1.280000e+02 : f32
    %6 = vector.broadcast %cst_6 : f32 to vector<8x1xf32>
    %7 = arith.divf %5, %6 : vector<8x1xf32>
    %8 = vector.broadcast %7 : vector<8x1xf32> to vector<8x128xf32>
    %9 = arith.subf %1, %8 : vector<8x128xf32>
    %10 = arith.mulf %9, %9 : vector<8x128xf32>
    %cst_7 = arith.constant dense<0.000000e+00> : vector<8xf32>
    %11 = vector.multi_reduction <add>, %10, %cst_7 [1] : vector<8x128xf32> to vector<8xf32>
    %12 = vector.shape_cast %11 : vector<8xf32> to vector<8x1xf32>
    %cst_8 = arith.constant 0.00787401571 : f32
    %13 = vector.broadcast %cst_8 : f32 to vector<8x1xf32>
    %14 = arith.mulf %12, %13 : vector<8x1xf32>
    %15 = math.sqrt %14 : vector<8x1xf32>
    %cst_9 = arith.constant 9.99999997E-7 : f32
    %16 = vector.broadcast %cst_9 : f32 to vector<8x1xf32>
    %17 = arith.addf %15, %16 : vector<8x1xf32>
    %18 = vector.broadcast %17 : vector<8x1xf32> to vector<8x128xf32>
    %19 = arith.divf %9, %18 : vector<8x128xf32>
    %20 = vector.broadcast %2 : vector<1x128xf32> to vector<8x128xf32>
    %21 = arith.mulf %20, %19 : vector<8x128xf32>
    %22 = vector.broadcast %3 : vector<1x128xf32> to vector<8x128xf32>
    %23 = arith.addf %21, %22 : vector<8x128xf32>
    %c0_10 = arith.constant 0 : index
    %c0_11 = arith.constant 0 : index
    %c0_12 = arith.constant 0 : index
    %24 = vector.load %arg7[%c0_10, %c0_11, %c0_12] : memref<4x128x32xf32, #tpu.memory_space<vmem>>, vector<1x128x32xf32>
    %25 = vector.shape_cast %24 : vector<1x128x32xf32> to vector<128x32xf32>
    %cst_13 = arith.constant dense<0.000000e+00> : vector<8x32xf32>
    %26 = tpu.matmul %23, %25, %cst_13 {dimension_numbers = #tpu.dot_dimension_numbers<[1], [0], [0], [1], [0, 0, 1, 1], [], []>} : vector<8x128xf32>, vector<128x32xf32>, vector<8x32xf32> -> vector<8x32xf32>
    %c0_14 = arith.constant 0 : index
    %c0_15 = arith.constant 0 : index
    %c0_16 = arith.constant 0 : index
    %27 = vector.load %arg8[%c0_14, %c0_15, %c0_16] : memref<4x1x32xf32, #tpu.memory_space<vmem>>, vector<1x1x32xf32>
    %28 = vector.shape_cast %27 : vector<1x1x32xf32> to vector<1x32xf32>
    %29 = vector.broadcast %28 : vector<1x32xf32> to vector<8x32xf32>
    %30 = arith.addf %26, %29 : vector<8x32xf32>
    %c0_17 = arith.constant 0 : index
    %c0_18 = arith.constant 0 : index
    %c0_19 = arith.constant 0 : index
    %c0_20 = arith.constant 0 : index
    %31 = vector.load %arg3[%c0_17, %c0_18, %c0_19, %c0_20] : memref<1x4x16x32xf32, #tpu.memory_space<vmem>>, vector<1x1x16x32xf32>
    %32 = vector.shape_cast %31 : vector<1x1x16x32xf32> to vector<16x32xf32>
    %c0_21 = arith.constant 0 : index
    %c0_22 = arith.constant 0 : index
    %c0_23 = arith.constant 0 : index
    %c0_24 = arith.constant 0 : index
    %33 = vector.load %arg4[%c0_21, %c0_22, %c0_23, %c0_24] : memref<1x4x16x32xf32, #tpu.memory_space<vmem>>, vector<1x1x16x32xf32>
    %34 = vector.shape_cast %33 : vector<1x1x16x32xf32> to vector<16x32xf32>
    %cst_25 = arith.constant dense<0.000000e+00> : vector<8x16xf32>
    %35 = tpu.matmul %30, %32, %cst_25 {dimension_numbers = #tpu.dot_dimension_numbers<[1], [1], [0], [0], [0, 0, 1, 0], [], []>} : vector<8x32xf32>, vector<16x32xf32>, vector<8x16xf32> -> vector<8x16xf32>
    %cst_26 = arith.constant dense<0xFF800000> : vector<8xf32>
    %36 = vector.multi_reduction <maximumf>, %35, %cst_26 [1] : vector<8x16xf32> to vector<8xf32>
    %37 = vector.shape_cast %36 : vector<8xf32> to vector<8x1xf32>
    %38 = vector.broadcast %37 : vector<8x1xf32> to vector<8x16xf32>
    %39 = arith.subf %35, %38 : vector<8x16xf32>
    %40 = math.exp %39 : vector<8x16xf32>
    %cst_27 = arith.constant dense<0.000000e+00> : vector<8xf32>
    %41 = vector.multi_reduction <add>, %40, %cst_27 [1] : vector<8x16xf32> to vector<8xf32>
    %42 = vector.shape_cast %41 : vector<8xf32> to vector<8x1xf32>
    %cst_28 = arith.constant dense<0.000000e+00> : vector<8x32xf32>
    %43 = tpu.matmul %40, %34, %cst_28 {dimension_numbers = #tpu.dot_dimension_numbers<[1], [0], [0], [1], [0, 0, 1, 1], [], []>} : vector<8x16xf32>, vector<16x32xf32>, vector<8x32xf32> -> vector<8x32xf32>
    %44 = vector.broadcast %42 : vector<8x1xf32> to vector<8x32xf32>
    %45 = arith.divf %43, %44 : vector<8x32xf32>
    %c0_29 = arith.constant 0 : index
    %c0_30 = arith.constant 0 : index
    %46 = vector.load %arg18[%c0_29, %c0_30] : memref<8x128xf32, #tpu.memory_space<vmem>>, vector<8x32xf32>
    tpu.vector_store %arg18[%c0_29, %c0_30], %45 {strides = array<i32>} : memref<8x128xf32, #tpu.memory_space<vmem>>, vector<8x32xf32>,
    %c1 = arith.constant 1 : index
    %c0_31 = arith.constant 0 : index
    %c0_32 = arith.constant 0 : index
    %47 = vector.load %arg7[%c1, %c0_31, %c0_32] : memref<4x128x32xf32, #tpu.memory_space<vmem>>, vector<1x128x32xf32>
    %48 = vector.shape_cast %47 : vector<1x128x32xf32> to vector<128x32xf32>
    %cst_33 = arith.constant dense<0.000000e+00> : vector<8x32xf32>
    %49 = tpu.matmul %23, %48, %cst_33 {dimension_numbers = #tpu.dot_dimension_numbers<[1], [0], [0], [1], [0, 0, 1, 1], [], []>} : vector<8x128xf32>, vector<128x32xf32>, vector<8x32xf32> -> vector<8x32xf32>
    %c1_34 = arith.constant 1 : index
    %c0_35 = arith.constant 0 : index
    %c0_36 = arith.constant 0 : index
    %50 = vector.load %arg8[%c1_34, %c0_35, %c0_36] : memref<4x1x32xf32, #tpu.memory_space<vmem>>, vector<1x1x32xf32>
    %51 = vector.shape_cast %50 : vector<1x1x32xf32> to vector<1x32xf32>
    %52 = vector.broadcast %51 : vector<1x32xf32> to vector<8x32xf32>
    %53 = arith.addf %49, %52 : vector<8x32xf32>
    %c0_37 = arith.constant 0 : index
    %c1_38 = arith.constant 1 : index
    %c0_39 = arith.constant 0 : index
    %c0_40 = arith.constant 0 : index
    %54 = vector.load %arg3[%c0_37, %c1_38, %c0_39, %c0_40] : memref<1x4x16x32xf32, #tpu.memory_space<vmem>>, vector<1x1x16x32xf32>
    %55 = vector.shape_cast %54 : vector<1x1x16x32xf32> to vector<16x32xf32>
    %c0_41 = arith.constant 0 : index
    %c1_42 = arith.constant 1 : index
    %c0_43 = arith.constant 0 : index
    %c0_44 = arith.constant 0 : index
    %56 = vector.load %arg4[%c0_41, %c1_42, %c0_43, %c0_44] : memref<1x4x16x32xf32, #tpu.memory_space<vmem>>, vector<1x1x16x32xf32>
    %57 = vector.shape_cast %56 : vector<1x1x16x32xf32> to vector<16x32xf32>
    %cst_45 = arith.constant dense<0.000000e+00> : vector<8x16xf32>
    %58 = tpu.matmul %53, %55, %cst_45 {dimension_numbers = #tpu.dot_dimension_numbers<[1], [1], [0], [0], [0, 0, 1, 0], [], []>} : vector<8x32xf32>, vector<16x32xf32>, vector<8x16xf32> -> vector<8x16xf32>
    %cst_46 = arith.constant dense<0xFF800000> : vector<8xf32>
    %59 = vector.multi_reduction <maximumf>, %58, %cst_46 [1] : vector<8x16xf32> to vector<8xf32>
    %60 = vector.shape_cast %59 : vector<8xf32> to vector<8x1xf32>
    %61 = vector.broadcast %60 : vector<8x1xf32> to vector<8x16xf32>
    %62 = arith.subf %58, %61 : vector<8x16xf32>
    %63 = math.exp %62 : vector<8x16xf32>
    %cst_47 = arith.constant dense<0.000000e+00> : vector<8xf32>
    %64 = vector.multi_reduction <add>, %63, %cst_47 [1] : vector<8x16xf32> to vector<8xf32>
    %65 = vector.shape_cast %64 : vector<8xf32> to vector<8x1xf32>
    %cst_48 = arith.constant dense<0.000000e+00> : vector<8x32xf32>
    %66 = tpu.matmul %63, %57, %cst_48 {dimension_numbers = #tpu.dot_dimension_numbers<[1], [0], [0], [1], [0, 0, 1, 1], [], []>} : vector<8x16xf32>, vector<16x32xf32>, vector<8x32xf32> -> vector<8x32xf32>
    %67 = vector.broadcast %65 : vector<8x1xf32> to vector<8x32xf32>
    %68 = arith.divf %66, %67 : vector<8x32xf32>
    %c0_49 = arith.constant 0 : index
    %c32 = arith.constant 32 : index
    %69 = vector.load %arg18[%c0_49, %c32] : memref<8x128xf32, #tpu.memory_space<vmem>>, vector<8x32xf32>
    tpu.vector_store %arg18[%c0_49, %c32], %68 {strides = array<i32>} : memref<8x128xf32, #tpu.memory_space<vmem>>, vector<8x32xf32>,
    %c2 = arith.constant 2 : index
    %c0_50 = arith.constant 0 : index
    %c0_51 = arith.constant 0 : index
    %70 = vector.load %arg7[%c2, %c0_50, %c0_51] : memref<4x128x32xf32, #tpu.memory_space<vmem>>, vector<1x128x32xf32>
    %71 = vector.shape_cast %70 : vector<1x128x32xf32> to vector<128x32xf32>
    %cst_52 = arith.constant dense<0.000000e+00> : vector<8x32xf32>
    %72 = tpu.matmul %23, %71, %cst_52 {dimension_numbers = #tpu.dot_dimension_numbers<[1], [0], [0], [1], [0, 0, 1, 1], [], []>} : vector<8x128xf32>, vector<128x32xf32>, vector<8x32xf32> -> vector<8x32xf32>
    %c2_53 = arith.constant 2 : index
    %c0_54 = arith.constant 0 : index
    %c0_55 = arith.constant 0 : index
    %73 = vector.load %arg8[%c2_53, %c0_54, %c0_55] : memref<4x1x32xf32, #tpu.memory_space<vmem>>, vector<1x1x32xf32>
    %74 = vector.shape_cast %73 : vector<1x1x32xf32> to vector<1x32xf32>
    %75 = vector.broadcast %74 : vector<1x32xf32> to vector<8x32xf32>
    %76 = arith.addf %72, %75 : vector<8x32xf32>
    %c0_56 = arith.constant 0 : index
    %c2_57 = arith.constant 2 : index
    %c0_58 = arith.constant 0 : index
    %c0_59 = arith.constant 0 : index
    %77 = vector.load %arg3[%c0_56, %c2_57, %c0_58, %c0_59] : memref<1x4x16x32xf32, #tpu.memory_space<vmem>>, vector<1x1x16x32xf32>
    %78 = vector.shape_cast %77 : vector<1x1x16x32xf32> to vector<16x32xf32>
    %c0_60 = arith.constant 0 : index
    %c2_61 = arith.constant 2 : index
    %c0_62 = arith.constant 0 : index
    %c0_63 = arith.constant 0 : index
    %79 = vector.load %arg4[%c0_60, %c2_61, %c0_62, %c0_63] : memref<1x4x16x32xf32, #tpu.memory_space<vmem>>, vector<1x1x16x32xf32>
    %80 = vector.shape_cast %79 : vector<1x1x16x32xf32> to vector<16x32xf32>
    %cst_64 = arith.constant dense<0.000000e+00> : vector<8x16xf32>
    %81 = tpu.matmul %76, %78, %cst_64 {dimension_numbers = #tpu.dot_dimension_numbers<[1], [1], [0], [0], [0, 0, 1, 0], [], []>} : vector<8x32xf32>, vector<16x32xf32>, vector<8x16xf32> -> vector<8x16xf32>
    %cst_65 = arith.constant dense<0xFF800000> : vector<8xf32>
    %82 = vector.multi_reduction <maximumf>, %81, %cst_65 [1] : vector<8x16xf32> to vector<8xf32>
    %83 = vector.shape_cast %82 : vector<8xf32> to vector<8x1xf32>
    %84 = vector.broadcast %83 : vector<8x1xf32> to vector<8x16xf32>
    %85 = arith.subf %81, %84 : vector<8x16xf32>
    %86 = math.exp %85 : vector<8x16xf32>
    %cst_66 = arith.constant dense<0.000000e+00> : vector<8xf32>
    %87 = vector.multi_reduction <add>, %86, %cst_66 [1] : vector<8x16xf32> to vector<8xf32>
    %88 = vector.shape_cast %87 : vector<8xf32> to vector<8x1xf32>
    %cst_67 = arith.constant dense<0.000000e+00> : vector<8x32xf32>
    %89 = tpu.matmul %86, %80, %cst_67 {dimension_numbers = #tpu.dot_dimension_numbers<[1], [0], [0], [1], [0, 0, 1, 1], [], []>} : vector<8x16xf32>, vector<16x32xf32>, vector<8x32xf32> -> vector<8x32xf32>
    %90 = vector.broadcast %88 : vector<8x1xf32> to vector<8x32xf32>
    %91 = arith.divf %89, %90 : vector<8x32xf32>
    %c0_68 = arith.constant 0 : index
    %c64 = arith.constant 64 : index
    %92 = vector.load %arg18[%c0_68, %c64] : memref<8x128xf32, #tpu.memory_space<vmem>>, vector<8x32xf32>
    tpu.vector_store %arg18[%c0_68, %c64], %91 {strides = array<i32>} : memref<8x128xf32, #tpu.memory_space<vmem>>, vector<8x32xf32>,
    %c3 = arith.constant 3 : index
    %c0_69 = arith.constant 0 : index
    %c0_70 = arith.constant 0 : index
    %93 = vector.load %arg7[%c3, %c0_69, %c0_70] : memref<4x128x32xf32, #tpu.memory_space<vmem>>, vector<1x128x32xf32>
    %94 = vector.shape_cast %93 : vector<1x128x32xf32> to vector<128x32xf32>
    %cst_71 = arith.constant dense<0.000000e+00> : vector<8x32xf32>
    %95 = tpu.matmul %23, %94, %cst_71 {dimension_numbers = #tpu.dot_dimension_numbers<[1], [0], [0], [1], [0, 0, 1, 1], [], []>} : vector<8x128xf32>, vector<128x32xf32>, vector<8x32xf32> -> vector<8x32xf32>
    %c3_72 = arith.constant 3 : index
    %c0_73 = arith.constant 0 : index
    %c0_74 = arith.constant 0 : index
    %96 = vector.load %arg8[%c3_72, %c0_73, %c0_74] : memref<4x1x32xf32, #tpu.memory_space<vmem>>, vector<1x1x32xf32>
    %97 = vector.shape_cast %96 : vector<1x1x32xf32> to vector<1x32xf32>
    %98 = vector.broadcast %97 : vector<1x32xf32> to vector<8x32xf32>
    %99 = arith.addf %95, %98 : vector<8x32xf32>
    %c0_75 = arith.constant 0 : index
    %c3_76 = arith.constant 3 : index
    %c0_77 = arith.constant 0 : index
    %c0_78 = arith.constant 0 : index
    %100 = vector.load %arg3[%c0_75, %c3_76, %c0_77, %c0_78] : memref<1x4x16x32xf32, #tpu.memory_space<vmem>>, vector<1x1x16x32xf32>
    %101 = vector.shape_cast %100 : vector<1x1x16x32xf32> to vector<16x32xf32>
    %c0_79 = arith.constant 0 : index
    %c3_80 = arith.constant 3 : index
    %c0_81 = arith.constant 0 : index
    %c0_82 = arith.constant 0 : index
    %102 = vector.load %arg4[%c0_79, %c3_80, %c0_81, %c0_82] : memref<1x4x16x32xf32, #tpu.memory_space<vmem>>, vector<1x1x16x32xf32>
    %103 = vector.shape_cast %102 : vector<1x1x16x32xf32> to vector<16x32xf32>
    %cst_83 = arith.constant dense<0.000000e+00> : vector<8x16xf32>
    %104 = tpu.matmul %99, %101, %cst_83 {dimension_numbers = #tpu.dot_dimension_numbers<[1], [1], [0], [0], [0, 0, 1, 0], [], []>} : vector<8x32xf32>, vector<16x32xf32>, vector<8x16xf32> -> vector<8x16xf32>
    %cst_84 = arith.constant dense<0xFF800000> : vector<8xf32>
    %105 = vector.multi_reduction <maximumf>, %104, %cst_84 [1] : vector<8x16xf32> to vector<8xf32>
    %106 = vector.shape_cast %105 : vector<8xf32> to vector<8x1xf32>
    %107 = vector.broadcast %106 : vector<8x1xf32> to vector<8x16xf32>
    %108 = arith.subf %104, %107 : vector<8x16xf32>
    %109 = math.exp %108 : vector<8x16xf32>
    %cst_85 = arith.constant dense<0.000000e+00> : vector<8xf32>
    %110 = vector.multi_reduction <add>, %109, %cst_85 [1] : vector<8x16xf32> to vector<8xf32>
    %111 = vector.shape_cast %110 : vector<8xf32> to vector<8x1xf32>
    %cst_86 = arith.constant dense<0.000000e+00> : vector<8x32xf32>
    %112 = tpu.matmul %109, %103, %cst_86 {dimension_numbers = #tpu.dot_dimension_numbers<[1], [0], [0], [1], [0, 0, 1, 1], [], []>} : vector<8x16xf32>, vector<16x32xf32>, vector<8x32xf32> -> vector<8x32xf32>
    %113 = vector.broadcast %111 : vector<8x1xf32> to vector<8x32xf32>
    %114 = arith.divf %112, %113 : vector<8x32xf32>
    %c0_87 = arith.constant 0 : index
    %c96 = arith.constant 96 : index
    %115 = vector.load %arg18[%c0_87, %c96] : memref<8x128xf32, #tpu.memory_space<vmem>>, vector<8x32xf32>
    tpu.vector_store %arg18[%c0_87, %c96], %114 {strides = array<i32>} : memref<8x128xf32, #tpu.memory_space<vmem>>, vector<8x32xf32>,
    %c0_88 = arith.constant 0 : index
    %c0_89 = arith.constant 0 : index
    %116 = vector.load %arg18[%c0_88, %c0_89] : memref<8x128xf32, #tpu.memory_space<vmem>>, vector<8x128xf32>
    %c0_90 = arith.constant 0 : index
    %c0_91 = arith.constant 0 : index
    %117 = vector.load %arg9[%c0_90, %c0_91] : memref<128x128xf32, #tpu.memory_space<vmem>>, vector<128x128xf32>
    %cst_92 = arith.constant dense<0.000000e+00> : vector<8x128xf32>
    %118 = tpu.matmul %116, %117, %cst_92 {dimension_numbers = #tpu.dot_dimension_numbers<[1], [0], [0], [1], [0, 0, 1, 1], [], []>} : vector<8x128xf32>, vector<128x128xf32>, vector<8x128xf32> -> vector<8x128xf32>
    %c0_93 = arith.constant 0 : index
    %c0_94 = arith.constant 0 : index
    %119 = vector.load %arg10[%c0_93, %c0_94] : memref<1x128xf32, #tpu.memory_space<vmem>>, vector<1x128xf32>
    %120 = vector.broadcast %119 : vector<1x128xf32> to vector<8x128xf32>
    %121 = arith.addf %118, %120 : vector<8x128xf32>
    %122 = arith.addf %1, %121 : vector<8x128xf32>
    %c0_95 = arith.constant 0 : index
    %c0_96 = arith.constant 0 : index
    %123 = vector.load %arg11[%c0_95, %c0_96] : memref<1x128xf32, #tpu.memory_space<vmem>>, vector<1x128xf32>
    %c0_97 = arith.constant 0 : index
    %c0_98 = arith.constant 0 : index
    %124 = vector.load %arg12[%c0_97, %c0_98] : memref<1x128xf32, #tpu.memory_space<vmem>>, vector<1x128xf32>
    %cst_99 = arith.constant dense<0.000000e+00> : vector<8xf32>
    %125 = vector.multi_reduction <add>, %122, %cst_99 [1] : vector<8x128xf32> to vector<8xf32>
    %126 = vector.shape_cast %125 : vector<8xf32> to vector<8x1xf32>
    %cst_100 = arith.constant 1.280000e+02 : f32
    %127 = vector.broadcast %cst_100 : f32 to vector<8x1xf32>
    %128 = arith.divf %126, %127 : vector<8x1xf32>
    %129 = vector.broadcast %128 : vector<8x1xf32> to vector<8x128xf32>
    %130 = arith.subf %122, %129 : vector<8x128xf32>
    %131 = arith.mulf %130, %130 : vector<8x128xf32>
    %cst_101 = arith.constant dense<0.000000e+00> : vector<8xf32>
    %132 = vector.multi_reduction <add>, %131, %cst_101 [1] : vector<8x128xf32> to vector<8xf32>
    %133 = vector.shape_cast %132 : vector<8xf32> to vector<8x1xf32>
    %cst_102 = arith.constant 0.00787401571 : f32
    %134 = vector.broadcast %cst_102 : f32 to vector<8x1xf32>
    %135 = arith.mulf %133, %134 : vector<8x1xf32>
    %136 = math.sqrt %135 : vector<8x1xf32>
    %cst_103 = arith.constant 9.99999997E-7 : f32
    %137 = vector.broadcast %cst_103 : f32 to vector<8x1xf32>
    %138 = arith.addf %136, %137 : vector<8x1xf32>
    %139 = vector.broadcast %138 : vector<8x1xf32> to vector<8x128xf32>
    %140 = arith.divf %130, %139 : vector<8x128xf32>
    %141 = vector.broadcast %123 : vector<1x128xf32> to vector<8x128xf32>
    %142 = arith.mulf %141, %140 : vector<8x128xf32>
    %143 = vector.broadcast %124 : vector<1x128xf32> to vector<8x128xf32>
    %144 = arith.addf %142, %143 : vector<8x128xf32>
    %cst_104 = arith.constant 0.000000e+00 : f32
    %145 = vector.broadcast %cst_104 : f32 to vector<8x128xf32>
    %c0_i32 = arith.constant 0 : i32
    %146 = arith.index_cast %c0_i32 : i32 to index
    %c0_105 = arith.constant 0 : index
    %c0_106 = arith.constant 0 : index
    %147 = vector.load %arg13[%146, %c0_105, %c0_106] : memref<1x128x256xf32, #tpu.memory_space<vmem>>, vector<1x128x256xf32>
    %148 = vector.shape_cast %147 : vector<1x128x256xf32> to vector<128x256xf32>
    %cst_107 = arith.constant dense<0.000000e+00> : vector<8x256xf32>
    %149 = tpu.matmul %144, %148, %cst_107 {dimension_numbers = #tpu.dot_dimension_numbers<[1], [0], [0], [1], [0, 0, 1, 1], [], []>} : vector<8x128xf32>, vector<128x256xf32>, vector<8x256xf32> -> vector<8x256xf32>
    %150 = arith.index_cast %c0_i32 : i32 to index
    %c0_108 = arith.constant 0 : index
    %c0_109 = arith.constant 0 : index
    %151 = vector.load %arg14[%150, %c0_108, %c0_109] : memref<1x1x256xf32, #tpu.memory_space<vmem>>, vector<1x1x256xf32>
    %152 = vector.shape_cast %151 : vector<1x1x256xf32> to vector<1x256xf32>
    %153 = vector.broadcast %152 : vector<1x256xf32> to vector<8x256xf32>
    %154 = arith.addf %149, %153 : vector<8x256xf32>
    %cst_110 = arith.constant 0.000000e+00 : f32
    %155 = vector.broadcast %cst_110 : f32 to vector<8x256xf32>
    %156 = arith.maximumf %154, %155 : vector<8x256xf32>
    %157 = arith.index_cast %c0_i32 : i32 to index
    %c0_111 = arith.constant 0 : index
    %c0_112 = arith.constant 0 : index
    %158 = vector.load %arg15[%157, %c0_111, %c0_112] : memref<1x256x128xf32, #tpu.memory_space<vmem>>, vector<1x256x128xf32>
    %159 = vector.shape_cast %158 : vector<1x256x128xf32> to vector<256x128xf32>
    %cst_113 = arith.constant dense<0.000000e+00> : vector<8x128xf32>
    %160 = tpu.matmul %156, %159, %cst_113 {dimension_numbers = #tpu.dot_dimension_numbers<[1], [0], [0], [1], [0, 0, 1, 1], [], []>} : vector<8x256xf32>, vector<256x128xf32>, vector<8x128xf32> -> vector<8x128xf32>
    %161 = arith.addf %145, %160 : vector<8x128xf32>
    %c1_i32 = arith.constant 1 : i32
    %162 = arith.addf %122, %161 : vector<8x128xf32>
    %c0_114 = arith.constant 0 : index
    %c0_115 = arith.constant 0 : index
    %163 = vector.load %arg16[%c0_114, %c0_115] : memref<1x128xf32, #tpu.memory_space<vmem>>, vector<1x128xf32>
    %164 = vector.broadcast %163 : vector<1x128xf32> to vector<8x128xf32>
    %165 = arith.addf %162, %164 : vector<8x128xf32>
    %c0_116 = arith.constant 0 : index
    %c0_117 = arith.constant 0 : index
    %c0_118 = arith.constant 0 : index
    %166 = vector.load %arg17[%c0_116, %c0_117, %c0_118] : memref<1x8x128xf32, #tpu.memory_space<vmem>>, vector<1x8x128xf32>
    %167 = vector.shape_cast %166 : vector<1x8x128xf32> to vector<8x128xf32>
    %168 = vector.shape_cast %165 : vector<8x128xf32> to vector<1x8x128xf32>
    tpu.vector_store %arg17[%c0_116, %c0_117, %c0_118], %168 {strides = array<i32>} : memref<1x8x128xf32, #tpu.memory_space<vmem>>, vector<1x8x128xf32>,
    return
  }
  func.func @transform_0(%arg0: i32, %arg1: i32) -> (i32, i32, i32) {
    %c0_i32 = arith.constant 0 : i32
    %c0_i32_0 = arith.constant 0 : i32
    return %arg0, %arg1, %c0_i32 : i32, i32, i32
  }
  func.func @transform_1(%arg0: i32, %arg1: i32) -> (i32, i32, i32, i32) {
    %c0_i32 = arith.constant 0 : i32
    %c0_i32_0 = arith.constant 0 : i32
    %c0_i32_1 = arith.constant 0 : i32
    %c0_i32_2 = arith.constant 0 : i32
    return %arg0, %c0_i32, %c0_i32_0, %c0_i32_1 : i32, i32, i32, i32
  }
  func.func @transform_2(%arg0: i32, %arg1: i32) -> (i32, i32, i32, i32) {
    %c0_i32 = arith.constant 0 : i32
    %c0_i32_0 = arith.constant 0 : i32
    %c0_i32_1 = arith.constant 0 : i32
    %c0_i32_2 = arith.constant 0 : i32
    return %arg0, %c0_i32, %c0_i32_0, %c0_i32_1 : i32, i32, i32, i32
  }
  func.func @transform_3(%arg0: i32, %arg1: i32) -> (i32, i32) {
    %c0_i32 = arith.constant 0 : i32
    %c0_i32_0 = arith.constant 0 : i32
    %c0_i32_1 = arith.constant 0 : i32
    return %c0_i32, %c0_i32_0 : i32, i32
  }
  func.func @transform_4(%arg0: i32, %arg1: i32) -> (i32, i32) {
    %c0_i32 = arith.constant 0 : i32
    %c0_i32_0 = arith.constant 0 : i32
    %c0_i32_1 = arith.constant 0 : i32
    return %c0_i32, %c0_i32_0 : i32, i32
  }
  func.func @transform_5(%arg0: i32, %arg1: i32) -> (i32, i32, i32) {
    %c0_i32 = arith.constant 0 : i32
    %c0_i32_0 = arith.constant 0 : i32
    %c0_i32_1 = arith.constant 0 : i32
    %c0_i32_2 = arith.constant 0 : i32
    return %c0_i32, %c0_i32_0, %c0_i32_1 : i32, i32, i32
  }
  func.func @transform_6(%arg0: i32, %arg1: i32) -> (i32, i32, i32) {
    %c0_i32 = arith.constant 0 : i32
    %c0_i32_0 = arith.constant 0 : i32
    %c0_i32_1 = arith.constant 0 : i32
    %c0_i32_2 = arith.constant 0 : i32
    return %c0_i32, %c0_i32_0, %c0_i32_1 : i32, i32, i32
  }
  func.func @transform_7(%arg0: i32, %arg1: i32) -> (i32, i32) {
    %c0_i32 = arith.constant 0 : i32
    %c0_i32_0 = arith.constant 0 : i32
    %c0_i32_1 = arith.constant 0 : i32
    return %c0_i32, %c0_i32_0 : i32, i32
  }
  func.func @transform_8(%arg0: i32, %arg1: i32) -> (i32, i32) {
    %c0_i32 = arith.constant 0 : i32
    %c0_i32_0 = arith.constant 0 : i32
    %c0_i32_1 = arith.constant 0 : i32
    return %c0_i32, %c0_i32_0 : i32, i32
  }
  func.func @transform_9(%arg0: i32, %arg1: i32) -> (i32, i32) {
    %c0_i32 = arith.constant 0 : i32
    %c0_i32_0 = arith.constant 0 : i32
    %c0_i32_1 = arith.constant 0 : i32
    return %c0_i32, %c0_i32_0 : i32, i32
  }
  func.func @transform_10(%arg0: i32, %arg1: i32) -> (i32, i32) {
    %c0_i32 = arith.constant 0 : i32
    %c0_i32_0 = arith.constant 0 : i32
    %c0_i32_1 = arith.constant 0 : i32
    return %c0_i32, %c0_i32_0 : i32, i32
  }
  func.func @transform_11(%arg0: i32, %arg1: i32) -> (i32, i32, i32) {
    %c0_i32 = arith.constant 0 : i32
    %c0_i32_0 = arith.constant 0 : i32
    %c0_i32_1 = arith.constant 0 : i32
    %c0_i32_2 = arith.constant 0 : i32
    return %c0_i32, %c0_i32_0, %c0_i32_1 : i32, i32, i32
  }
  func.func @transform_12(%arg0: i32, %arg1: i32) -> (i32, i32, i32) {
    %c0_i32 = arith.constant 0 : i32
    %c0_i32_0 = arith.constant 0 : i32
    %c0_i32_1 = arith.constant 0 : i32
    %c0_i32_2 = arith.constant 0 : i32
    return %c0_i32, %c0_i32_0, %c0_i32_1 : i32, i32, i32
  }
  func.func @transform_13(%arg0: i32, %arg1: i32) -> (i32, i32, i32) {
    %c0_i32 = arith.constant 0 : i32
    %c0_i32_0 = arith.constant 0 : i32
    %c0_i32_1 = arith.constant 0 : i32
    %c0_i32_2 = arith.constant 0 : i32
    return %c0_i32, %c0_i32_0, %c0_i32_1 : i32, i32, i32
  }
  func.func @transform_14(%arg0: i32, %arg1: i32) -> (i32, i32) {
    %c0_i32 = arith.constant 0 : i32
    %c0_i32_0 = arith.constant 0 : i32
    %c0_i32_1 = arith.constant 0 : i32
    return %c0_i32, %c0_i32_0 : i32, i32
  }
  func.func @transform_15(%arg0: i32, %arg1: i32) -> (i32, i32, i32) {
    %c0_i32 = arith.constant 0 : i32
    %c0_i32_0 = arith.constant 0 : i32
    return %arg0, %arg1, %c0_i32 : i32, i32, i32
  }
}

module attributes {stable_mosaic.version = 11 : i64} {
  func.func @_encoder_layer_kernel(%arg0: i32, %arg1: i32, %arg2: memref<1x8x128xf32, #tpu.memory_space<vmem>>, %arg3: memref<1x4x16x32xf32, #tpu.memory_space<vmem>>, %arg4: memref<1x4x16x32xf32, #tpu.memory_space<vmem>>, %arg5: memref<1x128xf32, #tpu.memory_space<vmem>>, %arg6: memref<1x128xf32, #tpu.memory_space<vmem>>, %arg7: memref<4x128x32xf32, #tpu.memory_space<vmem>>, %arg8: memref<4x1x32xf32, #tpu.memory_space<vmem>>, %arg9: memref<128x128xf32, #tpu.memory_space<vmem>>, %arg10: memref<1x128xf32, #tpu.memory_space<vmem>>, %arg11: memref<1x128xf32, #tpu.memory_space<vmem>>, %arg12: memref<1x128xf32, #tpu.memory_space<vmem>>, %arg13: memref<1x128x256xf32, #tpu.memory_space<vmem>>, %arg14: memref<1x1x256xf32, #tpu.memory_space<vmem>>, %arg15: memref<1x256x128xf32, #tpu.memory_space<vmem>>, %arg16: memref<1x128xf32, #tpu.memory_space<vmem>>, %arg17: memref<1x8x128xf32, #tpu.memory_space<vmem>>, %arg18: memref<8x128xf32, #tpu.memory_space<vmem>>) attributes {dimension_semantics = [#tpu.dimension_semantics<parallel>, #tpu.dimension_semantics<parallel>], iteration_bounds = array<i64: 2, 1>, scalar_prefetch = 0 : i64, scratch_operands = 1 : i64, tpu.core_type = #tpu.core_type<tc>, window_params = [{transform_indices = @transform_0, window_bounds = array<i64: 1, 8, 128>}, {transform_indices = @transform_1, window_bounds = array<i64: 1, 4, 16, 32>}, {transform_indices = @transform_2, window_bounds = array<i64: 1, 4, 16, 32>}, {pipeline_mode = #tpu.pipeline_mode<synchronous>, transform_indices = @transform_3, window_bounds = array<i64: 1, 128>}, {pipeline_mode = #tpu.pipeline_mode<synchronous>, transform_indices = @transform_4, window_bounds = array<i64: 1, 128>}, {pipeline_mode = #tpu.pipeline_mode<synchronous>, transform_indices = @transform_5, window_bounds = array<i64: 4, 128, 32>}, {pipeline_mode = #tpu.pipeline_mode<synchronous>, transform_indices = @transform_6, window_bounds = array<i64: 4, 1, 32>}, {pipeline_mode = #tpu.pipeline_mode<synchronous>, transform_indices = @transform_7, window_bounds = array<i64: 128, 128>}, {pipeline_mode = #tpu.pipeline_mode<synchronous>, transform_indices = @transform_8, window_bounds = array<i64: 1, 128>}, {pipeline_mode = #tpu.pipeline_mode<synchronous>, transform_indices = @transform_9, window_bounds = array<i64: 1, 128>}, {pipeline_mode = #tpu.pipeline_mode<synchronous>, transform_indices = @transform_10, window_bounds = array<i64: 1, 128>}, {pipeline_mode = #tpu.pipeline_mode<synchronous>, transform_indices = @transform_11, window_bounds = array<i64: 1, 128, 256>}, {pipeline_mode = #tpu.pipeline_mode<synchronous>, transform_indices = @transform_12, window_bounds = array<i64: 1, 1, 256>}, {pipeline_mode = #tpu.pipeline_mode<synchronous>, transform_indices = @transform_13, window_bounds = array<i64: 1, 256, 128>}, {pipeline_mode = #tpu.pipeline_mode<synchronous>, transform_indices = @transform_14, window_bounds = array<i64: 1, 128>}, {transform_indices = @transform_15, window_bounds = array<i64: 1, 8, 128>}]} {
    %c0 = arith.constant 0 : index
    %c0_0 = arith.constant 0 : index
    %c0_1 = arith.constant 0 : index
    %0 = vector.load %arg2[%c0, %c0_0, %c0_1] : memref<1x8x128xf32, #tpu.memory_space<vmem>>, vector<1x8x128xf32>
    %1 = vector.shape_cast %0 : vector<1x8x128xf32> to vector<8x128xf32>
    %c0_2 = arith.constant 0 : index
    %c0_3 = arith.constant 0 : index
    %2 = vector.load %arg5[%c0_2, %c0_3] : memref<1x128xf32, #tpu.memory_space<vmem>>, vector<1x128xf32>
    %c0_4 = arith.constant 0 : index
    %c0_5 = arith.constant 0 : index
    %3 = vector.load %arg6[%c0_4, %c0_5] : memref<1x128xf32, #tpu.memory_space<vmem>>, vector<1x128xf32>
    %cst = arith.constant dense<0.000000e+00> : vector<8xf32>
    %4 = vector.multi_reduction <add>, %1, %cst [1] : vector<8x128xf32> to vector<8xf32>
    %5 = vector.shape_cast %4 : vector<8xf32> to vector<8x1xf32>
    %cst_6 = arith.constant 1.280000e+02 : f32
    %6 = vector.broadcast %cst_6 : f32 to vector<8x1xf32>
    %7 = arith.divf %5, %6 : vector<8x1xf32>
    %8 = vector.broadcast %7 : vector<8x1xf32> to vector<8x128xf32>
    %9 = arith.subf %1, %8 : vector<8x128xf32>
    %10 = arith.mulf %9, %9 : vector<8x128xf32>
    %cst_7 = arith.constant dense<0.000000e+00> : vector<8xf32>
    %11 = vector.multi_reduction <add>, %10, %cst_7 [1] : vector<8x128xf32> to vector<8xf32>
    %12 = vector.shape_cast %11 : vector<8xf32> to vector<8x1xf32>
    %cst_8 = arith.constant 0.00787401571 : f32
    %13 = vector.broadcast %cst_8 : f32 to vector<8x1xf32>
    %14 = arith.mulf %12, %13 : vector<8x1xf32>
    %15 = math.sqrt %14 : vector<8x1xf32>
    %cst_9 = arith.constant 9.99999997E-7 : f32
    %16 = vector.broadcast %cst_9 : f32 to vector<8x1xf32>
    %17 = arith.addf %15, %16 : vector<8x1xf32>
    %18 = vector.broadcast %17 : vector<8x1xf32> to vector<8x128xf32>
    %19 = arith.divf %9, %18 : vector<8x128xf32>
    %20 = vector.broadcast %2 : vector<1x128xf32> to vector<8x128xf32>
    %21 = arith.mulf %20, %19 : vector<8x128xf32>
    %22 = vector.broadcast %3 : vector<1x128xf32> to vector<8x128xf32>
    %23 = arith.addf %21, %22 : vector<8x128xf32>
    %c0_10 = arith.constant 0 : index
    %c0_11 = arith.constant 0 : index
    %c0_12 = arith.constant 0 : index
    %24 = vector.load %arg7[%c0_10, %c0_11, %c0_12] : memref<4x128x32xf32, #tpu.memory_space<vmem>>, vector<1x128x32xf32>
    %25 = vector.shape_cast %24 : vector<1x128x32xf32> to vector<128x32xf32>
    %cst_13 = arith.constant dense<0.000000e+00> : vector<8x32xf32>
    %26 = tpu.matmul %23, %25, %cst_13 {dimension_numbers = #tpu.dot_dimension_numbers<[1], [0], [0], [1], [0, 0, 1, 1], [], []>} : vector<8x128xf32>, vector<128x32xf32>, vector<8x32xf32> -> vector<8x32xf32>
    %c0_14 = arith.constant 0 : index
    %c0_15 = arith.constant 0 : index
    %c0_16 = arith.constant 0 : index
    %27 = vector.load %arg8[%c0_14, %c0_15, %c0_16] : memref<4x1x32xf32, #tpu.memory_space<vmem>>, vector<1x1x32xf32>
    %28 = vector.shape_cast %27 : vector<1x1x32xf32> to vector<1x32xf32>
    %29 = vector.broadcast %28 : vector<1x32xf32> to vector<8x32xf32>
    %30 = arith.addf %26, %29 : vector<8x32xf32>
    %c0_17 = arith.constant 0 : index
    %c0_18 = arith.constant 0 : index
    %c0_19 = arith.constant 0 : index
    %c0_20 = arith.constant 0 : index
    %31 = vector.load %arg3[%c0_17, %c0_18, %c0_19, %c0_20] : memref<1x4x16x32xf32, #tpu.memory_space<vmem>>, vector<1x1x16x32xf32>
    %32 = vector.shape_cast %31 : vector<1x1x16x32xf32> to vector<16x32xf32>
    %c0_21 = arith.constant 0 : index
    %c0_22 = arith.constant 0 : index
    %c0_23 = arith.constant 0 : index
    %c0_24 = arith.constant 0 : index
    %33 = vector.load %arg4[%c0_21, %c0_22, %c0_23, %c0_24] : memref<1x4x16x32xf32, #tpu.memory_space<vmem>>, vector<1x1x16x32xf32>
    %34 = vector.shape_cast %33 : vector<1x1x16x32xf32> to vector<16x32xf32>
    %cst_25 = arith.constant dense<0.000000e+00> : vector<8x16xf32>
    %35 = tpu.matmul %30, %32, %cst_25 {dimension_numbers = #tpu.dot_dimension_numbers<[1], [1], [0], [0], [0, 0, 1, 0], [], []>} : vector<8x32xf32>, vector<16x32xf32>, vector<8x16xf32> -> vector<8x16xf32>
    %cst_26 = arith.constant dense<0xFF800000> : vector<8xf32>
    %36 = vector.multi_reduction <maximumf>, %35, %cst_26 [1] : vector<8x16xf32> to vector<8xf32>
    %37 = vector.shape_cast %36 : vector<8xf32> to vector<8x1xf32>
    %38 = vector.broadcast %37 : vector<8x1xf32> to vector<8x16xf32>
    %39 = arith.subf %35, %38 : vector<8x16xf32>
    %40 = math.exp %39 : vector<8x16xf32>
    %cst_27 = arith.constant dense<0.000000e+00> : vector<8xf32>
    %41 = vector.multi_reduction <add>, %40, %cst_27 [1] : vector<8x16xf32> to vector<8xf32>
    %42 = vector.shape_cast %41 : vector<8xf32> to vector<8x1xf32>
    %cst_28 = arith.constant dense<0.000000e+00> : vector<8x32xf32>
    %43 = tpu.matmul %40, %34, %cst_28 {dimension_numbers = #tpu.dot_dimension_numbers<[1], [0], [0], [1], [0, 0, 1, 1], [], []>} : vector<8x16xf32>, vector<16x32xf32>, vector<8x32xf32> -> vector<8x32xf32>
    %44 = vector.broadcast %42 : vector<8x1xf32> to vector<8x32xf32>
    %45 = arith.divf %43, %44 : vector<8x32xf32>
    %c0_29 = arith.constant 0 : index
    %c0_30 = arith.constant 0 : index
    %46 = vector.load %arg18[%c0_29, %c0_30] : memref<8x128xf32, #tpu.memory_space<vmem>>, vector<8x32xf32>
    tpu.vector_store %arg18[%c0_29, %c0_30], %45 {strides = array<i32>} : memref<8x128xf32, #tpu.memory_space<vmem>>, vector<8x32xf32>,
    %c1 = arith.constant 1 : index
    %c0_31 = arith.constant 0 : index
    %c0_32 = arith.constant 0 : index
    %47 = vector.load %arg7[%c1, %c0_31, %c0_32] : memref<4x128x32xf32, #tpu.memory_space<vmem>>, vector<1x128x32xf32>
    %48 = vector.shape_cast %47 : vector<1x128x32xf32> to vector<128x32xf32>
    %cst_33 = arith.constant dense<0.000000e+00> : vector<8x32xf32>
    %49 = tpu.matmul %23, %48, %cst_33 {dimension_numbers = #tpu.dot_dimension_numbers<[1], [0], [0], [1], [0, 0, 1, 1], [], []>} : vector<8x128xf32>, vector<128x32xf32>, vector<8x32xf32> -> vector<8x32xf32>
    %c1_34 = arith.constant 1 : index
    %c0_35 = arith.constant 0 : index
    %c0_36 = arith.constant 0 : index
    %50 = vector.load %arg8[%c1_34, %c0_35, %c0_36] : memref<4x1x32xf32, #tpu.memory_space<vmem>>, vector<1x1x32xf32>
    %51 = vector.shape_cast %50 : vector<1x1x32xf32> to vector<1x32xf32>
    %52 = vector.broadcast %51 : vector<1x32xf32> to vector<8x32xf32>
    %53 = arith.addf %49, %52 : vector<8x32xf32>
    %c0_37 = arith.constant 0 : index
    %c1_38 = arith.constant 1 : index
    %c0_39 = arith.constant 0 : index
    %c0_40 = arith.constant 0 : index
    %54 = vector.load %arg3[%c0_37, %c1_38, %c0_39, %c0_40] : memref<1x4x16x32xf32, #tpu.memory_space<vmem>>, vector<1x1x16x32xf32>
    %55 = vector.shape_cast %54 : vector<1x1x16x32xf32> to vector<16x32xf32>
    %c0_41 = arith.constant 0 : index
    %c1_42 = arith.constant 1 : index
    %c0_43 = arith.constant 0 : index
    %c0_44 = arith.constant 0 : index
    %56 = vector.load %arg4[%c0_41, %c1_42, %c0_43, %c0_44] : memref<1x4x16x32xf32, #tpu.memory_space<vmem>>, vector<1x1x16x32xf32>
    %57 = vector.shape_cast %56 : vector<1x1x16x32xf32> to vector<16x32xf32>
    %cst_45 = arith.constant dense<0.000000e+00> : vector<8x16xf32>
    %58 = tpu.matmul %53, %55, %cst_45 {dimension_numbers = #tpu.dot_dimension_numbers<[1], [1], [0], [0], [0, 0, 1, 0], [], []>} : vector<8x32xf32>, vector<16x32xf32>, vector<8x16xf32> -> vector<8x16xf32>
    %cst_46 = arith.constant dense<0xFF800000> : vector<8xf32>
    %59 = vector.multi_reduction <maximumf>, %58, %cst_46 [1] : vector<8x16xf32> to vector<8xf32>
    %60 = vector.shape_cast %59 : vector<8xf32> to vector<8x1xf32>
    %61 = vector.broadcast %60 : vector<8x1xf32> to vector<8x16xf32>
    %62 = arith.subf %58, %61 : vector<8x16xf32>
    %63 = math.exp %62 : vector<8x16xf32>
    %cst_47 = arith.constant dense<0.000000e+00> : vector<8xf32>
    %64 = vector.multi_reduction <add>, %63, %cst_47 [1] : vector<8x16xf32> to vector<8xf32>
    %65 = vector.shape_cast %64 : vector<8xf32> to vector<8x1xf32>
    %cst_48 = arith.constant dense<0.000000e+00> : vector<8x32xf32>
    %66 = tpu.matmul %63, %57, %cst_48 {dimension_numbers = #tpu.dot_dimension_numbers<[1], [0], [0], [1], [0, 0, 1, 1], [], []>} : vector<8x16xf32>, vector<16x32xf32>, vector<8x32xf32> -> vector<8x32xf32>
    %67 = vector.broadcast %65 : vector<8x1xf32> to vector<8x32xf32>
    %68 = arith.divf %66, %67 : vector<8x32xf32>
    %c0_49 = arith.constant 0 : index
    %c32 = arith.constant 32 : index
    %69 = vector.load %arg18[%c0_49, %c32] : memref<8x128xf32, #tpu.memory_space<vmem>>, vector<8x32xf32>
    tpu.vector_store %arg18[%c0_49, %c32], %68 {strides = array<i32>} : memref<8x128xf32, #tpu.memory_space<vmem>>, vector<8x32xf32>,
    %c2 = arith.constant 2 : index
    %c0_50 = arith.constant 0 : index
    %c0_51 = arith.constant 0 : index
    %70 = vector.load %arg7[%c2, %c0_50, %c0_51] : memref<4x128x32xf32, #tpu.memory_space<vmem>>, vector<1x128x32xf32>
    %71 = vector.shape_cast %70 : vector<1x128x32xf32> to vector<128x32xf32>
    %cst_52 = arith.constant dense<0.000000e+00> : vector<8x32xf32>
    %72 = tpu.matmul %23, %71, %cst_52 {dimension_numbers = #tpu.dot_dimension_numbers<[1], [0], [0], [1], [0, 0, 1, 1], [], []>} : vector<8x128xf32>, vector<128x32xf32>, vector<8x32xf32> -> vector<8x32xf32>
    %c2_53 = arith.constant 2 : index
    %c0_54 = arith.constant 0 : index
    %c0_55 = arith.constant 0 : index
    %73 = vector.load %arg8[%c2_53, %c0_54, %c0_55] : memref<4x1x32xf32, #tpu.memory_space<vmem>>, vector<1x1x32xf32>
    %74 = vector.shape_cast %73 : vector<1x1x32xf32> to vector<1x32xf32>
    %75 = vector.broadcast %74 : vector<1x32xf32> to vector<8x32xf32>
    %76 = arith.addf %72, %75 : vector<8x32xf32>
    %c0_56 = arith.constant 0 : index
    %c2_57 = arith.constant 2 : index
    %c0_58 = arith.constant 0 : index
    %c0_59 = arith.constant 0 : index
    %77 = vector.load %arg3[%c0_56, %c2_57, %c0_58, %c0_59] : memref<1x4x16x32xf32, #tpu.memory_space<vmem>>, vector<1x1x16x32xf32>
    %78 = vector.shape_cast %77 : vector<1x1x16x32xf32> to vector<16x32xf32>
    %c0_60 = arith.constant 0 : index
    %c2_61 = arith.constant 2 : index
    %c0_62 = arith.constant 0 : index
    %c0_63 = arith.constant 0 : index
    %79 = vector.load %arg4[%c0_60, %c2_61, %c0_62, %c0_63] : memref<1x4x16x32xf32, #tpu.memory_space<vmem>>, vector<1x1x16x32xf32>
    %80 = vector.shape_cast %79 : vector<1x1x16x32xf32> to vector<16x32xf32>
    %cst_64 = arith.constant dense<0.000000e+00> : vector<8x16xf32>
    %81 = tpu.matmul %76, %78, %cst_64 {dimension_numbers = #tpu.dot_dimension_numbers<[1], [1], [0], [0], [0, 0, 1, 0], [], []>} : vector<8x32xf32>, vector<16x32xf32>, vector<8x16xf32> -> vector<8x16xf32>
    %cst_65 = arith.constant dense<0xFF800000> : vector<8xf32>
    %82 = vector.multi_reduction <maximumf>, %81, %cst_65 [1] : vector<8x16xf32> to vector<8xf32>
    %83 = vector.shape_cast %82 : vector<8xf32> to vector<8x1xf32>
    %84 = vector.broadcast %83 : vector<8x1xf32> to vector<8x16xf32>
    %85 = arith.subf %81, %84 : vector<8x16xf32>
    %86 = math.exp %85 : vector<8x16xf32>
    %cst_66 = arith.constant dense<0.000000e+00> : vector<8xf32>
    %87 = vector.multi_reduction <add>, %86, %cst_66 [1] : vector<8x16xf32> to vector<8xf32>
    %88 = vector.shape_cast %87 : vector<8xf32> to vector<8x1xf32>
    %cst_67 = arith.constant dense<0.000000e+00> : vector<8x32xf32>
    %89 = tpu.matmul %86, %80, %cst_67 {dimension_numbers = #tpu.dot_dimension_numbers<[1], [0], [0], [1], [0, 0, 1, 1], [], []>} : vector<8x16xf32>, vector<16x32xf32>, vector<8x32xf32> -> vector<8x32xf32>
    %90 = vector.broadcast %88 : vector<8x1xf32> to vector<8x32xf32>
    %91 = arith.divf %89, %90 : vector<8x32xf32>
    %c0_68 = arith.constant 0 : index
    %c64 = arith.constant 64 : index
    %92 = vector.load %arg18[%c0_68, %c64] : memref<8x128xf32, #tpu.memory_space<vmem>>, vector<8x32xf32>
    tpu.vector_store %arg18[%c0_68, %c64], %91 {strides = array<i32>} : memref<8x128xf32, #tpu.memory_space<vmem>>, vector<8x32xf32>,
    %c3 = arith.constant 3 : index
    %c0_69 = arith.constant 0 : index
    %c0_70 = arith.constant 0 : index
    %93 = vector.load %arg7[%c3, %c0_69, %c0_70] : memref<4x128x32xf32, #tpu.memory_space<vmem>>, vector<1x128x32xf32>
    %94 = vector.shape_cast %93 : vector<1x128x32xf32> to vector<128x32xf32>
    %cst_71 = arith.constant dense<0.000000e+00> : vector<8x32xf32>
    %95 = tpu.matmul %23, %94, %cst_71 {dimension_numbers = #tpu.dot_dimension_numbers<[1], [0], [0], [1], [0, 0, 1, 1], [], []>} : vector<8x128xf32>, vector<128x32xf32>, vector<8x32xf32> -> vector<8x32xf32>
    %c3_72 = arith.constant 3 : index
    %c0_73 = arith.constant 0 : index
    %c0_74 = arith.constant 0 : index
    %96 = vector.load %arg8[%c3_72, %c0_73, %c0_74] : memref<4x1x32xf32, #tpu.memory_space<vmem>>, vector<1x1x32xf32>
    %97 = vector.shape_cast %96 : vector<1x1x32xf32> to vector<1x32xf32>
    %98 = vector.broadcast %97 : vector<1x32xf32> to vector<8x32xf32>
    %99 = arith.addf %95, %98 : vector<8x32xf32>
    %c0_75 = arith.constant 0 : index
    %c3_76 = arith.constant 3 : index
    %c0_77 = arith.constant 0 : index
    %c0_78 = arith.constant 0 : index
    %100 = vector.load %arg3[%c0_75, %c3_76, %c0_77, %c0_78] : memref<1x4x16x32xf32, #tpu.memory_space<vmem>>, vector<1x1x16x32xf32>
    %101 = vector.shape_cast %100 : vector<1x1x16x32xf32> to vector<16x32xf32>
    %c0_79 = arith.constant 0 : index
    %c3_80 = arith.constant 3 : index
    %c0_81 = arith.constant 0 : index
    %c0_82 = arith.constant 0 : index
    %102 = vector.load %arg4[%c0_79, %c3_80, %c0_81, %c0_82] : memref<1x4x16x32xf32, #tpu.memory_space<vmem>>, vector<1x1x16x32xf32>
    %103 = vector.shape_cast %102 : vector<1x1x16x32xf32> to vector<16x32xf32>
    %cst_83 = arith.constant dense<0.000000e+00> : vector<8x16xf32>
    %104 = tpu.matmul %99, %101, %cst_83 {dimension_numbers = #tpu.dot_dimension_numbers<[1], [1], [0], [0], [0, 0, 1, 0], [], []>} : vector<8x32xf32>, vector<16x32xf32>, vector<8x16xf32> -> vector<8x16xf32>
    %cst_84 = arith.constant dense<0xFF800000> : vector<8xf32>
    %105 = vector.multi_reduction <maximumf>, %104, %cst_84 [1] : vector<8x16xf32> to vector<8xf32>
    %106 = vector.shape_cast %105 : vector<8xf32> to vector<8x1xf32>
    %107 = vector.broadcast %106 : vector<8x1xf32> to vector<8x16xf32>
    %108 = arith.subf %104, %107 : vector<8x16xf32>
    %109 = math.exp %108 : vector<8x16xf32>
    %cst_85 = arith.constant dense<0.000000e+00> : vector<8xf32>
    %110 = vector.multi_reduction <add>, %109, %cst_85 [1] : vector<8x16xf32> to vector<8xf32>
    %111 = vector.shape_cast %110 : vector<8xf32> to vector<8x1xf32>
    %cst_86 = arith.constant dense<0.000000e+00> : vector<8x32xf32>
    %112 = tpu.matmul %109, %103, %cst_86 {dimension_numbers = #tpu.dot_dimension_numbers<[1], [0], [0], [1], [0, 0, 1, 1], [], []>} : vector<8x16xf32>, vector<16x32xf32>, vector<8x32xf32> -> vector<8x32xf32>
    %113 = vector.broadcast %111 : vector<8x1xf32> to vector<8x32xf32>
    %114 = arith.divf %112, %113 : vector<8x32xf32>
    %c0_87 = arith.constant 0 : index
    %c96 = arith.constant 96 : index
    %115 = vector.load %arg18[%c0_87, %c96] : memref<8x128xf32, #tpu.memory_space<vmem>>, vector<8x32xf32>
    tpu.vector_store %arg18[%c0_87, %c96], %114 {strides = array<i32>} : memref<8x128xf32, #tpu.memory_space<vmem>>, vector<8x32xf32>,
    %c0_88 = arith.constant 0 : index
    %c0_89 = arith.constant 0 : index
    %116 = vector.load %arg18[%c0_88, %c0_89] : memref<8x128xf32, #tpu.memory_space<vmem>>, vector<8x128xf32>
    %c0_90 = arith.constant 0 : index
    %c0_91 = arith.constant 0 : index
    %117 = vector.load %arg9[%c0_90, %c0_91] : memref<128x128xf32, #tpu.memory_space<vmem>>, vector<128x128xf32>
    %cst_92 = arith.constant dense<0.000000e+00> : vector<8x128xf32>
    %118 = tpu.matmul %116, %117, %cst_92 {dimension_numbers = #tpu.dot_dimension_numbers<[1], [0], [0], [1], [0, 0, 1, 1], [], []>} : vector<8x128xf32>, vector<128x128xf32>, vector<8x128xf32> -> vector<8x128xf32>
    %c0_93 = arith.constant 0 : index
    %c0_94 = arith.constant 0 : index
    %119 = vector.load %arg10[%c0_93, %c0_94] : memref<1x128xf32, #tpu.memory_space<vmem>>, vector<1x128xf32>
    %120 = vector.broadcast %119 : vector<1x128xf32> to vector<8x128xf32>
    %121 = arith.addf %118, %120 : vector<8x128xf32>
    %122 = arith.addf %1, %121 : vector<8x128xf32>
    %c0_95 = arith.constant 0 : index
    %c0_96 = arith.constant 0 : index
    %123 = vector.load %arg11[%c0_95, %c0_96] : memref<1x128xf32, #tpu.memory_space<vmem>>, vector<1x128xf32>
    %c0_97 = arith.constant 0 : index
    %c0_98 = arith.constant 0 : index
    %124 = vector.load %arg12[%c0_97, %c0_98] : memref<1x128xf32, #tpu.memory_space<vmem>>, vector<1x128xf32>
    %cst_99 = arith.constant dense<0.000000e+00> : vector<8xf32>
    %125 = vector.multi_reduction <add>, %122, %cst_99 [1] : vector<8x128xf32> to vector<8xf32>
    %126 = vector.shape_cast %125 : vector<8xf32> to vector<8x1xf32>
    %cst_100 = arith.constant 1.280000e+02 : f32
    %127 = vector.broadcast %cst_100 : f32 to vector<8x1xf32>
    %128 = arith.divf %126, %127 : vector<8x1xf32>
    %129 = vector.broadcast %128 : vector<8x1xf32> to vector<8x128xf32>
    %130 = arith.subf %122, %129 : vector<8x128xf32>
    %131 = arith.mulf %130, %130 : vector<8x128xf32>
    %cst_101 = arith.constant dense<0.000000e+00> : vector<8xf32>
    %132 = vector.multi_reduction <add>, %131, %cst_101 [1] : vector<8x128xf32> to vector<8xf32>
    %133 = vector.shape_cast %132 : vector<8xf32> to vector<8x1xf32>
    %cst_102 = arith.constant 0.00787401571 : f32
    %134 = vector.broadcast %cst_102 : f32 to vector<8x1xf32>
    %135 = arith.mulf %133, %134 : vector<8x1xf32>
    %136 = math.sqrt %135 : vector<8x1xf32>
    %cst_103 = arith.constant 9.99999997E-7 : f32
    %137 = vector.broadcast %cst_103 : f32 to vector<8x1xf32>
    %138 = arith.addf %136, %137 : vector<8x1xf32>
    %139 = vector.broadcast %138 : vector<8x1xf32> to vector<8x128xf32>
    %140 = arith.divf %130, %139 : vector<8x128xf32>
    %141 = vector.broadcast %123 : vector<1x128xf32> to vector<8x128xf32>
    %142 = arith.mulf %141, %140 : vector<8x128xf32>
    %143 = vector.broadcast %124 : vector<1x128xf32> to vector<8x128xf32>
    %144 = arith.addf %142, %143 : vector<8x128xf32>
    %cst_104 = arith.constant 0.000000e+00 : f32
    %145 = vector.broadcast %cst_104 : f32 to vector<8x128xf32>
    %c0_i32 = arith.constant 0 : i32
    %146 = arith.index_cast %c0_i32 : i32 to index
    %c0_105 = arith.constant 0 : index
    %c0_106 = arith.constant 0 : index
    %147 = vector.load %arg13[%146, %c0_105, %c0_106] : memref<1x128x256xf32, #tpu.memory_space<vmem>>, vector<1x128x256xf32>
    %148 = vector.shape_cast %147 : vector<1x128x256xf32> to vector<128x256xf32>
    %cst_107 = arith.constant dense<0.000000e+00> : vector<8x256xf32>
    %149 = tpu.matmul %144, %148, %cst_107 {dimension_numbers = #tpu.dot_dimension_numbers<[1], [0], [0], [1], [0, 0, 1, 1], [], []>} : vector<8x128xf32>, vector<128x256xf32>, vector<8x256xf32> -> vector<8x256xf32>
    %150 = arith.index_cast %c0_i32 : i32 to index
    %c0_108 = arith.constant 0 : index
    %c0_109 = arith.constant 0 : index
    %151 = vector.load %arg14[%150, %c0_108, %c0_109] : memref<1x1x256xf32, #tpu.memory_space<vmem>>, vector<1x1x256xf32>
    %152 = vector.shape_cast %151 : vector<1x1x256xf32> to vector<1x256xf32>
    %153 = vector.broadcast %152 : vector<1x256xf32> to vector<8x256xf32>
    %154 = arith.addf %149, %153 : vector<8x256xf32>
    %cst_110 = arith.constant 0.000000e+00 : f32
    %155 = vector.broadcast %cst_110 : f32 to vector<8x256xf32>
    %156 = arith.maximumf %154, %155 : vector<8x256xf32>
    %157 = arith.index_cast %c0_i32 : i32 to index
    %c0_111 = arith.constant 0 : index
    %c0_112 = arith.constant 0 : index
    %158 = vector.load %arg15[%157, %c0_111, %c0_112] : memref<1x256x128xf32, #tpu.memory_space<vmem>>, vector<1x256x128xf32>
    %159 = vector.shape_cast %158 : vector<1x256x128xf32> to vector<256x128xf32>
    %cst_113 = arith.constant dense<0.000000e+00> : vector<8x128xf32>
    %160 = tpu.matmul %156, %159, %cst_113 {dimension_numbers = #tpu.dot_dimension_numbers<[1], [0], [0], [1], [0, 0, 1, 1], [], []>} : vector<8x256xf32>, vector<256x128xf32>, vector<8x128xf32> -> vector<8x128xf32>
    %161 = arith.addf %145, %160 : vector<8x128xf32>
    %c1_i32 = arith.constant 1 : i32
    %162 = arith.addf %122, %161 : vector<8x128xf32>
    %c0_114 = arith.constant 0 : index
    %c0_115 = arith.constant 0 : index
    %163 = vector.load %arg16[%c0_114, %c0_115] : memref<1x128xf32, #tpu.memory_space<vmem>>, vector<1x128xf32>
    %164 = vector.broadcast %163 : vector<1x128xf32> to vector<8x128xf32>
    %165 = arith.addf %162, %164 : vector<8x128xf32>
    %c0_116 = arith.constant 0 : index
    %c0_117 = arith.constant 0 : index
    %c0_118 = arith.constant 0 : index
    %166 = vector.load %arg17[%c0_116, %c0_117, %c0_118] : memref<1x8x128xf32, #tpu.memory_space<vmem>>, vector<1x8x128xf32>
    %167 = vector.shape_cast %166 : vector<1x8x128xf32> to vector<8x128xf32>
    %168 = vector.shape_cast %165 : vector<8x128xf32> to vector<1x8x128xf32>
    tpu.vector_store %arg17[%c0_116, %c0_117, %c0_118], %168 {strides = array<i32>} : memref<1x8x128xf32, #tpu.memory_space<vmem>>, vector<1x8x128xf32>,
    return
  }
  func.func @transform_0(%arg0: i32, %arg1: i32) -> (i32, i32, i32) {
    %c0_i32 = arith.constant 0 : i32
    %c0_i32_0 = arith.constant 0 : i32
    return %arg0, %arg1, %c0_i32 : i32, i32, i32
  }
  func.func @transform_1(%arg0: i32, %arg1: i32) -> (i32, i32, i32, i32) {
    %c0_i32 = arith.constant 0 : i32
    %c0_i32_0 = arith.constant 0 : i32
    %c0_i32_1 = arith.constant 0 : i32
    %c0_i32_2 = arith.constant 0 : i32
    return %arg0, %c0_i32, %c0_i32_0, %c0_i32_1 : i32, i32, i32, i32
  }
  func.func @transform_2(%arg0: i32, %arg1: i32) -> (i32, i32, i32, i32) {
    %c0_i32 = arith.constant 0 : i32
    %c0_i32_0 = arith.constant 0 : i32
    %c0_i32_1 = arith.constant 0 : i32
    %c0_i32_2 = arith.constant 0 : i32
    return %arg0, %c0_i32, %c0_i32_0, %c0_i32_1 : i32, i32, i32, i32
  }
  func.func @transform_3(%arg0: i32, %arg1: i32) -> (i32, i32) {
    %c0_i32 = arith.constant 0 : i32
    %c0_i32_0 = arith.constant 0 : i32
    %c0_i32_1 = arith.constant 0 : i32
    return %c0_i32, %c0_i32_0 : i32, i32
  }
  func.func @transform_4(%arg0: i32, %arg1: i32) -> (i32, i32) {
    %c0_i32 = arith.constant 0 : i32
    %c0_i32_0 = arith.constant 0 : i32
    %c0_i32_1 = arith.constant 0 : i32
    return %c0_i32, %c0_i32_0 : i32, i32
  }
  func.func @transform_5(%arg0: i32, %arg1: i32) -> (i32, i32, i32) {
    %c0_i32 = arith.constant 0 : i32
    %c0_i32_0 = arith.constant 0 : i32
    %c0_i32_1 = arith.constant 0 : i32
    %c0_i32_2 = arith.constant 0 : i32
    return %c0_i32, %c0_i32_0, %c0_i32_1 : i32, i32, i32
  }
  func.func @transform_6(%arg0: i32, %arg1: i32) -> (i32, i32, i32) {
    %c0_i32 = arith.constant 0 : i32
    %c0_i32_0 = arith.constant 0 : i32
    %c0_i32_1 = arith.constant 0 : i32
    %c0_i32_2 = arith.constant 0 : i32
    return %c0_i32, %c0_i32_0, %c0_i32_1 : i32, i32, i32
  }
  func.func @transform_7(%arg0: i32, %arg1: i32) -> (i32, i32) {
    %c0_i32 = arith.constant 0 : i32
    %c0_i32_0 = arith.constant 0 : i32
    %c0_i32_1 = arith.constant 0 : i32
    return %c0_i32, %c0_i32_0 : i32, i32
  }
  func.func @transform_8(%arg0: i32, %arg1: i32) -> (i32, i32) {
    %c0_i32 = arith.constant 0 : i32
    %c0_i32_0 = arith.constant 0 : i32
    %c0_i32_1 = arith.constant 0 : i32
    return %c0_i32, %c0_i32_0 : i32, i32
  }
  func.func @transform_9(%arg0: i32, %arg1: i32) -> (i32, i32) {
    %c0_i32 = arith.constant 0 : i32
    %c0_i32_0 = arith.constant 0 : i32
    %c0_i32_1 = arith.constant 0 : i32
    return %c0_i32, %c0_i32_0 : i32, i32
  }
  func.func @transform_10(%arg0: i32, %arg1: i32) -> (i32, i32) {
    %c0_i32 = arith.constant 0 : i32
    %c0_i32_0 = arith.constant 0 : i32
    %c0_i32_1 = arith.constant 0 : i32
    return %c0_i32, %c0_i32_0 : i32, i32
  }
  func.func @transform_11(%arg0: i32, %arg1: i32) -> (i32, i32, i32) {
    %c0_i32 = arith.constant 0 : i32
    %c0_i32_0 = arith.constant 0 : i32
    %c0_i32_1 = arith.constant 0 : i32
    %c0_i32_2 = arith.constant 0 : i32
    return %c0_i32, %c0_i32_0, %c0_i32_1 : i32, i32, i32
  }
  func.func @transform_12(%arg0: i32, %arg1: i32) -> (i32, i32, i32) {
    %c0_i32 = arith.constant 0 : i32
    %c0_i32_0 = arith.constant 0 : i32
    %c0_i32_1 = arith.constant 0 : i32
    %c0_i32_2 = arith.constant 0 : i32
    return %c0_i32, %c0_i32_0, %c0_i32_1 : i32, i32, i32
  }
  func.func @transform_13(%arg0: i32, %arg1: i32) -> (i32, i32, i32) {
    %c0_i32 = arith.constant 0 : i32
    %c0_i32_0 = arith.constant 0 : i32
    %c0_i32_1 = arith.constant 0 : i32
    %c0_i32_2 = arith.constant 0 : i32
    return %c0_i32, %c0_i32_0, %c0_i32_1 : i32, i32, i32
  }
  func.func @transform_14(%arg0: i32, %arg1: i32) -> (i32, i32) {
    %c0_i32 = arith.constant 0 : i32
    %c0_i32_0 = arith.constant 0 : i32
    %c0_i32_1 = arith.constant 0 : i32
    return %c0_i32, %c0_i32_0 : i32, i32
  }
  func.func @transform_15(%arg0: i32, %arg1: i32) -> (i32, i32, i32) {
    %c0_i32 = arith.constant 0 : i32
    %c0_i32_0 = arith.constant 0 : i32
    return %arg0, %arg1, %c0_i32 : i32, i32, i32
  }
}

</mosaic_0001>

<bundles_post_ra>
// kernel: tpu_custom_call.1
= control target key start
LH: loop header
LB: loop body
LE: loop exit
PB: predicated region body
PF: predicated region fallthrough
CT: control target
= control target key end

     0   :  { %s4749_s0 = inlined_call_operand.hbm [shape: f32[2,8,128], index: 0, kind: input, shape index: {}]   ;;  %s4750_s1 = inlined_call_operand.hbm [shape: f32[2,4,16,32], index: 1, kind: input, shape index: {}]   ;;  %s4751_s2 = inlined_call_operand.hbm [shape: f32[2,4,16,32], index: 2, kind: input, shape index: {}]   ;;  %s4752_s3 = inlined_call_operand.hbm [shape: f32[1,128], index: 3, kind: input, shape index: {}]   ;;  %s4753_s4 = inlined_call_operand.hbm [shape: f32[1,128], index: 4, kind: input, shape index: {}]   ;;  %s4754_s5 = inlined_call_operand.hbm [shape: f32[4,128,32], index: 5, kind: input, shape index: {}]   ;;  %s4755_s6 = inlined_call_operand.hbm [shape: f32[4,1,32], index: 6, kind: input, shape index: {}]   ;;  %s4756_s7 = inlined_call_operand.hbm [shape: f32[128,128], index: 7, kind: input, shape index: {}]   ;;  %s4757_s8 = inlined_call_operand.hbm [shape: f32[1,128], index: 8, kind: input, shape index: {}]   ;;  %s4758_s9 = inlined_call_operand.hbm [shape: f32[1,128], index: 9, kind: input, shape index: {}]   ;;  %s4759_s10 = inlined_call_operand.hbm [shape: f32[1,128], index: 10, kind: input, shape index: {}]   ;;  %s4760_s11 = inlined_call_operand.hbm [shape: f32[1,128,256], index: 11, kind: input, shape index: {}]   ;;  %s4761_s12 = inlined_call_operand.hbm [shape: f32[1,1,256], index: 12, kind: input, shape index: {}]   ;;  %s4762_s13 = inlined_call_operand.hbm [shape: f32[1,256,128], index: 13, kind: input, shape index: {}]   ;;  %s4763_s14 = inlined_call_operand.hbm [shape: f32[1,128], index: 14, kind: input, shape index: {}]   ;;  %s4764_s15 = inlined_call_operand.hbm [shape: f32[2,8,128], index: 15, kind: output, shape index: {}]  }
   0x1   :  { %4800 = sst [smem:[#allocation47_spill]] %s4749_s0 }
   0x2   :  { %4801 = sst [smem:[#allocation48_spill]] %s4750_s1 }
   0x3   :  { %4802 = sst [smem:[#allocation49_spill]] %s4752_s3 }
   0x4   :  { %4803 = sst [smem:[#allocation50_spill]] %s4753_s4 }
   0x5   :  { %4804 = sst [smem:[#allocation51_spill]] %s4754_s5 }
   0x6   :  { %4805 = sst [smem:[#allocation52_spill]] %s4756_s7 }
   0x7   :  { %4806 = sst [smem:[#allocation53_spill]] %s4758_s9 }
   0x8   :  { %4807 = sst [smem:[#allocation54_spill]] %s4759_s10 }
   0x9   :  { %4808 = sst [smem:[#allocation55_spill]] %s4760_s11 }
   0xa   :  { %4809 = sst [smem:[#allocation56_spill]] %s4761_s12 }
   0xb   :  { %4810 = sst [smem:[#allocation57_spill]] %s4762_s13 }
   0xc   :  { %4811 = sst [smem:[#allocation58_spill]] %s4763_s14 }
   0xd   :  { %4812 = sst [smem:[#allocation59_spill]] %s4764_s15 }
   0xe   :  { %20 = vsyncpa [#allocation4], 0 }
   0xf   :  { %22 = vsyncpa [#allocation4 + $0x1], 0 }
  0x10   :  { %23 = vsyncpa [#allocation7], 0 }
  0x11   :  { %25 = vsyncpa [#allocation7 + $0x1], 0 }
  0x12   :  { %26 = vsyncpa [#allocation10], 0 }
  0x13   :  { %27 = vsyncpa [#allocation13], 0 }
  0x14   :  { %28 = vsyncpa [#allocation16], 0 }
  0x15   :  { %29 = vsyncpa [#allocation19], 0 }
  0x16   :  { %30 = vsyncpa [#allocation22], 0 }
  0x17   :  { %31 = vsyncpa [#allocation25], 0 }
  0x18   :  { %32 = vsyncpa [#allocation5], 0 }
  0x19   :  { %34 = vsyncpa [#allocation5 + $0x1], 0  ;;  %s4028_s18 = smov 0   ;;  %s4030_s19 = smov 0  }
  0x1a   :  { %s4032_s20 = smov 0   ;;  %s4034_s21 = smov 0  }
  0x1b   :  { %s4036_s22 = smov 0   ;;  %s4038_s23 = smov 0  }
  0x1c LB: > { %4813 = sst [smem:[#allocation37_spill]] %s3899_s18  ;;  %s4059_s24 = sadd.s32 4294967295, %s3919_s23   ;;  %s3919_s23 = sphi %s4038_s23, %s40_s23   ;;  %s3915_s22 = sphi %s4036_s22, %s4888_s22   ;;  %s3911_s21 = sphi %s4034_s21, %s4887_s21   ;;  %s3907_s20 = sphi %s4032_s20, %s4883_s20   ;;  %s3903_s19 = sphi %s4030_s19, %s4886_s19   ;;  %s3899_s18 = sphi %s4028_s18, %s4885_s18  }
  0x1d   : > { %4814 = sst [smem:[#allocation38_spill]] %s3907_s20  ;;  %p2485_p0 = scmp.ge.s32.totalorder %s3919_s23, 1 }
  0x1e   : > { %4815 = sst [smem:[#allocation39_spill]] %s3911_s21  ;;  %p4769_p1 = scmp.eq.s32.totalorder %s4059_s24, 0 }
  0x1f   : > { %4816 = sst [smem:[#allocation40_spill]] %s3919_s23  ;;  %p417_p2 = scmp.lt.s32.totalorder %s3919_s23, 3 }
  0x20   : > { %4817 = sst [smem:[#allocation41_spill]] %s4059_s24  ;;  %s3921_s26 = smov [#allocation9]  }
  0x21   : > { %p4064_p3 = pnand %p2485_p0, %p417_p2  ;;  %s430_s27 = sshll.u32 %s3921_s26, 4  ;;  %s431_s27 = int_to_ptr.vmem [resolvable:$true] %s430_s27 }
  0x22   : > { %s3922_s28 = smov [#allocation12]   ;;  %s3923_s16 = smov [#allocation15]  }
  0x23   : > { %s4818_s25 = scalar_select %p4064_p3, 1, 0 }
  0x24   : > { %p3211_p5 = pneg %p4064_p3  ;;  %s451_s29 = sshll.u32 %s3922_s28, 4  ;;  %s4077_s29 = int_to_ptr.vmem [resolvable:$true] %s451_s29 }
  0x25   : > { %4819 = sst [smem:[#allocation42_spill]] %s4818_s25  ;;  %s4079_s17 = sshll.u32 %s3923_s16, 4  ;;  %s478_s17 = int_to_ptr.vmem [resolvable:$true] %s4079_s17 }
  0x26   : > { %p4073_p6 = pnand %p3211_p5, %p4769_p1  ;;  %s4821_s3 = sld [smem:[#allocation49_spill]] }
  0x28   : > { %s4820_s30 = scalar_select %p4073_p6, 1, 0 }
  0x29   : > { %p4089_p8 = pneg %p4073_p6 }
  0x2b   : > { %s4822_s28 = scalar_select %p4089_p8, 1, 0 }
  0x2c   : > { %s3383_s26 = scalar_lea.hbm %s4821_s3, 16 }
  0x2d   : > { %p3384_p7 = scmp.ne.s32.totalorder %s4821_s3, %s3383_s26  ;;  %p3390_p11 = scmp.lt.u32.totalorder %s3383_s26, %s4821_s3 }
  0x2f   : > { %p3386_p9 = pnand %p4089_p8, %p3384_p7 }
  0x31   : > { %p3387_p10 = pneg %p3386_p9 }
  0x33   : > { %p3392_p12 = pnand %p3390_p11, %p3387_p10 }
  0x35   : > { %3395 = shalt.err (!%p3392_p12)
}
  0x36   : > { %s3396_s15 = scalar_lea.vmem %s431_s27, 16  ;;  %s3403_s0 = scalar_lea.vmem %s431_s27, 32 }
  0x37   : > { %p3397_p13 = scmp.ne.s32.totalorder %s431_s27, %s3396_s15  ;;  %p3404_p5 = scmp.lt.s32.totalorder %s431_s27, %s431_s27 }
  0x38   : > { %p3405_p4 = scmp.lt.s32.totalorder %s3403_s0, %s3396_s15 }
  0x39   : > { %p3399_p0 = pnand %p3397_p13, %p4089_p8 }
  0x3a   : > { %p3406_p1 = por %p3405_p4, %p3404_p5 }
  0x3b   : > { %p3400_p2 = pneg %p3399_p0 }
  0x3d   : > { %p3407_p3 = pnand %p3406_p1, %p3400_p2 }
  0x3f   : > { %3410 = shalt.err (!%p3407_p3)
}
  0x40   : > { %3214 = dma.hbm_to_vmem [thread:$0]  (!%p4073_p6), %s4821_s3, 16, %s431_s27, [#allocation10]  }
  0x41   : > { %s4823_s5 = sld [smem:[#allocation51_spill]] }
  0x47   : > { %s3411_s16 = scalar_lea.hbm %s4823_s5, 8192 }
  0x48   : > { %p3412_p7 = scmp.ne.s32.totalorder %s4823_s5, %s3411_s16  ;;  %p3418_p1 = scmp.lt.u32.totalorder %s3411_s16, %s4823_s5 }
  0x4a   : > { %p3414_p9 = pnand %p3412_p7, %p4089_p8 }
  0x4c   : > { %p3415_p4 = pneg %p3414_p9 }
  0x4e   : > { %p3420_p3 = pnand %p3418_p1, %p3415_p4 }
  0x50   : > { %3423 = shalt.err (!%p3420_p3)
}
  0x51   : > { %s3424_s27 = scalar_lea.vmem %s4077_s29, 8192  ;;  %p3432_p13 = scmp.lt.s32.totalorder %s4077_s29, %s4077_s29 }
  0x52   : > { %p3425_p10 = scmp.ne.s32.totalorder %s4077_s29, %s3424_s27  ;;  %p3433_p0 = scmp.lt.s32.totalorder %s3424_s27, %s3424_s27 }
  0x54   : > { %p3427_p11 = pnand %p3425_p10, %p4089_p8  ;;  %p3434_p2 = por %p3433_p0, %p3432_p13 }
  0x56   : > { %p3428_p12 = pneg %p3427_p11 }
  0x58   : > { %p3435_p5 = pnand %p3434_p2, %p3428_p12 }
  0x5a   : > { %3438 = shalt.err (!%p3435_p5)
}
  0x5b   : > { %s4773_s10 = smov 128   ;;  %s4775_s12 = smov 8  }
  0x5c   : > { %3220 = dma.hbm_to_vmem [thread:$0]  (!%p4073_p6), %s4823_s5, 8192, %s4077_s29, [#allocation13], %s4773_s10, %s4773_s10, %s4775_s12  }
  0x5d   : > { %s4824_s7 = sld [smem:[#allocation52_spill]] }
  0x63   : > { %s3439_s16 = scalar_lea.hbm %s4824_s7, 2048 }
  0x64   : > { %p3440_p7 = scmp.ne.s32.totalorder %s4824_s7, %s3439_s16  ;;  %p3446_p1 = scmp.lt.u32.totalorder %s3439_s16, %s4824_s7 }
  0x66   : > { %p3442_p9 = pnand %p3440_p7, %p4089_p8 }
  0x68   : > { %p3443_p4 = pneg %p3442_p9 }
  0x6a   : > { %p3448_p3 = pnand %p3446_p1, %p3443_p4 }
  0x6c   : > { %3451 = shalt.err (!%p3448_p3)
}
  0x6d   : > { %s3452_s21 = scalar_lea.vmem %s478_s17, 2048  ;;  %p3460_p13 = scmp.lt.s32.totalorder %s478_s17, %s478_s17 }
  0x6e   : > { %p3453_p10 = scmp.ne.s32.totalorder %s478_s17, %s3452_s21  ;;  %p3461_p0 = scmp.lt.s32.totalorder %s3452_s21, %s3452_s21 }
  0x70   : > { %p3455_p11 = pnand %p3453_p10, %p4089_p8  ;;  %p3462_p2 = por %p3461_p0, %p3460_p13 }
  0x72   : > { %p3456_p12 = pneg %p3455_p11 }
  0x74   : > { %p3463_p5 = pnand %p3462_p2, %p3456_p12 }
  0x76   : > { %3466 = shalt.err (!%p3463_p5)
}
  0x77   : > { %3226 = dma.hbm_to_vmem [thread:$0]  (!%p4073_p6), %s4824_s7, 2048, %s478_s17, [#allocation16], %s4773_s10, %s4773_s10, %s4775_s12  }
  0x78   : > { %s3926_s25 = smov [#allocation18]   ;;  %s4825_s9 = sld [smem:[#allocation53_spill]] }
  0x79   : > { %s502_s14 = sshll.u32 %s3926_s25, 4  ;;  %s503_s14 = int_to_ptr.vmem [resolvable:$true] %s502_s14 }
  0x7e   : > { %s3467_s15 = scalar_lea.hbm %s4825_s9, 16 }
  0x7f   : > { %p3468_p7 = scmp.ne.s32.totalorder %s4825_s9, %s3467_s15  ;;  %p3474_p1 = scmp.lt.u32.totalorder %s3467_s15, %s4825_s9 }
  0x81   : > { %p3470_p9 = pnand %p3468_p7, %p4089_p8 }
  0x83   : > { %p3471_p4 = pneg %p3470_p9 }
  0x85   : > { %p3476_p3 = pnand %p3474_p1, %p3471_p4 }
  0x87   : > { %3479 = shalt.err (!%p3476_p3)
}
  0x88   : > { %s3480_s17 = scalar_lea.vmem %s503_s14, 16  ;;  %s3487_s3 = scalar_lea.vmem %s503_s14, 32 }
  0x89   : > { %p3481_p10 = scmp.ne.s32.totalorder %s503_s14, %s3480_s17  ;;  %p3488_p13 = scmp.lt.s32.totalorder %s503_s14, %s503_s14 }
  0x8a   : > { %p3489_p0 = scmp.lt.s32.totalorder %s3487_s3, %s3480_s17 }
  0x8b   : > { %p3483_p11 = pnand %p3481_p10, %p4089_p8 }
  0x8c   : > { %p3490_p2 = por %p3489_p0, %p3488_p13 }
  0x8d   : > { %p3484_p12 = pneg %p3483_p11 }
  0x8f   : > { %p3491_p5 = pnand %p3490_p2, %p3484_p12 }
  0x91   : > { %3494 = shalt.err (!%p3491_p5)
}
  0x92   : > { %3232 = dma.hbm_to_vmem [thread:$0]  (!%p4073_p6), %s4825_s9, 16, %s503_s14, [#allocation19]  }
  0x93   : > { %s3927_s5 = smov [#allocation21]   ;;  %s4826_s11 = sld [smem:[#allocation55_spill]] }
  0x94   : > { %s523_s26 = sshll.u32 %s3927_s5, 4  ;;  %s524_s26 = int_to_ptr.vmem [resolvable:$true] %s523_s26 }
  0x99   : > { %s3495_s0 = scalar_lea.hbm %s4826_s11, 4096 }
  0x9a   : > { %p3496_p7 = scmp.ne.s32.totalorder %s4826_s11, %s3495_s0  ;;  %p3502_p1 = scmp.lt.u32.totalorder %s3495_s0, %s4826_s11 }
  0x9c   : > { %p3498_p9 = pnand %p3496_p7, %p4089_p8 }
  0x9e   : > { %p3499_p4 = pneg %p3498_p9 }
  0xa0   : > { %p3504_p3 = pnand %p3502_p1, %p3499_p4 }
  0xa2   : > { %3507 = shalt.err (!%p3504_p3)
}
  0xa3   : > { %s3508_s14 = scalar_lea.vmem %s524_s26, 4096  ;;  %p3516_p13 = scmp.lt.s32.totalorder %s524_s26, %s524_s26 }
  0xa4   : > { %p3509_p10 = scmp.ne.s32.totalorder %s524_s26, %s3508_s14  ;;  %p3517_p0 = scmp.lt.s32.totalorder %s3508_s14, %s3508_s14 }
  0xa6   : > { %p3511_p11 = pnand %p3509_p10, %p4089_p8  ;;  %p3518_p2 = por %p3517_p0, %p3516_p13 }
  0xa8   : > { %p3512_p12 = pneg %p3511_p11 }
  0xaa   : > { %p3519_p5 = pnand %p3518_p2, %p3512_p12 }
  0xac   : > { %3522 = shalt.err (!%p3519_p5)
}
  0xad   : > { %s3928_s29 = smov 256   ;;  %s4777_s25 = smov 16  }
  0xae   : > { %3238 = dma.hbm_to_vmem [thread:$0]  (!%p4073_p6), %s4826_s11, 4096, %s524_s26, [#allocation22], %s3928_s29, %s3928_s29, %s4777_s25  }
  0xaf   : > { %s3930_s15 = smov [#allocation24]   ;;  %s4827_s13 = sld [smem:[#allocation57_spill]] }
  0xb0   : > { %s547_s0 = sshll.u32 %s3930_s15, 4  ;;  %s548_s0 = int_to_ptr.vmem [resolvable:$true] %s547_s0 }
  0xb5   : > { %s3523_s17 = scalar_lea.hbm %s4827_s13, 4096 }
  0xb6   : > { %p3524_p7 = scmp.ne.s32.totalorder %s4827_s13, %s3523_s17  ;;  %p3530_p1 = scmp.lt.u32.totalorder %s3523_s17, %s4827_s13 }
  0xb8   : > { %p3526_p9 = pnand %p3524_p7, %p4089_p8 }
  0xba   : > { %p3527_p4 = pneg %p3526_p9 }
  0xbc   : > { %p3532_p3 = pnand %p3530_p1, %p3527_p4 }
  0xbe   : > { %3535 = shalt.err (!%p3532_p3)
}
  0xbf   : > { %s3536_s26 = scalar_lea.vmem %s548_s0, 4096  ;;  %p3544_p13 = scmp.lt.s32.totalorder %s548_s0, %s548_s0 }
  0xc0   : > { %p3537_p10 = scmp.ne.s32.totalorder %s548_s0, %s3536_s26  ;;  %p3545_p0 = scmp.lt.s32.totalorder %s3536_s26, %s3536_s26 }
  0xc2   : > { %p3539_p11 = pnand %p3537_p10, %p4089_p8  ;;  %p3546_p2 = por %p3545_p0, %p3544_p13 }
  0xc4   : > { %p3540_p12 = pneg %p3539_p11 }
  0xc6   : > { %p3547_p5 = pnand %p3546_p2, %p3540_p12 }
  0xc8   : > { %3550 = shalt.err (!%p3547_p5)
}
  0xc9   : > { %s4828_s29 = smov 8   ;;  %s4829_s5 = smov 128  }
  0xca   : > { %3244 = dma.hbm_to_vmem [thread:$0]  (!%p4073_p6), %s4827_s13, 4096, %s548_s0, [#allocation25], %s4829_s5, %s4829_s5, %s4828_s29  }
  0xcb   : > { %s2484_s16 = sadd.s32 4294967294, %s3919_s23   ;;  %s52_s15 = sadd.s32 1, %s3915_s22 }
  0xcc   : > { %p54_p7 = scmp.ge.s32.totalorder %s52_s15, 2  ;;  %s61_s27 = sadd.s32 1, %s3907_s20 }
  0xcd   : > { %p68_p9 = scmp.ne.s32.totalorder %s3907_s20, %s3903_s19  ;;  %p69_p4 = scmp.eq.s32.totalorder %s3919_s23, 0 }
  0xce   : > { %s4890_s15 = smov (%p54_p7, %s52_s15), 0  ;;  %p74_p3 = scmp.ne.s32.totalorder %s3903_s19, %s3899_s18 }
  0xcf   : > { %4830 = sst [smem:[#allocation43_spill]] %s4890_s15  ;;  %p4219_p1 = por %p69_p4, %p68_p9 }
  0xd0   : > { %s56_s0 = ssub.s32 %s3915_s22, %s4890_s15  ;;  %p404_p10 = scmp.eq.s32.totalorder %s4059_s24, 1 }
  0xd1   : > { %p59_p11 = scmp.eq.s32.totalorder %s56_s0, 0  ;;  %p4832_p12 = scmp.eq.s32.totalorder %s4059_s24, 0 }
  0xd2   : > { %p4234_p0 = por %p404_p10, %p68_p9  ;;  %p410_p2 = scmp.eq.s32.totalorder %s2484_s16, 1 }
  0xd3   : > { %p4230_p13 = por %p4832_p12, %p74_p3  ;;  %p3274_p7 = scmp.lt.s32.totalorder %s3919_s23, 2 }
  0xd4   : > { %s4834_s3 = scalar_select %p4234_p0, 1, 0 }
  0xd5   : > { %s4833_s17 = scalar_select %p4230_p13, 1, 0 }
  0xd6   : > { %4835 = sst [smem:[#allocation44_spill]] %s4834_s3  ;;  %p4241_p5 = por %p410_p2, %p74_p3 }
  0xd7   : > { %s4239_s14 = scalar_select %p59_p11, %s3907_s20, %s61_s27  }
  0xd8   : > { %s4837_s26 = scalar_select %p4241_p5, 1, 0 }
  0xd9   : > { %4836 = sst [smem:[#allocation45_spill]] %s4239_s14  ;;  %s4247_s10 = sand.u32 1, %s3907_s20  }
  0xda   : > { %4838 = sst [smem:[#allocation46_spill]] %s4837_s26  ;;  %s591_s12 = sand.u32 1, %s3919_s23  }
  0xdb   : > { %p4252_p4 = pnand %p3274_p7, %p4219_p1  ;;  %s4779_s25 = sshll.u32 %s4247_s10, 6 }
  0xdc   : > { %s4780_s16 = sshll.u32 %s3915_s22, 10  ;;  %s4840_s1 = sld [smem:[#allocation48_spill]] }
  0xdd   : > { %s4839_s0 = scalar_select %p4252_p4, 1, 0 }
  0xde   : > { %s595_s11 = scalar_lea.vmem [#allocation6], %s4779_s25  ;;  %s4269_s13 = scalar_lea.sflag [#allocation7], %s591_s12 }
  0xdf   : > { %s602_s21 = sshll.u32 %s595_s11, 4  ;;  %p4275_p1 = pneg %p4252_p4  ;;  %s4267_s21 = int_to_ptr.vmem [resolvable:$true] %s602_s21 }
  0xe1   : > { %s4841_s14 = scalar_select %p4275_p1, 1, 0 }
  0xe2   : > { %s4263_s9 = scalar_lea.hbm %s4840_s1, %s4780_s16  ;;  %s3556_s25 = scalar_lea.hbm %s4840_s1, 2048 }
  0xe3   : > { %s3551_s15 = scalar_lea.hbm %s4263_s9, 1024  ;;  %p3557_p11 = scmp.lt.u32.totalorder %s4263_s9, %s4840_s1 }
  0xe4   : > { %p3552_p9 = scmp.ne.s32.totalorder %s4263_s9, %s3551_s15  ;;  %p3558_p12 = scmp.lt.u32.totalorder %s3556_s25, %s3551_s15 }
  0xe5   : > { %p3560_p7 = scmp.lt.u32.totalorder %s3551_s15, %s4263_s9 }
  0xe6   : > { %p3554_p3 = pnand %p4275_p1, %p3552_p9  ;;  %p3559_p2 = por %p3558_p12, %p3557_p11 }
  0xe8   : > { %p3555_p10 = pneg %p3554_p3  ;;  %p3561_p5 = por %p3560_p7, %p3559_p2 }
  0xea   : > { %p3562_p0 = pnand %p3561_p5, %p3555_p10 }
  0xec   : > { %3565 = shalt.err (!%p3562_p0)
}
  0xed   : > { %s3566_s12 = scalar_lea.vmem %s4267_s21, 1024  ;;  %s3931_s7 = smov [#allocation6]  }
  0xee   : > { %p3567_p9 = scmp.ne.s32.totalorder %s4267_s21, %s3566_s12  ;;  %s3571_s27 = sshll.u32 %s3931_s7, 4  ;;  %s3572_s27 = int_to_ptr.vmem [resolvable:$false] %s3571_s27 }
  0xef   : > { %s3573_s16 = scalar_lea.vmem %s3572_s27, 2048  ;;  %p3574_p6 = scmp.lt.s32.totalorder %s4267_s21, %s3572_s27 }
  0xf0   : > { %p3569_p3 = pnand %p3567_p9, %p4275_p1  ;;  %p3575_p8 = scmp.lt.s32.totalorder %s3573_s16, %s3566_s12 }
  0xf2   : > { %p3570_p13 = pneg %p3569_p3  ;;  %p3576_p11 = por %p3575_p8, %p3574_p6 }
  0xf4   : > { %p3577_p12 = pnand %p3576_p11, %p3570_p13 }
  0xf6   : > { %3580 = shalt.err (!%p3577_p12)
}
  0xf7   : > { %3254 = dma.hbm_to_vmem [thread:$0]  (!%p4252_p4), %s4263_s9, 1024, %s4267_s21, %s4269_s13, %s4829_s5, %s4829_s5, %s4828_s29  }
  0xf8   : > { %s4842_s25 = sshll.u32 %s3915_s22, 10  ;;  %s4843_s7 = sshll.u32 %s4247_s10, 6 }
  0xf9   : > { %s4307_s12 = scalar_lea.hbm %s4751_s2, %s4842_s25  ;;  %s616_s27 = scalar_lea.vmem [#allocation8], %s4843_s7 }
  0xfa   : > { %s623_s16 = sshll.u32 %s616_s27, 4  ;;  %s3932_s1 = smov [#allocation11]   ;;  %s4311_s16 = int_to_ptr.vmem [resolvable:$true] %s623_s16 }
  0xfb   : > { %s441_s20 = sshll.u32 %s3932_s1, 4  ;;  %s3933_s23 = smov [#allocation14]   ;;  %s442_s20 = int_to_ptr.vmem [resolvable:$true] %s441_s20 }
  0xfc   : > { %s464_s26 = sshll.u32 %s3933_s23, 4  ;;  %s4844_s4 = sld [smem:[#allocation50_spill]]  ;;  %s465_s26 = int_to_ptr.vmem [resolvable:$true] %s464_s26 }
  0xfd   : > { %p4845_p8 = scmp.ne.s32.totalorder %s4822_s28, 0 }
 0x102   : > { %s3581_s9 = scalar_lea.hbm %s4844_s4, 16 }
 0x103   : > { %p3582_p6 = scmp.ne.s32.totalorder %s4844_s4, %s3581_s9  ;;  %p3588_p5 = scmp.lt.u32.totalorder %s3581_s9, %s4844_s4 }
 0x105   : > { %p3584_p13 = pnand %p3582_p6, %p4845_p8 }
 0x107   : > { %p3585_p0 = pneg %p3584_p13 }
 0x109   : > { %p3590_p10 = pnand %p3588_p5, %p3585_p0 }
 0x10b   : > { %3593 = shalt.err (!%p3590_p10)
}
 0x10c   : > { %s3594_s1 = scalar_lea.vmem %s442_s20, 16  ;;  %s3601_s18 = scalar_lea.vmem %s442_s20, 32 }
 0x10d   : > { %p3595_p2 = scmp.ne.s32.totalorder %s442_s20, %s3594_s1  ;;  %p3602_p3 = scmp.lt.s32.totalorder %s442_s20, %s442_s20 }
 0x10e   : > { %p3603_p11 = scmp.lt.s32.totalorder %s3601_s18, %s3594_s1 }
 0x10f   : > { %p3597_p7 = pnand %p3595_p2, %p4845_p8 }
 0x110   : > { %p3604_p12 = por %p3603_p11, %p3602_p3 }
 0x111   : > { %p3598_p9 = pneg %p3597_p7 }
 0x113   : > { %p3605_p4 = pnand %p3604_p12, %p3598_p9 }
 0x115   : > { %3608 = shalt.err (!%p3605_p4)
}
 0x116   : > { %p4846_p6 = scmp.ne.s32.totalorder %s4820_s30, 0  ;;  %s3609_s7 = scalar_lea.hbm %s4755_s6, 64 }
 0x117   : > { %p3610_p13 = scmp.ne.s32.totalorder %s4755_s6, %s3609_s7  ;;  %p3616_p4 = scmp.lt.u32.totalorder %s3609_s7, %s4755_s6 }
 0x118   : > { %3217 = dma.hbm_to_vmem [thread:$0]  (!%p4846_p6), %s4844_s4, 16, %s442_s20, [#allocation10]  }
 0x119   : > { %p3612_p0 = pnand %p3610_p13, %p4845_p8 }
 0x11b   : > { %p3613_p5 = pneg %p3612_p0 }
 0x11d   : > { %p3618_p10 = pnand %p3616_p4, %p3613_p5 }
 0x11f   : > { %3621 = shalt.err (!%p3618_p10)
}
 0x120   : > { %s3622_s15 = scalar_lea.vmem %s465_s26, 64  ;;  %p3630_p3 = scmp.lt.s32.totalorder %s465_s26, %s465_s26 }
 0x121   : > { %p3623_p2 = scmp.ne.s32.totalorder %s465_s26, %s3622_s15  ;;  %p3631_p11 = scmp.lt.s32.totalorder %s3622_s15, %s3622_s15 }
 0x123   : > { %p3625_p7 = pnand %p3623_p2, %p4845_p8  ;;  %p3632_p12 = por %p3631_p11, %p3630_p3 }
 0x125   : > { %p3626_p9 = pneg %p3625_p7 }
 0x127   : > { %p3633_p1 = pnand %p3632_p12, %p3626_p9 }
 0x129   : > { %3636 = shalt.err (!%p3633_p1)
}
 0x12a   : > { %s3934_s20 = smov 1   ;;  %s4847_s1 = smov 16  }
 0x12b   : > { %3223 = dma.hbm_to_vmem [thread:$0]  (!%p4846_p6), %s4755_s6, 64, %s465_s26, [#allocation13], %s4847_s1, %s4847_s1, %s3934_s20  }
 0x12c   : > { %s3935_s24 = smov [#allocation17]   ;;  %s3936_s11 = smov [#allocation20]  }
 0x12d   : > { %s491_s3 = sshll.u32 %s3935_s24, 4  ;;  %s513_s7 = sshll.u32 %s3936_s11, 4  ;;  %s492_s3 = int_to_ptr.vmem [resolvable:$true] %s491_s3  ;;  %s4351_s7 = int_to_ptr.vmem [resolvable:$true] %s513_s7 }
 0x12e   : > { %s3637_s21 = scalar_lea.hbm %s4757_s8, 16 }
 0x12f   : > { %p3638_p1 = scmp.ne.s32.totalorder %s4757_s8, %s3637_s21  ;;  %p3644_p5 = scmp.lt.u32.totalorder %s3637_s21, %s4757_s8 }
 0x131   : > { %p3640_p13 = pnand %p3638_p1, %p4845_p8 }
 0x133   : > { %p3641_p0 = pneg %p3640_p13 }
 0x135   : > { %p3646_p4 = pnand %p3644_p5, %p3641_p0 }
 0x137   : > { %3649 = shalt.err (!%p3646_p4)
}
 0x138   : > { %s3650_s20 = scalar_lea.vmem %s492_s3, 16  ;;  %s3657_s1 = scalar_lea.vmem %s492_s3, 32 }
 0x139   : > { %p3651_p10 = scmp.ne.s32.totalorder %s492_s3, %s3650_s20  ;;  %p3658_p9 = scmp.lt.s32.totalorder %s492_s3, %s492_s3 }
 0x13a   : > { %p3659_p3 = scmp.lt.s32.totalorder %s3657_s1, %s3650_s20 }
 0x13b   : > { %p3653_p2 = pnand %p3651_p10, %p4845_p8 }
 0x13c   : > { %p3660_p11 = por %p3659_p3, %p3658_p9 }
 0x13d   : > { %p3654_p7 = pneg %p3653_p2 }
 0x13f   : > { %p3661_p12 = pnand %p3660_p11, %p3654_p7 }
 0x141   : > { %3664 = shalt.err (!%p3661_p12)
}
 0x142   : > { %3229 = dma.hbm_to_vmem [thread:$0]  (!%p4846_p6), %s4757_s8, 16, %s492_s3, [#allocation16]  }
 0x143   : > { %s4848_s9 = sld [smem:[#allocation54_spill]] }
 0x149   : > { %s3665_s21 = scalar_lea.hbm %s4848_s9, 16 }
 0x14a   : > { %p3666_p1 = scmp.ne.s32.totalorder %s4848_s9, %s3665_s21  ;;  %p3672_p5 = scmp.lt.u32.totalorder %s3665_s21, %s4848_s9 }
 0x14c   : > { %p3668_p13 = pnand %p3666_p1, %p4845_p8 }
 0x14e   : > { %p3669_p0 = pneg %p3668_p13 }
 0x150   : > { %p3674_p4 = pnand %p3672_p5, %p3669_p0 }
 0x152   : > { %3677 = shalt.err (!%p3674_p4)
}
 0x153   : > { %s3678_s3 = scalar_lea.vmem %s4351_s7, 16  ;;  %s3685_s20 = scalar_lea.vmem %s4351_s7, 32 }
 0x154   : > { %p3679_p10 = scmp.ne.s32.totalorder %s4351_s7, %s3678_s3  ;;  %p3686_p9 = scmp.lt.s32.totalorder %s4351_s7, %s4351_s7 }
 0x155   : > { %p3687_p3 = scmp.lt.s32.totalorder %s3685_s20, %s3678_s3 }
 0x156   : > { %p3681_p2 = pnand %p3679_p10, %p4845_p8 }
 0x157   : > { %p3688_p11 = por %p3687_p3, %p3686_p9 }
 0x158   : > { %p3682_p7 = pneg %p3681_p2 }
 0x15a   : > { %p3689_p12 = pnand %p3688_p11, %p3682_p7 }
 0x15c   : > { %3692 = shalt.err (!%p3689_p12)
}
 0x15d   : > { %3235 = dma.hbm_to_vmem [thread:$0]  (!%p4846_p6), %s4848_s9, 16, %s4351_s7, [#allocation19]  }
 0x15e   : > { %s3937_s24 = smov [#allocation23]   ;;  %s3938_s27 = smov [#allocation26]  }
 0x15f   : > { %s537_s11 = sshll.u32 %s3937_s24, 4  ;;  %s561_s21 = sshll.u32 %s3938_s27, 4  ;;  %s538_s11 = int_to_ptr.vmem [resolvable:$true] %s537_s11  ;;  %s4395_s21 = int_to_ptr.vmem [resolvable:$true] %s561_s21 }
 0x160   : > { %s4849_s18 = sld [smem:[#allocation56_spill]] }
 0x166   : > { %s4850_s26 = smov %s4849_s18  ;;  %s3693_s3 = scalar_lea.hbm %s4849_s18, 32 }
 0x167   : > { %p3694_p1 = scmp.ne.s32.totalorder %s4850_s26, %s3693_s3  ;;  %p3700_p5 = scmp.lt.u32.totalorder %s3693_s3, %s4850_s26 }
 0x169   : > { %p3696_p13 = pnand %p3694_p1, %p4845_p8 }
 0x16b   : > { %p3697_p0 = pneg %p3696_p13 }
 0x16d   : > { %p3702_p4 = pnand %p3700_p5, %p3697_p0 }
 0x16f   : > { %3705 = shalt.err (!%p3702_p4)
}
 0x170   : > { %s3706_s23 = scalar_lea.vmem %s538_s11, 32  ;;  %p3714_p9 = scmp.lt.s32.totalorder %s538_s11, %s538_s11 }
 0x171   : > { %p3707_p10 = scmp.ne.s32.totalorder %s538_s11, %s3706_s23  ;;  %p3715_p3 = scmp.lt.s32.totalorder %s3706_s23, %s3706_s23 }
 0x173   : > { %p3709_p2 = pnand %p3707_p10, %p4845_p8  ;;  %p3716_p11 = por %p3715_p3, %p3714_p9 }
 0x175   : > { %p3710_p7 = pneg %p3709_p2 }
 0x177   : > { %p3717_p12 = pnand %p3716_p11, %p3710_p7 }
 0x179   : > { %3720 = shalt.err (!%p3717_p12)
}
 0x17a   : > { %3241 = dma.hbm_to_vmem [thread:$0]  (!%p4846_p6), %s4850_s26, 32, %s538_s11, [#allocation22]  }
 0x17b   : > { %s4851_s15 = sld [smem:[#allocation58_spill]] }
 0x181   : > { %s3721_s18 = scalar_lea.hbm %s4851_s15, 16 }
 0x182   : > { %p3722_p1 = scmp.ne.s32.totalorder %s4851_s15, %s3721_s18  ;;  %p3728_p5 = scmp.lt.u32.totalorder %s3721_s18, %s4851_s15 }
 0x184   : > { %p3724_p13 = pnand %p3722_p1, %p4845_p8 }
 0x186   : > { %p3725_p0 = pneg %p3724_p13 }
 0x188   : > { %p3730_p4 = pnand %p3728_p5, %p3725_p0 }
 0x18a   : > { %3733 = shalt.err (!%p3730_p4)
}
 0x18b   : > { %s3734_s11 = scalar_lea.vmem %s4395_s21, 16  ;;  %s3741_s23 = scalar_lea.vmem %s4395_s21, 32 }
 0x18c   : > { %p3735_p10 = scmp.ne.s32.totalorder %s4395_s21, %s3734_s11  ;;  %p3742_p9 = scmp.lt.s32.totalorder %s4395_s21, %s4395_s21 }
 0x18d   : > { %p3743_p3 = scmp.lt.s32.totalorder %s3741_s23, %s3734_s11 }
 0x18e   : > { %p3737_p2 = pnand %p3735_p10, %p4845_p8 }
 0x18f   : > { %p3744_p11 = por %p3743_p3, %p3742_p9 }
 0x190   : > { %p3738_p7 = pneg %p3737_p2 }
 0x192   : > { %p3745_p12 = pnand %p3744_p11, %p3738_p7 }
 0x194   : > { %3748 = shalt.err (!%p3745_p12)
}
 0x195   : > { %3247 = dma.hbm_to_vmem [thread:$0]  (!%p4846_p6), %s4851_s15, 16, %s4395_s21, [#allocation25]  }
 0x196   : > { %s2499_s28 = sshll.u32 %s4247_s10, 3  ;;  %s2500_s27 = sshll.u32 %s3915_s22, 7 }
 0x197   : > { %s4852_s3 = sld [smem:[#allocation47_spill]]  ;;  %s576_s30 = scalar_lea.vmem [#allocation3], %s2499_s28 }
 0x198   : > { %s584_s1 = sshll.u32 %s576_s30, 4  ;;  %s573_s7 = scalar_lea.sflag [#allocation4], %s4247_s10  ;;  %s585_s1 = int_to_ptr.vmem [resolvable:$true] %s584_s1 }
 0x199   : > { %p4853_p1 = scmp.ne.s32.totalorder %s4841_s14, 0 }
 0x19d   : > { %s4444_s20 = scalar_lea.hbm %s4852_s3, %s2500_s27  ;;  %s3754_s4 = scalar_lea.hbm %s4852_s3, 256 }
 0x19e   : > { %s3749_s11 = scalar_lea.hbm %s4444_s20, 128  ;;  %p3755_p0 = scmp.lt.u32.totalorder %s4444_s20, %s4852_s3 }
 0x19f   : > { %p3750_p8 = scmp.ne.s32.totalorder %s4444_s20, %s3749_s11  ;;  %p3756_p5 = scmp.lt.u32.totalorder %s3754_s4, %s3749_s11 }
 0x1a0   : > { %p3758_p10 = scmp.lt.u32.totalorder %s3749_s11, %s4444_s20 }
 0x1a1   : > { %p3752_p13 = pnand %p3750_p8, %p4853_p1  ;;  %p3757_p4 = por %p3756_p5, %p3755_p0 }
 0x1a3   : > { %p3753_p6 = pneg %p3752_p13  ;;  %p3759_p2 = por %p3758_p10, %p3757_p4 }
 0x1a5   : > { %p3760_p7 = pnand %p3759_p2, %p3753_p6 }
 0x1a7   : > { %3763 = shalt.err (!%p3760_p7)
}
 0x1a8   : > { %s3764_s10 = scalar_lea.vmem %s585_s1, 128  ;;  %s3939_s28 = smov [#allocation3]  }
 0x1a9   : > { %p3765_p9 = scmp.ne.s32.totalorder %s585_s1, %s3764_s10  ;;  %s3769_s25 = sshll.u32 %s3939_s28, 4  ;;  %s3770_s25 = int_to_ptr.vmem [resolvable:$false] %s3769_s25 }
 0x1aa   : > { %s3771_s18 = scalar_lea.vmem %s3770_s25, 256  ;;  %p3772_p12 = scmp.lt.s32.totalorder %s585_s1, %s3770_s25 }
 0x1ab   : > { %p3767_p3 = pnand %p3765_p9, %p4853_p1  ;;  %p3773_p8 = scmp.lt.s32.totalorder %s3771_s18, %s3764_s10 }
 0x1ad   : > { %p3768_p11 = pneg %p3767_p3  ;;  %p3774_p13 = por %p3773_p8, %p3772_p12 }
 0x1af   : > { %p3775_p0 = pnand %p3774_p13, %p3768_p11 }
 0x1b1   : > { %3778 = shalt.err (!%p3775_p0)
}
 0x1b2   : > { %p4854_p5 = scmp.ne.s32.totalorder %s4839_s0, 0  ;;  %s3779_s30 = scalar_lea.hbm %s4307_s12, 1024 }
 0x1b3   : > { %p3780_p6 = scmp.ne.s32.totalorder %s4307_s12, %s3779_s30  ;;  %s3784_s23 = scalar_lea.hbm %s4751_s2, 2048 }
 0x1b4   : > { %3251 = dma.hbm_to_vmem [thread:$0]  (!%p4854_p5), %s4444_s20, 128, %s585_s1, %s573_s7  }
 0x1b5   : > { %p3782_p4 = pnand %p3780_p6, %p4853_p1  ;;  %p3785_p2 = scmp.lt.u32.totalorder %s4307_s12, %s4751_s2 }
 0x1b6   : > { %p3786_p7 = scmp.lt.u32.totalorder %s3784_s23, %s3779_s30  ;;  %p3788_p3 = scmp.lt.u32.totalorder %s3779_s30, %s4307_s12 }
 0x1b7   : > { %p3783_p10 = pneg %p3782_p4 }
 0x1b8   : > { %p3787_p9 = por %p3786_p7, %p3785_p2 }
 0x1ba   : > { %p3789_p11 = por %p3788_p3, %p3787_p9 }
 0x1bc   : > { %p3790_p12 = pnand %p3789_p11, %p3783_p10 }
 0x1be   : > { %3793 = shalt.err (!%p3790_p12)
}
 0x1bf   : > { %s3794_s20 = scalar_lea.vmem %s4311_s16, 1024  ;;  %s3940_s1 = smov [#allocation8]  }
 0x1c0   : > { %p3795_p8 = scmp.ne.s32.totalorder %s4311_s16, %s3794_s20  ;;  %s3799_s7 = sshll.u32 %s3940_s1, 4  ;;  %s3800_s7 = int_to_ptr.vmem [resolvable:$false] %s3799_s7 }
 0x1c1   : > { %s3801_s27 = scalar_lea.vmem %s3800_s7, 2048  ;;  %p3802_p6 = scmp.lt.s32.totalorder %s4311_s16, %s3800_s7 }
 0x1c2   : > { %p3797_p13 = pnand %p3795_p8, %p4853_p1  ;;  %p3803_p4 = scmp.lt.s32.totalorder %s3801_s27, %s3794_s20 }
 0x1c4   : > { %p3798_p0 = pneg %p3797_p13  ;;  %p3804_p2 = por %p3803_p4, %p3802_p6 }
 0x1c6   : > { %p3805_p7 = pnand %p3804_p2, %p3798_p0 }
 0x1c8   : > { %3808 = shalt.err (!%p3805_p7)
}
 0x1c9   : > { %3257 = dma.hbm_to_vmem [thread:$0]  (!%p4854_p5), %s4307_s12, 1024, %s4311_s16, %s4269_s13, %s4829_s5, %s4829_s5, %s4828_s29  }
 0x1ca   : > { %s4855_s14 = sld [smem:[#allocation42_spill]] }
 0x1d0   : > { %p4856_p1 = scmp.ne.s32.totalorder %s4855_s14, 0 }
 0x1d1   : > { %s4492_s10 = sand.u32 (!%p4856_p1), 1, %s3903_s19   ;;  %p4857_p10 = scmp.ne.s32.totalorder (!%p4856_p1), %s4833_s17, 0 }
 0x1d2   : > { %635 = sbr.rel (%p4856_p1) target bundleno = 4591 (0x11ef), region = 80  ;;  %s2508_s28 = sshll.u32 (!%p4856_p1), %s4492_s10, 3 }
 0x1d3   : > { %s638_s25 = scalar_lea.sflag (!%p4856_p1), [#allocation4], %s4492_s10  ;;  %s641_s0 = scalar_lea.vmem (!%p4856_p1), [#allocation3], %s2508_s28 }
 0x1d9   : > { %3862 = dma.done.wait (%p4857_p10), %s638_s25, 128  }
 0x1da   : > { %3864 = vsyncadd (%p4857_p10), %s638_s25, 4294967168  ;;  %s4858_s13 = sld [smem:[#allocation41_spill]]  ;;  %s2509_s5 = sshll.u32 %s4492_s10, 6 }
 0x1db   : > { %s4504_s16 = scalar_lea.vmem [#allocation6], %s2509_s5 }
 0x1e0   : > { %s646_s29 = sand.u32 1, %s4858_s13  }
 0x1e1   : > { %s647_s12 = scalar_lea.sflag [#allocation7], %s646_s29 }
 0x1e2   : > { %3866 = dma.done.wait (%p4857_p10), %s647_s12, 2048  }
 0x1e3   : > { %3868 = vsyncadd (%p4857_p10), %s647_s12, 4294965248  ;;  %s4510_s18 = scalar_lea.vmem [#allocation8], %s2509_s5  ;;  %p4859_p5 = scmp.eq.s32.totalorder %s4858_s13, 0 }
 0x1e5   : > { %3870 = dma.done.wait (%p4859_p5), [#allocation10], 32   ;;  %p4860_p9 = pmov %p4859_p5 }
 0x1e6   : > { %p4861_p3 = pmov %p4859_p5 }
 0x1e7   : > { %3872 = vsyncadd (%p4860_p9), [#allocation10], 4294967264 }
 0x1e8   : > { %3874 = dma.done.wait (%p4861_p3), [#allocation13], 8256   ;;  %p4862_p11 = pmov %p4861_p3 }
 0x1e9   : > { %p4863_p12 = pmov %p4861_p3 }
 0x1ea   : > { %3876 = vsyncadd (%p4862_p11), [#allocation13], 4294959040 }
 0x1eb   : > { %3878 = dma.done.wait (%p4863_p12), [#allocation16], 2064   ;;  %p4864_p8 = pmov %p4861_p3 }
 0x1ec   : > { %p4865_p13 = pmov %p4861_p3 }
 0x1ed   : > { %3880 = vsyncadd (%p4864_p8), [#allocation16], 4294965232 }
 0x1ee   : > { %3882 = dma.done.wait (%p4865_p13), [#allocation19], 32   ;;  %p4866_p0 = pmov %p4861_p3 }
 0x1f0   : > { %3884 = vsyncadd (%p4866_p0), [#allocation19], 4294967264  ;;  %p4867_p6 = pmov %p4866_p0 }
 0x1f1   : > { %p4868_p4 = pmov %p4866_p0 }
 0x1f2   : > { %3886 = dma.done.wait (%p4867_p6), [#allocation22], 4128  }
 0x1f3   : > { %3888 = vsyncadd (%p4868_p4), [#allocation22], 4294963168  ;;  %p4869_p2 = pmov %p4866_p0 }
 0x1f4   : > { %p4870_p7 = pmov %p4866_p0 }
 0x1f5   : > { %3890 = dma.done.wait (%p4869_p2), [#allocation25], 4112  }
 0x1f6   : > { %3892 = vsyncadd (%p4870_p7), [#allocation25], 4294963184  ;;  %v4536_v0 = vld [vmem:[%s641_s0] sm:$0xff]  ;;  %v800_v5 = vld [vmem:[#allocation12] sm:$0xff]  ;;  %v3941_v8 = vmov 0.0|0.0   ;;  %vm3942_vm0 = vmmov 0  }
 0x1f7   : > { %767 = vadd.xlane.f32.xlu0 %v4536_v0  ;;  %v801_v6 = vld [vmem:[#allocation12 + $0x8] sm:$0xff]  ;;  %2943 = vmatprep.subr.bf16.mxu0 %v3941_v8  ;;  %v802_v9 = vld [vmem:[#allocation12 + $0x10] sm:$0xff]  ;;  %v803_v10 = vld [vmem:[#allocation12 + $0x18] sm:$0xff]  ;;  %v3943_v23 = vmov 0.0   ;;  %vm897_vm1 = vcmask 261120   ;;  %vm977_vm5 = vcmask 130048  }
 0x1f8   : > { %v2944_v7 = vpack.c.bf16 %v801_v6, %v800_v5  ;;  %2967 = vmatprep.subr.bf16.mxu1 %v3941_v8  ;;  %v2947_v11 = vpack.c.bf16 %v803_v10, %v802_v9  ;;  %v804_v12 = vld [vmem:[#allocation12 + $0x20] sm:$0xff]  ;;  %v805_v13 = vld [vmem:[#allocation12 + $0x28] sm:$0xff]  ;;  %v806_v15 = vld [vmem:[#allocation12 + $0x30] sm:$0xff]  ;;  %2744 = vmatprep.mubr.msk.f32.mxu0 %vm3942_vm0, %v3943_v23  ;;  %s3944_s17 = smov 64   ;;  %s3945_s30 = smov 32   ;;  %vm1331_vm6 = vcmask 523520  }
 0x1f9   : > { %v2950_v14 = vpack.c.bf16 %v805_v13, %v804_v12  ;;  %v807_v16 = vld [vmem:[#allocation12 + $0x38] sm:$0xff]  ;;  %v808_v18 = vld [vmem:[#allocation12 + $0x40] sm:$0xff]  ;;  %v809_v19 = vld [vmem:[#allocation12 + $0x48] sm:$0xff]  ;;  %2751 = vmatprep.mubr.msk.f32.mxu1 %vm3942_vm0, %v3943_v23  ;;  %vm1601_vm7 = vcmask 785920   ;;  %s3946_s11 = smov 96   ;;  %vm1871_vm8 = vcmask 1048320  }
 0x1fa   : > { %2945 = vmatpush3.bf16.msra.mxu0 %v2944_v7  ;;  %v2953_v17 = vpack.c.bf16 %v807_v16, %v806_v15  ;;  %v2956_v20 = vpack.c.bf16 %v809_v19, %v808_v18  ;;  %v810_v21 = vld [vmem:[#allocation12 + $0x50] sm:$0xff]  ;;  %v811_v22 = vld [vmem:[#allocation12 + $0x58] sm:$0xff]  ;;  %v812_v25 = vld [vmem:[#allocation12 + $0x60] sm:$0xff]  ;;  %s4873_s21 = sld [smem:[#allocation39_spill]]  ;;  %s4874_s23 = sld [smem:[#allocation44_spill]] }
 0x1fb   : > { %2946 = vmatprep.subr.bf16.mxu0 %v3941_v8  ;;  %v2959_v24 = vpack.c.bf16 %v811_v22, %v810_v21  ;;  %v813_v26 = vld [vmem:[#allocation12 + $0x68] sm:$0xff]  ;;  %v814_v28 = vld [vmem:[#allocation12 + $0x70] sm:$0xff]  ;;  %v815_v29 = vld [vmem:[#allocation12 + $0x78] sm:$0xff]  ;;  %s763_s24 = scalar_lea.vmem [#allocation27], %s2508_s28  ;;  %s4875_s27 = sld [smem:[#allocation59_spill]] }
 0x1fc   : > { %v2962_v27 = vpack.c.bf16 %v813_v26, %v812_v25  ;;  %v2965_v30 = vpack.c.bf16 %v815_v29, %v814_v28  ;;  %v893_v31 = vld [vmem:[%s4504_s16] sm:$0xff]  ;;  %v894_v32 = vld [vmem:[%s4504_s16 + $0x8] sm:$0xff]  ;;  %vm4562_vm2 = vmpackc.low %vm897_vm1, %vm897_vm1  ;;  %s2246_s20 = sshll.u32 %s763_s24, 4  ;;  %s2232_s25 = scalar_lea.sflag [#allocation5], %s4492_s10  ;;  %s4702_s20 = int_to_ptr.vmem [resolvable:$true] %s2246_s20 }
 0x1fd   : > { %v2968_v33 = vpack.c.bf16 %v894_v32, %v893_v31  ;;  %v2524_v44 = vld [vmem:[#allocation9] ss:$0 sm:$0xff]  ;;  %v2525_v46 = vld [vmem:[#allocation11] ss:$0 sm:$0xff]  ;;  %v2526_v49 = vld [vmem:[#allocation14] ss:$0 sm:$0xff] }
 0x1fe   : > { %2948 = vmatpush3.bf16.msra.mxu0 %v2947_v11  ;;  %v895_v56 = vld [vmem:[%s4510_s18] sm:$0xff]  ;;  %v896_v57 = vld [vmem:[%s4510_s18 + $0x8] sm:$0xff]  ;;  %v1070_v10 = vld [vmem:[#allocation12 + $0xb0] sm:$0xff]  ;;  %s3809_s0 = scalar_lea.vmem %s4702_s20, 128  ;;  %s3947_s28 = smov [#allocation27]  }
 0x1ff   : > { %2949 = vmatprep.subr.bf16.mxu0 %v3941_v8  ;;  %2970 = vmatpush3.bf16.xpose.msk.msra.mxu1 %vm4562_vm2, %v2968_v33  ;;  %v2972_v58 = vpack.c.bf16 %v896_v57, %v895_v56  ;;  %v1064_v62 = vld [vmem:[#allocation12 + $0x80] sm:$0xff]  ;;  %v1065_v63 = vld [vmem:[#allocation12 + $0x88] sm:$0xff]  ;;  %v1071_v11 = vld [vmem:[#allocation12 + $0xb8] sm:$0xff]  ;;  %p3810_p1 = scmp.ne.s32.totalorder %s4702_s20, %s3809_s0  ;;  %s3813_s13 = sshll.u32 %s3947_s28, 4  ;;  %s3814_s13 = int_to_ptr.vmem [resolvable:$false] %s3813_s13 }
 0x200   : > { %2971 = vmatprep.subr.bf16.mxu1 %v3941_v8  ;;  %v1068_v6 = vld [vmem:[#allocation12 + $0xa0] sm:$0xff]  ;;  %v1069_v7 = vld [vmem:[#allocation12 + $0xa8] sm:$0xff]  ;;  %v2984_v12 = vpack.c.bf16 %v1071_v11, %v1070_v10  ;;  %v1074_v16 = vld [vmem:[#allocation12 + $0xd0] sm:$0xff]  ;;  %s2563_s4 = sshll.u32 %s4873_s21, 7  ;;  %p4876_p10 = scmp.ne.s32.totalorder %s4874_s23, 0 }
 0x201   : > { %v2981_v9 = vpack.c.bf16 %v1069_v7, %v1068_v6  ;;  %v1072_v13 = vld [vmem:[#allocation12 + $0xc0] sm:$0xff]  ;;  %v1078_v22 = vld [vmem:[#allocation12 + $0xf0] sm:$0xff]  ;;  %v1341_v57 = vld [vmem:[#allocation12 + $0x138] sm:$0xff]  ;;  %s4700_s14 = scalar_lea.hbm %s4875_s27, %s2563_s4  ;;  %s3815_s29 = scalar_lea.vmem %s3814_s13, 256 }
 0x202   : > { %2951 = vmatpush3.bf16.msra.mxu0 %v2950_v14  ;;  %v1073_v14 = vld [vmem:[#allocation12 + $0xc8] sm:$0xff]  ;;  %v1076_v19 = vld [vmem:[#allocation12 + $0xe0] sm:$0xff]  ;;  %v1340_v56 = vld [vmem:[#allocation12 + $0x130] sm:$0xff]  ;;  %p3811_p5 = pnand %p3810_p1, %p4876_p10  ;;  %p3816_p3 = scmp.lt.s32.totalorder %s4702_s20, %s3814_s13 }
 0x203   : > { %2952 = vmatprep.subr.bf16.mxu0 %v3941_v8  ;;  %v2987_v15 = vpack.c.bf16 %v1073_v14, %v1072_v13  ;;  %v2532_v26 = vld [vmem:[%s4504_s16 + $0x10] sm:$0xff]  ;;  %v2531_v31 = vld [vmem:[#allocation14 + $0x1] ss:$0 sm:$0xff]  ;;  %v1349_v7 = vld [vmem:[#allocation12 + $0x178] sm:$0xff]  ;;  %p3817_p11 = scmp.lt.s32.totalorder %s3815_s29, %s3809_s0 }
 0x204   : > { %v1348_v6 = vld [vmem:[#allocation12 + $0x170] sm:$0xff]  ;;  %v2541_v10 = vld [vmem:[%s4504_s16 + $0x20] sm:$0xff]  ;;  %v2542_v11 = vld [vmem:[%s4504_s16 + $0x28] sm:$0xff]  ;;  %p3812_p9 = pneg %p3811_p5 }
 0x205   : > { %p3818_p12 = por %p3817_p11, %p3816_p3 }
 0x206   : > { %2954 = vmatpush3.bf16.msra.mxu0 %v2953_v17  ;;  %v1075_v17 = vld [vmem:[#allocation12 + $0xd8] sm:$0xff] }
 0x207   : > { %2955 = vmatprep.subr.bf16.mxu0 %v3941_v8  ;;  %v2990_v18 = vpack.c.bf16 %v1075_v17, %v1074_v16  ;;  %p3819_p8 = pnand %p3818_p12, %p3812_p9 }
 0x20a   : > { %2957 = vmatpush3.bf16.msra.mxu0 %v2956_v20  ;;  %v1077_v20 = vld [vmem:[#allocation12 + $0xe8] sm:$0xff] }
 0x20b   : > { %2958 = vmatprep.subr.bf16.mxu0 %v3941_v8  ;;  %v2993_v21 = vpack.c.bf16 %v1077_v20, %v1076_v19 }
 0x20e   : > { %2960 = vmatpush3.bf16.msra.mxu0 %v2959_v24  ;;  %v1079_v24 = vld [vmem:[#allocation12 + $0xf8] sm:$0xff] }
 0x20f   : > { %2961 = vmatprep.subr.bf16.mxu0 %v3941_v8  ;;  %v2996_v25 = vpack.c.bf16 %v1079_v24, %v1078_v22  ;;  %v2543_v24 = vld [vmem:[%s4510_s18 + $0x20] sm:$0xff] }
 0x212   : > { %2963 = vmatpush3.bf16.msra.mxu0 %v2962_v27  ;;  %v2533_v27 = vld [vmem:[%s4504_s16 + $0x18] sm:$0xff] }
 0x213   : > { %2964 = vmatprep.subr.bf16.mxu0 %v3941_v8  ;;  %v2999_v28 = vpack.c.bf16 %v2533_v27, %v2532_v26 }
 0x216   : > { %2966 = vmatpush3.bf16.msra.mxu0 %v2965_v30 }
 0x217   : > { %3002 = vmatprep.subr.bf16.mxu0 %v3941_v8 }
 0x284   : > { %v768_v1 = vpop.xlane.xlu0 %767 }
 0x285   : > { %v770_v2 = vmul.f32 0.0078125, %v768_v1  ;;  %v2975_v1 = vpack.c.bf16 %v1065_v63, %v1064_v62  ;;  %v1344_v62 = vld [vmem:[#allocation12 + $0x150] sm:$0xff]  ;;  %v1345_v63 = vld [vmem:[#allocation12 + $0x158] sm:$0xff] }
 0x287   : > { %v4540_v3 = vsub.f32 %v4536_v0, %v770_v2  ;;  %v1066_v2 = vld [vmem:[#allocation12 + $0x90] sm:$0xff] }
 0x289   : > { %v772_v4 = vmul.f32 %v4540_v3, %v4540_v3 }
 0x28b   : > { %773 = vadd.xlane.f32.xlu0 %v772_v4 }
 0x318   : > { %v774_v35 = vpop.xlane.xlu0 %773 }
 0x319   : > { %v775_v36 = vmul.f32 0.007874016, %v774_v35 }
 0x31b   : > { %3359 = vrsqrt.f32 %v775_v36  ;;  %vm778_vm3 = vcmp.eq.f32.partialorder %v775_v36, inf  ;;  %v781_v39 = vand.u32 2147483648, %v775_v36  ;;  %vm780_vm4 = vcmp.eq.f32.partialorder %v775_v36, 0.0 }
 0x325   : > { %v3360_v37 = vpop.eup %3359 }
 0x326   : > { %v777_v38 = vmul.f32 %v3360_v37, %v775_v36 }
 0x328   : > { %v779_v40 = vsel %vm778_vm3, %v775_v36, %v777_v38 }
 0x329   : > { %v782_v41 = vsel %vm780_vm4, %v781_v39, %v779_v40  ;;  %v2534_v39 = vld [vmem:[%s4510_s18 + $0x10] sm:$0xff]  ;;  %v2535_v40 = vld [vmem:[%s4510_s18 + $0x18] sm:$0xff] }
 0x32a   : > { %v783_v42 = vadd.f32 1e-06, %v782_v41  ;;  %v3003_v41 = vpack.c.bf16 %v2535_v40, %v2534_v39  ;;  %v1608_v39 = vld [vmem:[#allocation12 + $0x1a0] sm:$0xff]  ;;  %v1609_v40 = vld [vmem:[#allocation12 + $0x1a8] sm:$0xff] }
 0x32c   : > { %3361 = vrcp.f32 %v783_v42 }
 0x336   : > { %v3362_v43 = vpop.eup %3361 }
 0x337   : > { %v785_v45 = vmul.f32 %v3362_v43, %v4540_v3  ;;  %v1067_v3 = vld [vmem:[#allocation12 + $0x98] sm:$0xff] }
 0x338   : > { %v2978_v5 = vpack.c.bf16 %v1067_v3, %v1066_v2  ;;  %v1346_v2 = vld [vmem:[#allocation12 + $0x160] sm:$0xff]  ;;  %v1347_v3 = vld [vmem:[#allocation12 + $0x168] sm:$0xff] }
 0x339   : > { %v792_v47 = vmul.f32 %v2524_v44, %v785_v45  ;;  %v1334_v45 = vld [vmem:[#allocation12 + $0x100] sm:$0xff] }
 0x33b   : > { %v4570_v48 = vadd.f32 %v2525_v46, %v792_v47  ;;  %v1335_v46 = vld [vmem:[#allocation12 + $0x108] sm:$0xff] }
 0x33c   : > { %v3006_v47 = vpack.c.bf16 %v1335_v46, %v1334_v45  ;;  %v1612_v45 = vld [vmem:[#allocation12 + $0x1c0] sm:$0xff]  ;;  %v1613_v46 = vld [vmem:[#allocation12 + $0x1c8] sm:$0xff] }
 0x33d   : > { %2745 = vmatmul.mubr.f32.vlgmr.msra.gmra.mrb[0].mxu0 %v4570_v48 }
 0x33e   : > { %2807 = vmatprep.mubr.msk.f32.mxu0 %vm3942_vm0, %v3943_v23  ;;  %3004 = vmatpush3.bf16.msra.mxu0 %v3003_v41  ;;  %v3043_v41 = vpack.c.bf16 %v1609_v40, %v1608_v39  ;;  %v1883_v39 = vld [vmem:[#allocation15 + $0x48] sm:$0xff] }
 0x33f   : > { %3005 = vmatprep.subr.bf16.mxu0 %v3941_v8 }
 0x410   : > { %v889_v50 = vpop.f32.mrb[0].mxu0 }
 0x411   : > { %v890_v51 = vadd.f32 %v2526_v49, %v889_v50  ;;  %v2746_v52 = vpop.f32.mrb[1].mxu0  ;;  %v1336_v49 = vld [vmem:[#allocation12 + $0x110] sm:$0xff]  ;;  %v1337_v50 = vld [vmem:[#allocation12 + $0x118] sm:$0xff] }
 0x412   : > { %v3009_v52 = vpack.c.bf16 %v1337_v50, %v1336_v49  ;;  %v1614_v49 = vld [vmem:[#allocation12 + $0x1d0] sm:$0xff]  ;;  %v1615_v50 = vld [vmem:[#allocation12 + $0x1d8] sm:$0xff] }
 0x413   : > { %2752 = vmatmul.mubr.msk.f32.vlgmr.msra.gmra.mrb[0].mxu1 %vm897_vm1, %v890_v51 }
 0x414   : > { %2758 = vmatprep.mubr.msk.f32.mxu1 %vm3942_vm0, %v3943_v23  ;;  %2973 = vmatpush3.bf16.msra.mxu1 %v2972_v58  ;;  %v3015_v58 = vpack.c.bf16 %v1341_v57, %v1340_v56  ;;  %v1619_v56 = vld [vmem:[#allocation12 + $0x1f8] sm:$0xff] }
 0x415   : > { %2974 = vmatprep.subr.bf16.mxu1 %v3941_v8 }
 0x4e6   : > { %v973_v53 = vpop.f32.mrb[0].mxu1 }
 0x4e7   : > { %v2753_v54 = vpop.f32.mrb[1].mxu1  ;;  %v978_v55 = vsel %vm977_vm5, %v973_v53, -inf }
 0x4e8   : > { %979 = vmax.xlane.f32.xlu1 %v978_v55  ;;  %v1339_v54 = vld [vmem:[#allocation12 + $0x128] sm:$0xff] }
 0x575   : > { %v980_v59 = vpop.xlane.xlu1 %979 }
 0x576   : > { %v981_v60 = vsub.f32 %v973_v53, %v980_v59  ;;  %v1338_v53 = vld [vmem:[#allocation12 + $0x120] sm:$0xff] }
 0x577   : > { %v3012_v55 = vpack.c.bf16 %v1339_v54, %v1338_v53  ;;  %v1342_v59 = vld [vmem:[#allocation12 + $0x140] sm:$0xff]  ;;  %v1617_v53 = vld [vmem:[#allocation12 + $0x1e8] sm:$0xff] }
 0x578   : > { %v982_v61 = vmul.f32 1.442695, %v981_v60  ;;  %v1343_v60 = vld [vmem:[#allocation12 + $0x148] sm:$0xff] }
 0x57a   : > { %3363 = vpow2.f32 %v982_v61  ;;  %v3018_v61 = vpack.c.bf16 %v1343_v60, %v1342_v59  ;;  %v2551_v59 = vld [vmem:[%s4504_s16 + $0x38] sm:$0xff] }
 0x584   : > { %v4582_v4 = vpop.eup %3363 }
 0x585   : > { %2759 = vmatmul.mubr.msk.f32.vlgmr.msra.gmra.mrb[2].mxu1 %vm977_vm5, %v4582_v4 }
 0x586   : > { %2976 = vmatpush3.bf16.msra.mxu1 %v2975_v1  ;;  %2793 = vmatprep.mubr.msk.f32.mxu1 %vm3942_vm0, %v3943_v23  ;;  %v3021_v1 = vpack.c.bf16 %v1345_v63, %v1344_v62  ;;  %v2549_v63 = vld [vmem:[#allocation14 + $0x3] ss:$0 sm:$0xff] }
 0x587   : > { %2977 = vmatprep.subr.bf16.mxu1 %v3941_v8 }
 0x58a   : > { %2979 = vmatpush3.bf16.msra.mxu1 %v2978_v5  ;;  %v3024_v5 = vpack.c.bf16 %v1347_v3, %v1346_v2 }
 0x58b   : > { %2980 = vmatprep.subr.bf16.mxu1 %v3941_v8 }
 0x58e   : > { %2982 = vmatpush3.bf16.msra.mxu1 %v2981_v9  ;;  %v3027_v9 = vpack.c.bf16 %v1349_v7, %v1348_v6  ;;  %v984_v7 = vsel %vm977_vm5, %v4582_v4, 0.0 }
 0x58f   : > { %2983 = vmatprep.subr.bf16.mxu1 %v3941_v8 }
 0x592   : > { %2985 = vmatpush3.bf16.msra.mxu1 %v2984_v12  ;;  %v3030_v12 = vpack.c.bf16 %v2542_v11, %v2541_v10  ;;  %v2553_v10 = vld [vmem:[%s4510_s18 + $0x38] sm:$0xff] }
 0x593   : > { %2986 = vmatprep.subr.bf16.mxu1 %v3941_v8 }
 0x596   : > { %2988 = vmatpush3.bf16.msra.mxu1 %v2987_v15  ;;  %v2540_v15 = vld [vmem:[#allocation14 + $0x2] ss:$0 sm:$0xff] }
 0x597   : > { %2989 = vmatprep.subr.bf16.mxu1 %v3941_v8 }
 0x59a   : > { %2991 = vmatpush3.bf16.msra.mxu1 %v2990_v18 }
 0x59b   : > { %2992 = vmatprep.subr.bf16.mxu1 %v3941_v8 }
 0x59e   : > { %2994 = vmatpush3.bf16.msra.mxu1 %v2993_v21 }
 0x59f   : > { %2995 = vmatprep.subr.bf16.mxu1 %v3941_v8 }
 0x5a2   : > { %2997 = vmatpush3.bf16.msra.mxu1 %v2996_v25  ;;  %v2544_v25 = vld [vmem:[%s4510_s18 + $0x28] sm:$0xff] }
 0x5a3   : > { %2998 = vmatprep.subr.bf16.mxu1 %v3941_v8  ;;  %v3034_v26 = vpack.c.bf16 %v2544_v25, %v2543_v24 }
 0x5a5   : > { %2794 = vmatmul.mubr.f32.vlgmr.msra.gmra.mrb[4].mxu1 %v4570_v48 }
 0x5a6   : > { %2800 = vmatprep.mubr.msk.f32.mxu1 %vm3942_vm0, %v3943_v23 }
 0x5ab   : > { %3001 = vmatpush3.bf16.xpose.msk.msra.mxu1 %vm4562_vm2, %v2999_v28 }
 0x5ac   : > { %3029 = vmatprep.subr.bf16.mxu1 %v3941_v8 }
 0x658   : > { %v4604_v29 = vpop.f32.mrb[2].mxu1 }
 0x659   : > { %v2760_v30 = vpop.f32.mrb[3].mxu1 }
 0x678   : > { %v1154_v32 = vpop.f32.mrb[4].mxu1 }
 0x679   : > { %v1155_v33 = vadd.f32 %v2531_v31, %v1154_v32  ;;  %v2795_v35 = vpop.f32.mrb[5].mxu1  ;;  %v1604_v31 = vld [vmem:[#allocation12 + $0x180] sm:$0xff]  ;;  %v1605_v32 = vld [vmem:[#allocation12 + $0x188] sm:$0xff] }
 0x67a   : > { %v1606_v35 = vld [vmem:[#allocation12 + $0x190] sm:$0xff] }
 0x67b   : > { %2801 = vmatmul.mubr.msk.f32.vlgmr.msra.gmra.mrb[6].mxu1 %vm897_vm1, %v1155_v33  ;;  %v3037_v33 = vpack.c.bf16 %v1605_v32, %v1604_v31  ;;  %v1877_v32 = vld [vmem:[#allocation15 + $0x18] sm:$0xff] }
 0x67c   : > { %2849 = vmatprep.mubr.msk.f32.mxu1 %vm3942_vm0, %v3943_v23  ;;  %3032 = vmatpush3.bf16.xpose.msk.msra.mxu1 %vm4562_vm2, %v3030_v12 }
 0x67d   : > { %3033 = vmatprep.subr.bf16.mxu1 %v3941_v8 }
 0x74e   : > { %v1239_v36 = vpop.f32.mrb[6].mxu1 }
 0x74f   : > { %v2802_v37 = vpop.f32.mrb[7].mxu1  ;;  %v1243_v38 = vsel %vm977_vm5, %v1239_v36, -inf }
 0x750   : > { %1244 = vmax.xlane.f32.xlu1 %v1243_v38 }
 0x7dd   : > { %v1245_v42 = vpop.xlane.xlu1 %1244 }
 0x7de   : > { %v1246_v43 = vsub.f32 %v1239_v36, %v1245_v42  ;;  %v1607_v36 = vld [vmem:[#allocation12 + $0x198] sm:$0xff]  ;;  %v1610_v42 = vld [vmem:[#allocation12 + $0x1b0] sm:$0xff] }
 0x7df   : > { %v3040_v38 = vpack.c.bf16 %v1607_v36, %v1606_v35  ;;  %v1880_v36 = vld [vmem:[#allocation15 + $0x30] sm:$0xff] }
 0x7e0   : > { %v1247_v44 = vmul.f32 1.442695, %v1246_v43  ;;  %v1611_v43 = vld [vmem:[#allocation12 + $0x1b8] sm:$0xff] }
 0x7e2   : > { %3365 = vpow2.f32 %v1247_v44  ;;  %v3046_v44 = vpack.c.bf16 %v1611_v43, %v1610_v42  ;;  %v1885_v42 = vld [vmem:[#allocation15 + $0x58] sm:$0xff] }
 0x7ec   : > { %v3366_v51 = vpop.eup %3365 }
 0x7ed   : > { %2808 = vmatmul.mubr.msk.f32.vlgmr.msra.gmra.mrb[2].mxu0 %vm977_vm5, %v3366_v51  ;;  %v1249_v22 = vsel %vm977_vm5, %v3366_v51, 0.0  ;;  %v3052_v51 = vpack.c.bf16 %v1615_v50, %v1614_v49  ;;  %v1887_v49 = vld [vmem:[#allocation15 + $0x68] sm:$0xff] }
 0x7ee   : > { %3007 = vmatpush3.bf16.msra.mxu0 %v3006_v47  ;;  %2842 = vmatprep.mubr.msk.f32.mxu0 %vm3942_vm0, %v3943_v23  ;;  %v3049_v47 = vpack.c.bf16 %v1613_v46, %v1612_v45 }
 0x7ef   : > { %3008 = vmatprep.subr.bf16.mxu0 %v3941_v8 }
 0x7f2   : > { %3010 = vmatpush3.bf16.msra.mxu0 %v3009_v52  ;;  %v1616_v52 = vld [vmem:[#allocation12 + $0x1e0] sm:$0xff] }
 0x7f3   : > { %3011 = vmatprep.subr.bf16.mxu0 %v3941_v8  ;;  %v3055_v54 = vpack.c.bf16 %v1617_v53, %v1616_v52  ;;  %v1889_v52 = vld [vmem:[#allocation15 + $0x78] sm:$0xff] }
 0x7f6   : > { %3013 = vmatpush3.bf16.msra.mxu0 %v3012_v55  ;;  %v1618_v55 = vld [vmem:[#allocation12 + $0x1f0] sm:$0xff] }
 0x7f7   : > { %3014 = vmatprep.subr.bf16.mxu0 %v3941_v8  ;;  %v3058_v57 = vpack.c.bf16 %v1619_v56, %v1618_v55 }
 0x7fa   : > { %3016 = vmatpush3.bf16.msra.mxu0 %v3015_v58  ;;  %v2550_v58 = vld [vmem:[%s4504_s16 + $0x30] sm:$0xff] }
 0x7fb   : > { %3017 = vmatprep.subr.bf16.mxu0 %v3941_v8  ;;  %v3061_v60 = vpack.c.bf16 %v2551_v59, %v2550_v58 }
 0x7fe   : > { %3019 = vmatpush3.bf16.msra.mxu0 %v3018_v61 }
 0x7ff   : > { %3020 = vmatprep.subr.bf16.mxu0 %v3941_v8 }
 0x802   : > { %3022 = vmatpush3.bf16.msra.mxu0 %v3021_v1 }
 0x803   : > { %3023 = vmatprep.subr.bf16.mxu0 %v3941_v8 }
 0x806   : > { %3025 = vmatpush3.bf16.msra.mxu0 %v3024_v5 }
 0x807   : > { %3026 = vmatprep.subr.bf16.mxu0 %v3941_v8 }
 0x80a   : > { %3028 = vmatpush3.bf16.msra.mxu0 %v3027_v9  ;;  %v2552_v9 = vld [vmem:[%s4510_s18 + $0x30] sm:$0xff] }
 0x80b   : > { %3064 = vmatprep.subr.bf16.mxu0 %v3941_v8  ;;  %v3065_v11 = vpack.c.bf16 %v2553_v10, %v2552_v9  ;;  %v2004_v9 = vld [vmem:[#allocation21 + $0x10] sm:$0xff] }
 0x80d   : > { %2843 = vmatmul.mubr.f32.vlgmr.msra.gmra.mrb[4].mxu0 %v4570_v48 }
 0x80e   : > { %2905 = vmatprep.mubr.msk.f32.mxu0 %vm3942_vm0, %v3943_v23  ;;  %3066 = vmatpush3.bf16.msra.mxu0 %v3065_v11  ;;  %v2009_v11 = vld [vmem:[#allocation21 + $0x38] sm:$0xff] }
 0x80f   : > { %3067 = vmatprep.subr.bf16.mxu0 %v3941_v8 }
 0x8c0   : > { %v4632_v13 = vpop.f32.mrb[2].mxu0 }
 0x8c1   : > { %v2809_v14 = vpop.f32.mrb[3].mxu0 }
 0x8e0   : > { %v1424_v16 = vpop.f32.mrb[4].mxu0 }
 0x8e1   : > { %v1425_v17 = vadd.f32 %v2540_v15, %v1424_v16  ;;  %v2844_v18 = vpop.f32.mrb[5].mxu0 }
 0x8e3   : > { %2850 = vmatmul.mubr.msk.f32.vlgmr.msra.gmra.mrb[8].mxu1 %vm897_vm1, %v1425_v17 }
 0x8e4   : > { %2856 = vmatprep.mubr.msk.f32.mxu1 %vm3942_vm0, %v3943_v23  ;;  %3035 = vmatpush3.bf16.msra.mxu1 %v3034_v26 }
 0x8e5   : > { %3036 = vmatprep.subr.bf16.mxu1 %v3941_v8 }
 0x9b6   : > { %v1509_v19 = vpop.f32.mrb[8].mxu1 }
 0x9b7   : > { %v2851_v20 = vpop.f32.mrb[9].mxu1  ;;  %v1513_v21 = vsel %vm977_vm5, %v1509_v19, -inf }
 0x9b8   : > { %1514 = vmax.xlane.f32.xlu0 %v1513_v21 }
 0x9bc   : > { %1250 = vadd.xlane.f32.xlu0 %v1249_v22 }
 0xa45   : > { %v1515_v27 = vpop.xlane.xlu0 %1514 }
 0xa46   : > { %v1516_v28 = vsub.f32 %v1509_v19, %v1515_v27  ;;  %v1874_v27 = vld [vmem:[#allocation15] sm:$0xff] }
 0xa48   : > { %v1517_v30 = vmul.f32 1.442695, %v1516_v28  ;;  %v1875_v28 = vld [vmem:[#allocation15 + $0x8] sm:$0xff] }
 0xa49   : > { %v1251_v24 = vpop.xlane.xlu0 %1250  ;;  %v3068_v31 = vpack.c.bf16 %v1875_v28, %v1874_v27  ;;  %v2016_v27 = vld [vmem:[#allocation21 + $0x70] sm:$0xff] }
 0xa4a   : > { %3367 = vpow2.f32 %v1517_v30  ;;  %v1876_v30 = vld [vmem:[#allocation15 + $0x10] sm:$0xff] }
 0xa54   : > { %v3368_v37 = vpop.eup %3367 }
 0xa55   : > { %2857 = vmatmul.mubr.msk.f32.vlgmr.msra.gmra.mrb[10].mxu1 %vm977_vm5, %v3368_v37  ;;  %v1519_v34 = vsel %vm977_vm5, %v3368_v37, 0.0  ;;  %v1881_v37 = vld [vmem:[#allocation15 + $0x38] sm:$0xff] }
 0xa56   : > { %3038 = vmatpush3.bf16.msra.mxu1 %v3037_v33  ;;  %2891 = vmatprep.mubr.msk.f32.mxu1 %vm3942_vm0, %v3943_v23  ;;  %v1878_v33 = vld [vmem:[#allocation15 + $0x20] sm:$0xff] }
 0xa57   : > { %3039 = vmatprep.subr.bf16.mxu1 %v3941_v8 }
 0xa5a   : > { %3041 = vmatpush3.bf16.msra.mxu1 %v3040_v38  ;;  %v1882_v38 = vld [vmem:[#allocation15 + $0x40] sm:$0xff] }
 0xa5b   : > { %3042 = vmatprep.subr.bf16.mxu1 %v3941_v8  ;;  %v3080_v40 = vpack.c.bf16 %v1883_v39, %v1882_v38  ;;  %v2027_v39 = vld [vmem:[#allocation21 + $0xc8] sm:$0xff] }
 0xa5e   : > { %3044 = vmatpush3.bf16.msra.mxu1 %v3043_v41  ;;  %v1884_v41 = vld [vmem:[#allocation15 + $0x50] sm:$0xff] }
 0xa5f   : > { %3045 = vmatprep.subr.bf16.mxu1 %v3941_v8  ;;  %v3083_v43 = vpack.c.bf16 %v1885_v42, %v1884_v41 }
 0xa62   : > { %3047 = vmatpush3.bf16.msra.mxu1 %v3046_v44 }
 0xa63   : > { %3048 = vmatprep.subr.bf16.mxu1 %v3941_v8 }
 0xa66   : > { %3050 = vmatpush3.bf16.msra.mxu1 %v3049_v47  ;;  %v1886_v47 = vld [vmem:[#allocation15 + $0x60] sm:$0xff] }
 0xa67   : > { %3051 = vmatprep.subr.bf16.mxu1 %v3941_v8  ;;  %v3086_v50 = vpack.c.bf16 %v1887_v49, %v1886_v47 }
 0xa6a   : > { %3053 = vmatpush3.bf16.msra.mxu1 %v3052_v51  ;;  %v1888_v51 = vld [vmem:[#allocation15 + $0x70] sm:$0xff] }
 0xa6b   : > { %3054 = vmatprep.subr.bf16.mxu1 %v3941_v8  ;;  %v3089_v53 = vpack.c.bf16 %v1889_v52, %v1888_v51  ;;  %v2032_v51 = vld [vmem:[#allocation21 + $0xf0] sm:$0xff] }
 0xa6e   : > { %3056 = vmatpush3.bf16.msra.mxu1 %v3055_v54 }
 0xa6f   : > { %3057 = vmatprep.subr.bf16.mxu1 %v3941_v8 }
 0xa72   : > { %3059 = vmatpush3.bf16.msra.mxu1 %v3058_v57 }
 0xa73   : > { %3060 = vmatprep.subr.bf16.mxu1 %v3941_v8 }
 0xa75   : > { %2892 = vmatmul.mubr.f32.vlgmr.msra.gmra.mrb[12].mxu1 %v4570_v48 }
 0xa76   : > { %2898 = vmatprep.mubr.msk.f32.mxu1 %vm3942_vm0, %v3943_v23 }
 0xa7b   : > { %3063 = vmatpush3.bf16.xpose.msk.msra.mxu1 %vm4562_vm2, %v3061_v60  ;;  %v2558_v60 = vld [vmem:[#allocation17] ss:$0 sm:$0xff] }
 0xb28   : > { %v1591_v61 = vpop.f32.mrb[10].mxu1 }
 0xb29   : > { %v2858_v62 = vpop.f32.mrb[11].mxu1 }
 0xb48   : > { %v1694_v1 = vpop.f32.mrb[12].mxu1 }
 0xb49   : > { %v1695_v2 = vadd.f32 %v2549_v63, %v1694_v1  ;;  %v2893_v3 = vpop.f32.mrb[13].mxu1 }
 0xb4b   : > { %2899 = vmatmul.mubr.msk.f32.vlgmr.msra.gmra.mrb[14].mxu1 %vm897_vm1, %v1695_v2 }
 0xb4c   : > { %2110 = vmatprep.mubr.f32.mxu1 %v3943_v23 }
 0xc1e   : > { %v1779_v48 = vpop.f32.mrb[14].mxu1 }
 0xc1f   : > { %v2900_v5 = vpop.f32.mrb[15].mxu1  ;;  %v1783_v6 = vsel %vm977_vm5, %v1779_v48, -inf }
 0xc20   : > { %1784 = vmax.xlane.f32.xlu1 %v1783_v6  ;;  %v2003_v5 = vld [vmem:[#allocation21 + $0x8] sm:$0xff]  ;;  %v2005_v6 = vld [vmem:[#allocation21 + $0x18] sm:$0xff] }
 0xc24   : > { %1520 = vadd.xlane.f32.xlu1 %v1519_v34  ;;  %v3091_v34 = vpack.c.bf16 %v2005_v6, %v2003_v5  ;;  %v2123_v6 = vld [vmem:[#allocation24 + $0x20] sm:$0xff] }
 0xc26   : > { %3092 = vmatprep.subr.bf16.mxu1 %v3091_v34  ;;  %v2124_v34 = vld [vmem:[#allocation24 + $0x28] sm:$0xff] }
 0xc28   : > { %985 = vadd.xlane.f32.xlu1 %v984_v7  ;;  %v2002_v7 = vld [vmem:[#allocation21] sm:$0xff] }
 0xc29   : > { %v3093_v10 = vpack.c.bf16 %v2004_v9, %v2002_v7  ;;  %v2141_v7 = vld [vmem:[#allocation24 + $0xb0] sm:$0xff]  ;;  %v2142_v9 = vld [vmem:[#allocation24 + $0xb8] sm:$0xff] }
 0xc2b   : > { %3094 = vmatpush1.bf16.msra.mxu1 %v3093_v10  ;;  %v3133_v10 = vpack.c.bf16 %v2124_v34, %v2123_v6  ;;  %v2561_v6 = vld [vmem:[#allocation26] ss:$0 sm:$0xff] }
 0xcad   : > { %v1785_v12 = vpop.xlane.xlu1 %1784 }
 0xcae   : > { %v1786_v14 = vsub.f32 %v1779_v48, %v1785_v12 }
 0xcb0   : > { %v1787_v15 = vmul.f32 1.442695, %v1786_v14  ;;  %v2006_v14 = vld [vmem:[#allocation21 + $0x20] sm:$0xff] }
 0xcb1   : > { %v1521_v16 = vpop.xlane.xlu1 %1520 }
 0xcb2   : > { %3369 = vpow2.f32 %v1787_v15  ;;  %v2008_v15 = vld [vmem:[#allocation21 + $0x30] sm:$0xff] }
 0xcb3   : > { %3371 = vrcp.f32 %v1521_v16  ;;  %v3097_v16 = vpack.c.bf16 %v2008_v15, %v2006_v14  ;;  %v2143_v14 = vld [vmem:[#allocation24 + $0xc0] sm:$0xff]  ;;  %v2144_v15 = vld [vmem:[#allocation24 + $0xc8] sm:$0xff] }
 0xcb5   : > { %v986_v17 = vpop.xlane.xlu1 %985 }
 0xcb6   : > { %3373 = vrcp.f32 %v986_v17  ;;  %v2011_v17 = vld [vmem:[#allocation21 + $0x48] sm:$0xff] }
 0xcb7   : > { %3375 = vrcp.f32 %v1251_v24  ;;  %v2017_v24 = vld [vmem:[#allocation21 + $0x78] sm:$0xff] }
 0xcbc   : > { %v3370_v18 = vpop.eup %3369 }
 0xcbd   : > { %v3372_v19 = vpop.eup %3371  ;;  %2906 = vmatmul.mubr.msk.f32.vlgmr.msra.gmra.mrb[6].mxu0 %vm977_vm5, %v3370_v18  ;;  %v1789_v4 = vsel %vm977_vm5, %v3370_v18, 0.0  ;;  %v2013_v18 = vld [vmem:[#allocation21 + $0x58] sm:$0xff] }
 0xcbe   : > { %1790 = vadd.xlane.f32.xlu0 %v1789_v4  ;;  %v1596_v20 = vmul.f32 %v3372_v19, %v1591_v61  ;;  %2940 = vmatprep.mubr.msk.f32.mxu0 %vm3942_vm0, %v3943_v23  ;;  %v3071_v23 = vpack.c.bf16 %v1877_v32, %v1876_v30  ;;  %v3099_v19 = vpack.c.bf16 %v2013_v18, %v2011_v17  ;;  %v2010_v4 = vld [vmem:[#allocation21 + $0x40] sm:$0xff]  ;;  %v2019_v30 = vld [vmem:[#allocation21 + $0x88] sm:$0xff] }
 0xcbf   : > { %3069 = vmatpush3.bf16.msra.mxu0 %v3068_v31  ;;  %v2021_v31 = vld [vmem:[#allocation21 + $0x98] sm:$0xff]  ;;  %v3139_v17 = vpack.c.bf16 %v2144_v15, %v2143_v14  ;;  %v2127_v18 = vld [vmem:[#allocation24 + $0x40] sm:$0xff] }
 0xcc0   : > { %v3374_v21 = vpop.eup %3373  ;;  %1598 = vrot.lane.b32.xlu1 %v1596_v20, %s3944_s17  ;;  %3070 = vmatprep.subr.bf16.mxu0 %v3941_v8  ;;  %v2012_v20 = vld [vmem:[#allocation21 + $0x50] sm:$0xff]  ;;  %v3107_v32 = vpack.c.bf16 %v2021_v31, %v2019_v30 }
 0xcc1   : > { %v1061_v22 = vmul.f32 %v3374_v21, %v4604_v29  ;;  %v3376_v25 = vpop.eup %3375  ;;  %v1879_v29 = vld [vmem:[#allocation15 + $0x28] sm:$0xff]  ;;  %v3101_v21 = vpack.c.bf16 %v2012_v20, %v2010_v4  ;;  %v2145_v4 = vld [vmem:[#allocation24 + $0xd0] sm:$0xff]  ;;  %v2146_v20 = vld [vmem:[#allocation24 + $0xd8] sm:$0xff] }
 0xcc2   : > { %v1326_v26 = vmul.f32 %v3376_v25, %v4632_v13  ;;  %v3074_v35 = vpack.c.bf16 %v1879_v29, %v1878_v33  ;;  %v3077_v13 = vpack.c.bf16 %v1881_v37, %v1880_v36  ;;  %v2020_v33 = vld [vmem:[#allocation21 + $0x90] sm:$0xff]  ;;  %v2023_v29 = vld [vmem:[#allocation21 + $0xa8] sm:$0xff]  ;;  %v2025_v36 = vld [vmem:[#allocation21 + $0xb8] sm:$0xff] }
 0xcc3   : > { %1062 = vst.msk [vmem:[#allocation2] sm:$0xff] %vm897_vm1, %v1061_v22  ;;  %3072 = vmatpush3.bf16.msra.mxu0 %v3071_v23  ;;  %v2015_v22 = vld [vmem:[#allocation21 + $0x68] sm:$0xff]  ;;  %v2018_v23 = vld [vmem:[#allocation21 + $0x80] sm:$0xff]  ;;  %v3111_v38 = vpack.c.bf16 %v2025_v36, %v2023_v29 }
 0xcc4   : > { %3073 = vmatprep.subr.bf16.mxu0 %v3941_v8  ;;  %v3103_v25 = vpack.c.bf16 %v2017_v24, %v2015_v22  ;;  %v2022_v37 = vld [vmem:[#allocation21 + $0xa0] sm:$0xff]  ;;  %v3143_v22 = vpack.c.bf16 %v2146_v20, %v2145_v4  ;;  %v2129_v24 = vld [vmem:[#allocation24 + $0x50] sm:$0xff] }
 0xcc7   : > { %3075 = vmatpush3.bf16.msra.mxu0 %v3074_v35  ;;  %v3109_v35 = vpack.c.bf16 %v2020_v33, %v2018_v23 }
 0xcc8   : > { %3076 = vmatprep.subr.bf16.mxu0 %v3941_v8 }
 0xccb   : > { %3078 = vmatpush3.bf16.msra.mxu0 %v3077_v13  ;;  %v2024_v13 = vld [vmem:[#allocation21 + $0xb0] sm:$0xff] }
 0xccc   : > { %3079 = vmatprep.subr.bf16.mxu0 %v3941_v8  ;;  %v3113_v41 = vpack.c.bf16 %v2024_v13, %v2022_v37 }
 0xccf   : > { %3081 = vmatpush3.bf16.msra.mxu0 %v3080_v40  ;;  %v2029_v40 = vld [vmem:[#allocation21 + $0xd8] sm:$0xff] }
 0xcd0   : > { %3082 = vmatprep.subr.bf16.mxu0 %v3941_v8  ;;  %v3115_v42 = vpack.c.bf16 %v2029_v40, %v2027_v39  ;;  %v2560_v40 = vld [vmem:[#allocation20] ss:$0 sm:$0xff] }
 0xcd3   : > { %3084 = vmatpush3.bf16.msra.mxu0 %v3083_v43  ;;  %v2026_v43 = vld [vmem:[#allocation21 + $0xc0] sm:$0xff] }
 0xcd4   : > { %1328 = vrot.lane.b32.xlu0 %v1326_v26, %s3945_s30  ;;  %3085 = vmatprep.subr.bf16.mxu0 %v3941_v8  ;;  %v2014_v26 = vld [vmem:[#allocation21 + $0x60] sm:$0xff] }
 0xcd5   : > { %v3105_v28 = vpack.c.bf16 %v2016_v27, %v2014_v26  ;;  %v2147_v26 = vld [vmem:[#allocation24 + $0xe0] sm:$0xff]  ;;  %v2148_v27 = vld [vmem:[#allocation24 + $0xe8] sm:$0xff] }
 0xcd6   : > { %v3147_v30 = vpack.c.bf16 %v2148_v27, %v2147_v26 }
 0xcd7   : > { %3087 = vmatpush3.bf16.msra.mxu0 %v3086_v50  ;;  %v2030_v50 = vld [vmem:[#allocation21 + $0xe0] sm:$0xff] }
 0xcd8   : > { %3088 = vmatprep.subr.bf16.mxu0 %v3941_v8  ;;  %v3121_v52 = vpack.c.bf16 %v2032_v51, %v2030_v50  ;;  %v2133_v50 = vld [vmem:[#allocation24 + $0x70] sm:$0xff]  ;;  %v2134_v51 = vld [vmem:[#allocation24 + $0x78] sm:$0xff] }
 0xcdb   : > { %3090 = vmatpush3.bf16.msra.mxu0 %v3089_v53  ;;  %v2135_v53 = vld [vmem:[#allocation24 + $0x80] sm:$0xff] }
 0xd32   : > { %v1599_v46 = vpop.permute.xlu1 %1598 }
 0xd4b   : > { %v1791_v44 = vpop.xlane.xlu0 %1790 }
 0xd4c   : > { %3377 = vrcp.f32 %v1791_v44  ;;  %v2028_v44 = vld [vmem:[#allocation21 + $0xd0] sm:$0xff] }
 0xd4d   : > { %v3117_v47 = vpack.c.bf16 %v2028_v44, %v2026_v43  ;;  %v2131_v43 = vld [vmem:[#allocation24 + $0x60] sm:$0xff]  ;;  %v2132_v44 = vld [vmem:[#allocation24 + $0x68] sm:$0xff] }
 0xd4f   : > { %v1329_v45 = vpop.permute.xlu0 %1328 }
 0xd50   : > { %1332 = vst.msk [vmem:[#allocation2] sm:$0xff] %vm1331_vm6, %v1329_v45  ;;  %v2031_v45 = vld [vmem:[#allocation21 + $0xe8] sm:$0xff] }
 0xd51   : > { %1602 = vst.msk [vmem:[#allocation2] sm:$0xff] %vm1601_vm7, %v1599_v46  ;;  %v2033_v46 = vld [vmem:[#allocation21 + $0xf8] sm:$0xff] }
 0xd52   : > { %v3119_v49 = vpack.c.bf16 %v2033_v46, %v2031_v45  ;;  %v3149_v45 = vpack.c.bf16 %v2132_v44, %v2131_v43  ;;  %v2149_v46 = vld [vmem:[#allocation24 + $0xf0] sm:$0xff] }
 0xd56   : > { %v3378_v54 = vpop.eup %3377 }
 0xd90   : > { %v1861_v55 = vpop.f32.mrb[6].mxu0 }
 0xd91   : > { %v1866_v56 = vmul.f32 %v3378_v54, %v1861_v55  ;;  %v2907_v57 = vpop.f32.mrb[7].mxu0  ;;  %v2136_v54 = vld [vmem:[#allocation24 + $0x88] sm:$0xff]  ;;  %v2119_v55 = vld [vmem:[#allocation24] sm:$0xff] }
 0xd92   : > { %v2120_v57 = vld [vmem:[#allocation24 + $0x8] sm:$0xff] }
 0xd93   : > { %1868 = vrot.lane.b32.xlu1 %v1866_v56, %s3946_s11  ;;  %v3123_v56 = vpack.c.bf16 %v2136_v54, %v2135_v53  ;;  %v2036_v53 = vlaneseq }
 0xd95   : > { %3124 = vmatprep.subr.bf16.mxu0 %v3123_v56  ;;  %v2037_v54 = vshrl.u32 %v2036_v53, 7 }
 0xd97   : > { %v2042_v56 = vsub.s32 1, %v2037_v54 }
 0xe05   : > { %v1869_v58 = vpop.permute.xlu1 %1868 }
 0xe06   : > { %1872 = vst.msk [vmem:[#allocation2] sm:$0xff] %vm1871_vm8, %v1869_v58  ;;  %v2137_v58 = vld [vmem:[#allocation24 + $0x90] sm:$0xff] }
 0xe0d   : > { %v1873_v59 = vld [vmem:[#allocation2] sm:$0xff] }
 0xe0e   : > { %2941 = vmatmul.mubr.f32.vlgmr.msra.gmra.mrb[8].mxu0 %v1873_v59  ;;  %v2138_v59 = vld [vmem:[#allocation24 + $0x98] sm:$0xff] }
 0xee1   : > { %v1963_v61 = vpop.f32.mrb[8].mxu0 }
 0xee2   : > { %v1964_v62 = vadd.f32 %v2558_v60, %v1963_v61  ;;  %v2942_v63 = vpop.f32.mrb[9].mxu0  ;;  %v3125_v60 = vpack.c.bf16 %v2120_v57, %v2119_v55  ;;  %v3127_v61 = vpack.c.bf16 %v2138_v59, %v2137_v58  ;;  %v2038_v55 = vsub.s32 0, %v2037_v54 }
 0xee3   : > { %v2122_v63 = vld [vmem:[#allocation24 + $0x18] sm:$0xff] }
 0xee4   : > { %v4684_v1 = vadd.f32 %v1964_v62, %v4536_v0  ;;  %v2007_v0 = vld [vmem:[#allocation21 + $0x28] sm:$0xff]  ;;  %v2121_v62 = vld [vmem:[#allocation24 + $0x10] sm:$0xff]  ;;  %3126 = vmatpush3.bf16.msra.mxu0 %v3125_v60 }
 0xee5   : > { %v3095_v12 = vpack.c.bf16 %v2009_v11, %v2007_v0  ;;  %3128 = vmatprep.subr.bf16.mxu0 %v3127_v61  ;;  %v3135_v0 = vpack.c.bf16 %v2142_v9, %v2141_v7  ;;  %v2125_v11 = vld [vmem:[#allocation24 + $0x30] sm:$0xff] }
 0xee6   : > { %1970 = vadd.xlane.f32.xlu1 %v4684_v1 }
 0xee7   : > { %3096 = vmatprep.subr.bf16.mxu1 %v3095_v12  ;;  %v2126_v12 = vld [vmem:[#allocation24 + $0x38] sm:$0xff] }
 0xee8   : > { %3098 = vmatpush1.bf16.msra.mxu1 %v3097_v16  ;;  %v3137_v16 = vpack.c.bf16 %v2126_v12, %v2125_v11 }
 0xee9   : > { %3100 = vmatprep.subr.bf16.mxu1 %v3099_v19  ;;  %v2128_v19 = vld [vmem:[#allocation24 + $0x48] sm:$0xff] }
 0xeec   : > { %3102 = vmatpush1.bf16.msra.mxu1 %v3101_v21  ;;  %v3141_v21 = vpack.c.bf16 %v2128_v19, %v2127_v18 }
 0xeed   : > { %3104 = vmatprep.subr.bf16.mxu1 %v3103_v25  ;;  %v2130_v25 = vld [vmem:[#allocation24 + $0x58] sm:$0xff] }
 0xef0   : > { %3106 = vmatpush1.bf16.msra.mxu1 %v3105_v28  ;;  %v3145_v28 = vpack.c.bf16 %v2130_v25, %v2129_v24 }
 0xef1   : > { %3108 = vmatprep.subr.bf16.mxu1 %v3107_v32 }
 0xef4   : > { %3110 = vmatpush1.bf16.msra.mxu1 %v3109_v35 }
 0xef5   : > { %3112 = vmatprep.subr.bf16.mxu1 %v3111_v38  ;;  %v2559_v38 = vld [vmem:[#allocation18] ss:$0 sm:$0xff] }
 0xef8   : > { %3114 = vmatpush1.bf16.msra.mxu1 %v3113_v41 }
 0xef9   : > { %3116 = vmatprep.subr.bf16.mxu1 %v3115_v42 }
 0xefc   : > { %3118 = vmatpush1.bf16.msra.mxu1 %v3117_v47  ;;  %v2150_v47 = vld [vmem:[#allocation24 + $0xf8] sm:$0xff] }
 0xefd   : > { %3120 = vmatprep.subr.bf16.mxu1 %v3119_v49  ;;  %v3151_v49 = vpack.c.bf16 %v2150_v47, %v2149_v46 }
 0xf00   : > { %3122 = vmatpush1.bf16.msra.mxu1 %v3121_v52  ;;  %v3153_v52 = vpack.c.bf16 %v2134_v51, %v2133_v50 }
 0xf73   : > { %v1971_v8 = vpop.xlane.xlu1 %1970 }
 0xf74   : > { %v1972_v2 = vmul.f32 0.0078125, %v1971_v8  ;;  %v2139_v8 = vld [vmem:[#allocation24 + $0xa0] sm:$0xff] }
 0xf76   : > { %v4688_v3 = vsub.f32 %v4684_v1, %v1972_v2  ;;  %v2140_v2 = vld [vmem:[#allocation24 + $0xa8] sm:$0xff] }
 0xf77   : > { %v3131_v5 = vpack.c.bf16 %v2140_v2, %v2139_v8 }
 0xf78   : > { %v1974_v48 = vmul.f32 %v4688_v3, %v4688_v3 }
 0xf7a   : > { %1975 = vadd.xlane.f32.xlu0 %v1974_v48  ;;  %v3129_v48 = vpack.c.bf16 %v2122_v63, %v2121_v62 }
 0xf7c   : > { %3130 = vmatpush3.bf16.msra.mxu0 %v3129_v48 }
 0xf7d   : > { %3132 = vmatprep.subr.bf16.mxu0 %v3131_v5 }
 0xf80   : > { %3134 = vmatpush3.bf16.msra.mxu0 %v3133_v10 }
 0xf81   : > { %3136 = vmatprep.subr.bf16.mxu0 %v3135_v0 }
 0xf84   : > { %3138 = vmatpush3.bf16.msra.mxu0 %v3137_v16 }
 0xf85   : > { %3140 = vmatprep.subr.bf16.mxu0 %v3139_v17 }
 0xf88   : > { %3142 = vmatpush3.bf16.msra.mxu0 %v3141_v21 }
 0xf89   : > { %3144 = vmatprep.subr.bf16.mxu0 %v3143_v22 }
 0xf8c   : > { %3146 = vmatpush3.bf16.msra.mxu0 %v3145_v28 }
 0xf8d   : > { %3148 = vmatprep.subr.bf16.mxu0 %v3147_v30 }
 0xf90   : > { %3150 = vmatpush3.bf16.msra.mxu0 %v3149_v45 }
 0xf91   : > { %3152 = vmatprep.subr.bf16.mxu0 %v3151_v49 }
 0xf94   : > { %3154 = vmatpush3.bf16.msra.mxu0 %v3153_v52 }
0x1007   : > { %v1976_v31 = vpop.xlane.xlu0 %1975 }
0x1008   : > { %v1977_v32 = vmul.f32 0.007874016, %v1976_v31 }
0x100a   : > { %3379 = vrsqrt.f32 %v1977_v32  ;;  %vm1980_vm9 = vcmp.eq.f32.partialorder %v1977_v32, inf  ;;  %v1983_v29 = vand.u32 2147483648, %v1977_v32  ;;  %vm1982_vm10 = vcmp.eq.f32.partialorder %v1977_v32, 0.0 }
0x1014   : > { %v3380_v23 = vpop.eup %3379 }
0x1015   : > { %v1979_v33 = vmul.f32 %v3380_v23, %v1977_v32 }
0x1017   : > { %v1981_v35 = vsel %vm1980_vm9, %v1977_v32, %v1979_v33 }
0x1018   : > { %v1984_v36 = vsel %vm1982_vm10, %v1983_v29, %v1981_v35 }
0x1019   : > { %v1985_v37 = vadd.f32 1e-06, %v1984_v36 }
0x101b   : > { %3381 = vrcp.f32 %v1985_v37 }
0x1025   : > { %v3382_v13 = vpop.eup %3381 }
0x1026   : > { %v1987_v39 = vmul.f32 %v3382_v13, %v4688_v3  ;;  %v2034_v3 = vld [vmem:[#allocation23] sm:$0x3] }
0x1027   : > { %v2039_v57 = vrot.slane %v2034_v3, %v2038_v55  ;;  %v2043_v58 = vrot.slane %v2034_v3, %v2042_v56 }
0x1028   : > { %v1994_v41 = vmul.f32 %v2559_v38, %v1987_v39 }
0x102a   : > { %v2001_v42 = vadd.f32 %v2560_v40, %v1994_v41 }
0x102c   : > { %2111 = vmatmul.mubr.f32.vlgmr.msra.gmra.mrb[16].mxu1 %v2001_v42 }
0x10ff   : > { %v2112_v59 = vpop.f32.mrb[16].mxu1 }
0x1100   : > { %v2113_v60 = vadd.f32 %v2112_v59, %v2039_v57  ;;  %v2114_v61 = vpop.f32.mrb[17].mxu1 }
0x1101   : > { %v2115_v62 = vadd.f32 %v2114_v61, %v2043_v58 }
0x1102   : > { %v2117_v8 = vmax.f32 %v2113_v60, 0.0 }
0x1103   : > { %v2118_v63 = vmax.f32 %v2115_v62, 0.0 }
0x1105   : > { %2215 = vmatprep.mubr.f32.mxu0 %v2118_v63 }
0x1106   : > { %2216 = vmatmul.mubr.f32.vlgmr.msra.gmra.mrb[10].mxu0 %v2117_v8 }
0x11d9   : > { %v2709_v2 = vpop.f32.mrb[10].mxu0 }
0x11da   : > { %v2710_v48 = vpop.f32.mrb[11].mxu0 }
0x11db   : > { %v2711_v5 = vadd.f32 %v2710_v48, %v2709_v2 }
0x11dd   : > { %v2221_v34 = vadd.f32 %v2711_v5, %v4684_v1 }
0x11df   : > { %v2229_v7 = vadd.f32 %v2561_v6, %v2221_v34 }
0x11e1   : > { %2230 = vst [vmem:[%s763_s24] sm:$0xff] %v2229_v7 }
0x11e2   : > { %3822 = shalt.err (!%p3819_p8)
}
0x11e3   : > { %s3823_s10 = scalar_lea.hbm %s4700_s14, 128  ;;  %s3827_s16 = scalar_lea.hbm %s4875_s27, 256 }
0x11e4   : > { %p3824_p13 = scmp.ne.s32.totalorder %s4700_s14, %s3823_s10  ;;  %p3828_p4 = scmp.lt.u32.totalorder %s4700_s14, %s4875_s27 }
0x11e5   : > { %p3829_p2 = scmp.lt.u32.totalorder %s3827_s16, %s3823_s10  ;;  %p3831_p1 = scmp.lt.u32.totalorder %s3823_s10, %s4700_s14 }
0x11e6   : > { %p3825_p0 = pnand %p3824_p13, %p4876_p10 }
0x11e7   : > { %p3830_p7 = por %p3829_p2, %p3828_p4 }
0x11e8   : > { %p3826_p6 = pneg %p3825_p0 }
0x11e9   : > { %p3832_p5 = por %p3831_p1, %p3830_p7 }
0x11eb   : > { %p3833_p9 = pnand %p3832_p5, %p3826_p6 }
0x11ed   : > { %3836 = shalt.err (!%p3833_p9)
}
0x11ee   : > { %3209 = dma.vmem_to_hbm [thread:$0]  (%p4876_p10), %s4702_s20, 128, %s4700_s14, %s2232_s25  }
0x11ef PF: > { %s4877_s30 = sld [smem:[#allocation37_spill]]  ;;  %s4878_s11 = sld [smem:[#allocation46_spill]] }
0x11f0   : > { %s4879_s21 = sld [smem:[#allocation40_spill]] }
0x11f5   : > { %s2258_s4 = sand.u32 1, %s4877_s30   ;;  %p4880_p3 = scmp.ne.s32.totalorder %s4878_s11, 0 }
0x11f6   : > { %p4881_p11 = scmp.ge.s32.totalorder %s4879_s21, 2  ;;  %s2259_s24 = scalar_lea.sflag [#allocation5], %s2258_s4 }
0x11f8   : > { %p3259_p12 = pnand %p4881_p11, %p4880_p3 }
0x11fa   : > { %3894 = dma.done.wait (!%p3259_p12), %s2259_s24, 128  }
0x11fb   : > { %3896 = vsyncadd (!%p3259_p12), %s2259_s24, 4294967168  ;;  %s40_s23 = sadd.s32 1, %s4879_s21   ;;  %s4882_s1 = sld [smem:[#allocation38_spill]] }
0x11fc   : > { %p37_p8 = scmp.ge.s32.totalorder %s40_s23, 4   ;;  %s4883_s20 = sld [smem:[#allocation45_spill]] }
0x11fd   : > { %s4884_s7 = sld [smem:[#allocation43_spill]]  ;;  %s4885_s18 = smov %s3903_s19 }
0x11fe   : > { %s4887_s21 = smov %s3915_s22  ;;  %39 = sbr.rel (!%p37_p8) target bundleno = 28 (0x1c), region = 209 }
0x1201   : > { %s4886_s19 = smov %s4882_s1 }
0x1203   : > { %s4888_s22 = smov %s4884_s7 }
0x1205   :  { %2264 = vsyncpa [#allocation4], 1 }
0x1206   :  { %2266 = vsyncpa [#allocation4 + $0x1], 1 }
0x1207   :  { %2267 = vsyncpa [#allocation7], 1 }
0x1208   :  { %2269 = vsyncpa [#allocation7 + $0x1], 1 }
0x1209   :  { %2270 = vsyncpa [#allocation10], 1 }
0x120a   :  { %2271 = vsyncpa [#allocation13], 1 }
0x120b   :  { %2272 = vsyncpa [#allocation16], 1 }
0x120c   :  { %2273 = vsyncpa [#allocation19], 1 }
0x120d   :  { %2274 = vsyncpa [#allocation22], 1 }
0x120e   :  { %2275 = vsyncpa [#allocation25], 1 }
0x120f   :  { %2276 = vsyncpa [#allocation5], 1 }
0x1210   :  { %2278 = vsyncpa [#allocation5 + $0x1], 1 }

// kernel: tpu_custom_call.1
= control target key start
LH: loop header
LB: loop body
LE: loop exit
PB: predicated region body
PF: predicated region fallthrough
CT: control target
= control target key end

     0   :  { %s4749_s0 = inlined_call_operand.hbm [shape: f32[2,8,128], index: 0, kind: input, shape index: {}]   ;;  %s4750_s1 = inlined_call_operand.hbm [shape: f32[2,4,16,32], index: 1, kind: input, shape index: {}]   ;;  %s4751_s2 = inlined_call_operand.hbm [shape: f32[2,4,16,32], index: 2, kind: input, shape index: {}]   ;;  %s4752_s3 = inlined_call_operand.hbm [shape: f32[1,128], index: 3, kind: input, shape index: {}]   ;;  %s4753_s4 = inlined_call_operand.hbm [shape: f32[1,128], index: 4, kind: input, shape index: {}]   ;;  %s4754_s5 = inlined_call_operand.hbm [shape: f32[4,128,32], index: 5, kind: input, shape index: {}]   ;;  %s4755_s6 = inlined_call_operand.hbm [shape: f32[4,1,32], index: 6, kind: input, shape index: {}]   ;;  %s4756_s7 = inlined_call_operand.hbm [shape: f32[128,128], index: 7, kind: input, shape index: {}]   ;;  %s4757_s8 = inlined_call_operand.hbm [shape: f32[1,128], index: 8, kind: input, shape index: {}]   ;;  %s4758_s9 = inlined_call_operand.hbm [shape: f32[1,128], index: 9, kind: input, shape index: {}]   ;;  %s4759_s10 = inlined_call_operand.hbm [shape: f32[1,128], index: 10, kind: input, shape index: {}]   ;;  %s4760_s11 = inlined_call_operand.hbm [shape: f32[1,128,256], index: 11, kind: input, shape index: {}]   ;;  %s4761_s12 = inlined_call_operand.hbm [shape: f32[1,1,256], index: 12, kind: input, shape index: {}]   ;;  %s4762_s13 = inlined_call_operand.hbm [shape: f32[1,256,128], index: 13, kind: input, shape index: {}]   ;;  %s4763_s14 = inlined_call_operand.hbm [shape: f32[1,128], index: 14, kind: input, shape index: {}]   ;;  %s4764_s15 = inlined_call_operand.hbm [shape: f32[2,8,128], index: 15, kind: output, shape index: {}]  }
   0x1   :  { %4800 = sst [smem:[#allocation47_spill]] %s4749_s0 }
   0x2   :  { %4801 = sst [smem:[#allocation48_spill]] %s4750_s1 }
   0x3   :  { %4802 = sst [smem:[#allocation49_spill]] %s4752_s3 }
   0x4   :  { %4803 = sst [smem:[#allocation50_spill]] %s4753_s4 }
   0x5   :  { %4804 = sst [smem:[#allocation51_spill]] %s4754_s5 }
   0x6   :  { %4805 = sst [smem:[#allocation52_spill]] %s4756_s7 }
   0x7   :  { %4806 = sst [smem:[#allocation53_spill]] %s4758_s9 }
   0x8   :  { %4807 = sst [smem:[#allocation54_spill]] %s4759_s10 }
   0x9   :  { %4808 = sst [smem:[#allocation55_spill]] %s4760_s11 }
   0xa   :  { %4809 = sst [smem:[#allocation56_spill]] %s4761_s12 }
   0xb   :  { %4810 = sst [smem:[#allocation57_spill]] %s4762_s13 }
   0xc   :  { %4811 = sst [smem:[#allocation58_spill]] %s4763_s14 }
   0xd   :  { %4812 = sst [smem:[#allocation59_spill]] %s4764_s15 }
   0xe   :  { %20 = vsyncpa [#allocation4], 0 }
   0xf   :  { %22 = vsyncpa [#allocation4 + $0x1], 0 }
  0x10   :  { %23 = vsyncpa [#allocation7], 0 }
  0x11   :  { %25 = vsyncpa [#allocation7 + $0x1], 0 }
  0x12   :  { %26 = vsyncpa [#allocation10], 0 }
  0x13   :  { %27 = vsyncpa [#allocation13], 0 }
  0x14   :  { %28 = vsyncpa [#allocation16], 0 }
  0x15   :  { %29 = vsyncpa [#allocation19], 0 }
  0x16   :  { %30 = vsyncpa [#allocation22], 0 }
  0x17   :  { %31 = vsyncpa [#allocation25], 0 }
  0x18   :  { %32 = vsyncpa [#allocation5], 0 }
  0x19   :  { %34 = vsyncpa [#allocation5 + $0x1], 0  ;;  %s4028_s18 = smov 0   ;;  %s4030_s19 = smov 0  }
  0x1a   :  { %s4032_s20 = smov 0   ;;  %s4034_s21 = smov 0  }
  0x1b   :  { %s4036_s22 = smov 0   ;;  %s4038_s23 = smov 0  }
  0x1c LB: > { %4813 = sst [smem:[#allocation37_spill]] %s3899_s18  ;;  %s4059_s24 = sadd.s32 4294967295, %s3919_s23   ;;  %s3919_s23 = sphi %s4038_s23, %s40_s23   ;;  %s3915_s22 = sphi %s4036_s22, %s4888_s22   ;;  %s3911_s21 = sphi %s4034_s21, %s4887_s21   ;;  %s3907_s20 = sphi %s4032_s20, %s4883_s20   ;;  %s3903_s19 = sphi %s4030_s19, %s4886_s19   ;;  %s3899_s18 = sphi %s4028_s18, %s4885_s18  }
  0x1d   : > { %4814 = sst [smem:[#allocation38_spill]] %s3907_s20  ;;  %p2485_p0 = scmp.ge.s32.totalorder %s3919_s23, 1 }
  0x1e   : > { %4815 = sst [smem:[#allocation39_spill]] %s3911_s21  ;;  %p4769_p1 = scmp.eq.s32.totalorder %s4059_s24, 0 }
  0x1f   : > { %4816 = sst [smem:[#allocation40_spill]] %s3919_s23  ;;  %p417_p2 = scmp.lt.s32.totalorder %s3919_s23, 3 }
  0x20   : > { %4817 = sst [smem:[#allocation41_spill]] %s4059_s24  ;;  %s3921_s26 = smov [#allocation9]  }
  0x21   : > { %p4064_p3 = pnand %p2485_p0, %p417_p2  ;;  %s430_s27 = sshll.u32 %s3921_s26, 4  ;;  %s431_s27 = int_to_ptr.vmem [resolvable:$true] %s430_s27 }
  0x22   : > { %s3922_s28 = smov [#allocation12]   ;;  %s3923_s16 = smov [#allocation15]  }
  0x23   : > { %s4818_s25 = scalar_select %p4064_p3, 1, 0 }
  0x24   : > { %p3211_p5 = pneg %p4064_p3  ;;  %s451_s29 = sshll.u32 %s3922_s28, 4  ;;  %s4077_s29 = int_to_ptr.vmem [resolvable:$true] %s451_s29 }
  0x25   : > { %4819 = sst [smem:[#allocation42_spill]] %s4818_s25  ;;  %s4079_s17 = sshll.u32 %s3923_s16, 4  ;;  %s478_s17 = int_to_ptr.vmem [resolvable:$true] %s4079_s17 }
  0x26   : > { %p4073_p6 = pnand %p3211_p5, %p4769_p1  ;;  %s4821_s3 = sld [smem:[#allocation49_spill]] }
  0x28   : > { %s4820_s30 = scalar_select %p4073_p6, 1, 0 }
  0x29   : > { %p4089_p8 = pneg %p4073_p6 }
  0x2b   : > { %s4822_s28 = scalar_select %p4089_p8, 1, 0 }
  0x2c   : > { %s3383_s26 = scalar_lea.hbm %s4821_s3, 16 }
  0x2d   : > { %p3384_p7 = scmp.ne.s32.totalorder %s4821_s3, %s3383_s26  ;;  %p3390_p11 = scmp.lt.u32.totalorder %s3383_s26, %s4821_s3 }
  0x2f   : > { %p3386_p9 = pnand %p4089_p8, %p3384_p7 }
  0x31   : > { %p3387_p10 = pneg %p3386_p9 }
  0x33   : > { %p3392_p12 = pnand %p3390_p11, %p3387_p10 }
  0x35   : > { %3395 = shalt.err (!%p3392_p12)
}
  0x36   : > { %s3396_s15 = scalar_lea.vmem %s431_s27, 16  ;;  %s3403_s0 = scalar_lea.vmem %s431_s27, 32 }
  0x37   : > { %p3397_p13 = scmp.ne.s32.totalorder %s431_s27, %s3396_s15  ;;  %p3404_p5 = scmp.lt.s32.totalorder %s431_s27, %s431_s27 }
  0x38   : > { %p3405_p4 = scmp.lt.s32.totalorder %s3403_s0, %s3396_s15 }
  0x39   : > { %p3399_p0 = pnand %p3397_p13, %p4089_p8 }
  0x3a   : > { %p3406_p1 = por %p3405_p4, %p3404_p5 }
  0x3b   : > { %p3400_p2 = pneg %p3399_p0 }
  0x3d   : > { %p3407_p3 = pnand %p3406_p1, %p3400_p2 }
  0x3f   : > { %3410 = shalt.err (!%p3407_p3)
}
  0x40   : > { %3214 = dma.hbm_to_vmem [thread:$0]  (!%p4073_p6), %s4821_s3, 16, %s431_s27, [#allocation10]  }
  0x41   : > { %s4823_s5 = sld [smem:[#allocation51_spill]] }
  0x47   : > { %s3411_s16 = scalar_lea.hbm %s4823_s5, 8192 }
  0x48   : > { %p3412_p7 = scmp.ne.s32.totalorder %s4823_s5, %s3411_s16  ;;  %p3418_p1 = scmp.lt.u32.totalorder %s3411_s16, %s4823_s5 }
  0x4a   : > { %p3414_p9 = pnand %p3412_p7, %p4089_p8 }
  0x4c   : > { %p3415_p4 = pneg %p3414_p9 }
  0x4e   : > { %p3420_p3 = pnand %p3418_p1, %p3415_p4 }
  0x50   : > { %3423 = shalt.err (!%p3420_p3)
}
  0x51   : > { %s3424_s27 = scalar_lea.vmem %s4077_s29, 8192  ;;  %p3432_p13 = scmp.lt.s32.totalorder %s4077_s29, %s4077_s29 }
  0x52   : > { %p3425_p10 = scmp.ne.s32.totalorder %s4077_s29, %s3424_s27  ;;  %p3433_p0 = scmp.lt.s32.totalorder %s3424_s27, %s3424_s27 }
  0x54   : > { %p3427_p11 = pnand %p3425_p10, %p4089_p8  ;;  %p3434_p2 = por %p3433_p0, %p3432_p13 }
  0x56   : > { %p3428_p12 = pneg %p3427_p11 }
  0x58   : > { %p3435_p5 = pnand %p3434_p2, %p3428_p12 }
  0x5a   : > { %3438 = shalt.err (!%p3435_p5)
}
  0x5b   : > { %s4773_s10 = smov 128   ;;  %s4775_s12 = smov 8  }
  0x5c   : > { %3220 = dma.hbm_to_vmem [thread:$0]  (!%p4073_p6), %s4823_s5, 8192, %s4077_s29, [#allocation13], %s4773_s10, %s4773_s10, %s4775_s12  }
  0x5d   : > { %s4824_s7 = sld [smem:[#allocation52_spill]] }
  0x63   : > { %s3439_s16 = scalar_lea.hbm %s4824_s7, 2048 }
  0x64   : > { %p3440_p7 = scmp.ne.s32.totalorder %s4824_s7, %s3439_s16  ;;  %p3446_p1 = scmp.lt.u32.totalorder %s3439_s16, %s4824_s7 }
  0x66   : > { %p3442_p9 = pnand %p3440_p7, %p4089_p8 }
  0x68   : > { %p3443_p4 = pneg %p3442_p9 }
  0x6a   : > { %p3448_p3 = pnand %p3446_p1, %p3443_p4 }
  0x6c   : > { %3451 = shalt.err (!%p3448_p3)
}
  0x6d   : > { %s3452_s21 = scalar_lea.vmem %s478_s17, 2048  ;;  %p3460_p13 = scmp.lt.s32.totalorder %s478_s17, %s478_s17 }
  0x6e   : > { %p3453_p10 = scmp.ne.s32.totalorder %s478_s17, %s3452_s21  ;;  %p3461_p0 = scmp.lt.s32.totalorder %s3452_s21, %s3452_s21 }
  0x70   : > { %p3455_p11 = pnand %p3453_p10, %p4089_p8  ;;  %p3462_p2 = por %p3461_p0, %p3460_p13 }
  0x72   : > { %p3456_p12 = pneg %p3455_p11 }
  0x74   : > { %p3463_p5 = pnand %p3462_p2, %p3456_p12 }
  0x76   : > { %3466 = shalt.err (!%p3463_p5)
}
  0x77   : > { %3226 = dma.hbm_to_vmem [thread:$0]  (!%p4073_p6), %s4824_s7, 2048, %s478_s17, [#allocation16], %s4773_s10, %s4773_s10, %s4775_s12  }
  0x78   : > { %s3926_s25 = smov [#allocation18]   ;;  %s4825_s9 = sld [smem:[#allocation53_spill]] }
  0x79   : > { %s502_s14 = sshll.u32 %s3926_s25, 4  ;;  %s503_s14 = int_to_ptr.vmem [resolvable:$true] %s502_s14 }
  0x7e   : > { %s3467_s15 = scalar_lea.hbm %s4825_s9, 16 }
  0x7f   : > { %p3468_p7 = scmp.ne.s32.totalorder %s4825_s9, %s3467_s15  ;;  %p3474_p1 = scmp.lt.u32.totalorder %s3467_s15, %s4825_s9 }
  0x81   : > { %p3470_p9 = pnand %p3468_p7, %p4089_p8 }
  0x83   : > { %p3471_p4 = pneg %p3470_p9 }
  0x85   : > { %p3476_p3 = pnand %p3474_p1, %p3471_p4 }
  0x87   : > { %3479 = shalt.err (!%p3476_p3)
}
  0x88   : > { %s3480_s17 = scalar_lea.vmem %s503_s14, 16  ;;  %s3487_s3 = scalar_lea.vmem %s503_s14, 32 }
  0x89   : > { %p3481_p10 = scmp.ne.s32.totalorder %s503_s14, %s3480_s17  ;;  %p3488_p13 = scmp.lt.s32.totalorder %s503_s14, %s503_s14 }
  0x8a   : > { %p3489_p0 = scmp.lt.s32.totalorder %s3487_s3, %s3480_s17 }
  0x8b   : > { %p3483_p11 = pnand %p3481_p10, %p4089_p8 }
  0x8c   : > { %p3490_p2 = por %p3489_p0, %p3488_p13 }
  0x8d   : > { %p3484_p12 = pneg %p3483_p11 }
  0x8f   : > { %p3491_p5 = pnand %p3490_p2, %p3484_p12 }
  0x91   : > { %3494 = shalt.err (!%p3491_p5)
}
  0x92   : > { %3232 = dma.hbm_to_vmem [thread:$0]  (!%p4073_p6), %s4825_s9, 16, %s503_s14, [#allocation19]  }
  0x93   : > { %s3927_s5 = smov [#allocation21]   ;;  %s4826_s11 = sld [smem:[#allocation55_spill]] }
  0x94   : > { %s523_s26 = sshll.u32 %s3927_s5, 4  ;;  %s524_s26 = int_to_ptr.vmem [resolvable:$true] %s523_s26 }
  0x99   : > { %s3495_s0 = scalar_lea.hbm %s4826_s11, 4096 }
  0x9a   : > { %p3496_p7 = scmp.ne.s32.totalorder %s4826_s11, %s3495_s0  ;;  %p3502_p1 = scmp.lt.u32.totalorder %s3495_s0, %s4826_s11 }
  0x9c   : > { %p3498_p9 = pnand %p3496_p7, %p4089_p8 }
  0x9e   : > { %p3499_p4 = pneg %p3498_p9 }
  0xa0   : > { %p3504_p3 = pnand %p3502_p1, %p3499_p4 }
  0xa2   : > { %3507 = shalt.err (!%p3504_p3)
}
  0xa3   : > { %s3508_s14 = scalar_lea.vmem %s524_s26, 4096  ;;  %p3516_p13 = scmp.lt.s32.totalorder %s524_s26, %s524_s26 }
  0xa4   : > { %p3509_p10 = scmp.ne.s32.totalorder %s524_s26, %s3508_s14  ;;  %p3517_p0 = scmp.lt.s32.totalorder %s3508_s14, %s3508_s14 }
  0xa6   : > { %p3511_p11 = pnand %p3509_p10, %p4089_p8  ;;  %p3518_p2 = por %p3517_p0, %p3516_p13 }
  0xa8   : > { %p3512_p12 = pneg %p3511_p11 }
  0xaa   : > { %p3519_p5 = pnand %p3518_p2, %p3512_p12 }
  0xac   : > { %3522 = shalt.err (!%p3519_p5)
}
  0xad   : > { %s3928_s29 = smov 256   ;;  %s4777_s25 = smov 16  }
  0xae   : > { %3238 = dma.hbm_to_vmem [thread:$0]  (!%p4073_p6), %s4826_s11, 4096, %s524_s26, [#allocation22], %s3928_s29, %s3928_s29, %s4777_s25  }
  0xaf   : > { %s3930_s15 = smov [#allocation24]   ;;  %s4827_s13 = sld [smem:[#allocation57_spill]] }
  0xb0   : > { %s547_s0 = sshll.u32 %s3930_s15, 4  ;;  %s548_s0 = int_to_ptr.vmem [resolvable:$true] %s547_s0 }
  0xb5   : > { %s3523_s17 = scalar_lea.hbm %s4827_s13, 4096 }
  0xb6   : > { %p3524_p7 = scmp.ne.s32.totalorder %s4827_s13, %s3523_s17  ;;  %p3530_p1 = scmp.lt.u32.totalorder %s3523_s17, %s4827_s13 }
  0xb8   : > { %p3526_p9 = pnand %p3524_p7, %p4089_p8 }
  0xba   : > { %p3527_p4 = pneg %p3526_p9 }
  0xbc   : > { %p3532_p3 = pnand %p3530_p1, %p3527_p4 }
  0xbe   : > { %3535 = shalt.err (!%p3532_p3)
}
  0xbf   : > { %s3536_s26 = scalar_lea.vmem %s548_s0, 4096  ;;  %p3544_p13 = scmp.lt.s32.totalorder %s548_s0, %s548_s0 }
  0xc0   : > { %p3537_p10 = scmp.ne.s32.totalorder %s548_s0, %s3536_s26  ;;  %p3545_p0 = scmp.lt.s32.totalorder %s3536_s26, %s3536_s26 }
  0xc2   : > { %p3539_p11 = pnand %p3537_p10, %p4089_p8  ;;  %p3546_p2 = por %p3545_p0, %p3544_p13 }
  0xc4   : > { %p3540_p12 = pneg %p3539_p11 }
  0xc6   : > { %p3547_p5 = pnand %p3546_p2, %p3540_p12 }
  0xc8   : > { %3550 = shalt.err (!%p3547_p5)
}
  0xc9   : > { %s4828_s29 = smov 8   ;;  %s4829_s5 = smov 128  }
  0xca   : > { %3244 = dma.hbm_to_vmem [thread:$0]  (!%p4073_p6), %s4827_s13, 4096, %s548_s0, [#allocation25], %s4829_s5, %s4829_s5, %s4828_s29  }
  0xcb   : > { %s2484_s16 = sadd.s32 4294967294, %s3919_s23   ;;  %s52_s15 = sadd.s32 1, %s3915_s22 }
  0xcc   : > { %p54_p7 = scmp.ge.s32.totalorder %s52_s15, 2  ;;  %s61_s27 = sadd.s32 1, %s3907_s20 }
  0xcd   : > { %p68_p9 = scmp.ne.s32.totalorder %s3907_s20, %s3903_s19  ;;  %p69_p4 = scmp.eq.s32.totalorder %s3919_s23, 0 }
  0xce   : > { %s4890_s15 = smov (%p54_p7, %s52_s15), 0  ;;  %p74_p3 = scmp.ne.s32.totalorder %s3903_s19, %s3899_s18 }
  0xcf   : > { %4830 = sst [smem:[#allocation43_spill]] %s4890_s15  ;;  %p4219_p1 = por %p69_p4, %p68_p9 }
  0xd0   : > { %s56_s0 = ssub.s32 %s3915_s22, %s4890_s15  ;;  %p404_p10 = scmp.eq.s32.totalorder %s4059_s24, 1 }
  0xd1   : > { %p59_p11 = scmp.eq.s32.totalorder %s56_s0, 0  ;;  %p4832_p12 = scmp.eq.s32.totalorder %s4059_s24, 0 }
  0xd2   : > { %p4234_p0 = por %p404_p10, %p68_p9  ;;  %p410_p2 = scmp.eq.s32.totalorder %s2484_s16, 1 }
  0xd3   : > { %p4230_p13 = por %p4832_p12, %p74_p3  ;;  %p3274_p7 = scmp.lt.s32.totalorder %s3919_s23, 2 }
  0xd4   : > { %s4834_s3 = scalar_select %p4234_p0, 1, 0 }
  0xd5   : > { %s4833_s17 = scalar_select %p4230_p13, 1, 0 }
  0xd6   : > { %4835 = sst [smem:[#allocation44_spill]] %s4834_s3  ;;  %p4241_p5 = por %p410_p2, %p74_p3 }
  0xd7   : > { %s4239_s14 = scalar_select %p59_p11, %s3907_s20, %s61_s27  }
  0xd8   : > { %s4837_s26 = scalar_select %p4241_p5, 1, 0 }
  0xd9   : > { %4836 = sst [smem:[#allocation45_spill]] %s4239_s14  ;;  %s4247_s10 = sand.u32 1, %s3907_s20  }
  0xda   : > { %4838 = sst [smem:[#allocation46_spill]] %s4837_s26  ;;  %s591_s12 = sand.u32 1, %s3919_s23  }
  0xdb   : > { %p4252_p4 = pnand %p3274_p7, %p4219_p1  ;;  %s4779_s25 = sshll.u32 %s4247_s10, 6 }
  0xdc   : > { %s4780_s16 = sshll.u32 %s3915_s22, 10  ;;  %s4840_s1 = sld [smem:[#allocation48_spill]] }
  0xdd   : > { %s4839_s0 = scalar_select %p4252_p4, 1, 0 }
  0xde   : > { %s595_s11 = scalar_lea.vmem [#allocation6], %s4779_s25  ;;  %s4269_s13 = scalar_lea.sflag [#allocation7], %s591_s12 }
  0xdf   : > { %s602_s21 = sshll.u32 %s595_s11, 4  ;;  %p4275_p1 = pneg %p4252_p4  ;;  %s4267_s21 = int_to_ptr.vmem [resolvable:$true] %s602_s21 }
  0xe1   : > { %s4841_s14 = scalar_select %p4275_p1, 1, 0 }
  0xe2   : > { %s4263_s9 = scalar_lea.hbm %s4840_s1, %s4780_s16  ;;  %s3556_s25 = scalar_lea.hbm %s4840_s1, 2048 }
  0xe3   : > { %s3551_s15 = scalar_lea.hbm %s4263_s9, 1024  ;;  %p3557_p11 = scmp.lt.u32.totalorder %s4263_s9, %s4840_s1 }
  0xe4   : > { %p3552_p9 = scmp.ne.s32.totalorder %s4263_s9, %s3551_s15  ;;  %p3558_p12 = scmp.lt.u32.totalorder %s3556_s25, %s3551_s15 }
  0xe5   : > { %p3560_p7 = scmp.lt.u32.totalorder %s3551_s15, %s4263_s9 }
  0xe6   : > { %p3554_p3 = pnand %p4275_p1, %p3552_p9  ;;  %p3559_p2 = por %p3558_p12, %p3557_p11 }
  0xe8   : > { %p3555_p10 = pneg %p3554_p3  ;;  %p3561_p5 = por %p3560_p7, %p3559_p2 }
  0xea   : > { %p3562_p0 = pnand %p3561_p5, %p3555_p10 }
  0xec   : > { %3565 = shalt.err (!%p3562_p0)
}
  0xed   : > { %s3566_s12 = scalar_lea.vmem %s4267_s21, 1024  ;;  %s3931_s7 = smov [#allocation6]  }
  0xee   : > { %p3567_p9 = scmp.ne.s32.totalorder %s4267_s21, %s3566_s12  ;;  %s3571_s27 = sshll.u32 %s3931_s7, 4  ;;  %s3572_s27 = int_to_ptr.vmem [resolvable:$false] %s3571_s27 }
  0xef   : > { %s3573_s16 = scalar_lea.vmem %s3572_s27, 2048  ;;  %p3574_p6 = scmp.lt.s32.totalorder %s4267_s21, %s3572_s27 }
  0xf0   : > { %p3569_p3 = pnand %p3567_p9, %p4275_p1  ;;  %p3575_p8 = scmp.lt.s32.totalorder %s3573_s16, %s3566_s12 }
  0xf2   : > { %p3570_p13 = pneg %p3569_p3  ;;  %p3576_p11 = por %p3575_p8, %p3574_p6 }
  0xf4   : > { %p3577_p12 = pnand %p3576_p11, %p3570_p13 }
  0xf6   : > { %3580 = shalt.err (!%p3577_p12)
}
  0xf7   : > { %3254 = dma.hbm_to_vmem [thread:$0]  (!%p4252_p4), %s4263_s9, 1024, %s4267_s21, %s4269_s13, %s4829_s5, %s4829_s5, %s4828_s29  }
  0xf8   : > { %s4842_s25 = sshll.u32 %s3915_s22, 10  ;;  %s4843_s7 = sshll.u32 %s4247_s10, 6 }
  0xf9   : > { %s4307_s12 = scalar_lea.hbm %s4751_s2, %s4842_s25  ;;  %s616_s27 = scalar_lea.vmem [#allocation8], %s4843_s7 }
  0xfa   : > { %s623_s16 = sshll.u32 %s616_s27, 4  ;;  %s3932_s1 = smov [#allocation11]   ;;  %s4311_s16 = int_to_ptr.vmem [resolvable:$true] %s623_s16 }
  0xfb   : > { %s441_s20 = sshll.u32 %s3932_s1, 4  ;;  %s3933_s23 = smov [#allocation14]   ;;  %s442_s20 = int_to_ptr.vmem [resolvable:$true] %s441_s20 }
  0xfc   : > { %s464_s26 = sshll.u32 %s3933_s23, 4  ;;  %s4844_s4 = sld [smem:[#allocation50_spill]]  ;;  %s465_s26 = int_to_ptr.vmem [resolvable:$true] %s464_s26 }
  0xfd   : > { %p4845_p8 = scmp.ne.s32.totalorder %s4822_s28, 0 }
 0x102   : > { %s3581_s9 = scalar_lea.hbm %s4844_s4, 16 }
 0x103   : > { %p3582_p6 = scmp.ne.s32.totalorder %s4844_s4, %s3581_s9  ;;  %p3588_p5 = scmp.lt.u32.totalorder %s3581_s9, %s4844_s4 }
 0x105   : > { %p3584_p13 = pnand %p3582_p6, %p4845_p8 }
 0x107   : > { %p3585_p0 = pneg %p3584_p13 }
 0x109   : > { %p3590_p10 = pnand %p3588_p5, %p3585_p0 }
 0x10b   : > { %3593 = shalt.err (!%p3590_p10)
}
 0x10c   : > { %s3594_s1 = scalar_lea.vmem %s442_s20, 16  ;;  %s3601_s18 = scalar_lea.vmem %s442_s20, 32 }
 0x10d   : > { %p3595_p2 = scmp.ne.s32.totalorder %s442_s20, %s3594_s1  ;;  %p3602_p3 = scmp.lt.s32.totalorder %s442_s20, %s442_s20 }
 0x10e   : > { %p3603_p11 = scmp.lt.s32.totalorder %s3601_s18, %s3594_s1 }
 0x10f   : > { %p3597_p7 = pnand %p3595_p2, %p4845_p8 }
 0x110   : > { %p3604_p12 = por %p3603_p11, %p3602_p3 }
 0x111   : > { %p3598_p9 = pneg %p3597_p7 }
 0x113   : > { %p3605_p4 = pnand %p3604_p12, %p3598_p9 }
 0x115   : > { %3608 = shalt.err (!%p3605_p4)
}
 0x116   : > { %p4846_p6 = scmp.ne.s32.totalorder %s4820_s30, 0  ;;  %s3609_s7 = scalar_lea.hbm %s4755_s6, 64 }
 0x117   : > { %p3610_p13 = scmp.ne.s32.totalorder %s4755_s6, %s3609_s7  ;;  %p3616_p4 = scmp.lt.u32.totalorder %s3609_s7, %s4755_s6 }
 0x118   : > { %3217 = dma.hbm_to_vmem [thread:$0]  (!%p4846_p6), %s4844_s4, 16, %s442_s20, [#allocation10]  }
 0x119   : > { %p3612_p0 = pnand %p3610_p13, %p4845_p8 }
 0x11b   : > { %p3613_p5 = pneg %p3612_p0 }
 0x11d   : > { %p3618_p10 = pnand %p3616_p4, %p3613_p5 }
 0x11f   : > { %3621 = shalt.err (!%p3618_p10)
}
 0x120   : > { %s3622_s15 = scalar_lea.vmem %s465_s26, 64  ;;  %p3630_p3 = scmp.lt.s32.totalorder %s465_s26, %s465_s26 }
 0x121   : > { %p3623_p2 = scmp.ne.s32.totalorder %s465_s26, %s3622_s15  ;;  %p3631_p11 = scmp.lt.s32.totalorder %s3622_s15, %s3622_s15 }
 0x123   : > { %p3625_p7 = pnand %p3623_p2, %p4845_p8  ;;  %p3632_p12 = por %p3631_p11, %p3630_p3 }
 0x125   : > { %p3626_p9 = pneg %p3625_p7 }
 0x127   : > { %p3633_p1 = pnand %p3632_p12, %p3626_p9 }
 0x129   : > { %3636 = shalt.err (!%p3633_p1)
}
 0x12a   : > { %s3934_s20 = smov 1   ;;  %s4847_s1 = smov 16  }
 0x12b   : > { %3223 = dma.hbm_to_vmem [thread:$0]  (!%p4846_p6), %s4755_s6, 64, %s465_s26, [#allocation13], %s4847_s1, %s4847_s1, %s3934_s20  }
 0x12c   : > { %s3935_s24 = smov [#allocation17]   ;;  %s3936_s11 = smov [#allocation20]  }
 0x12d   : > { %s491_s3 = sshll.u32 %s3935_s24, 4  ;;  %s513_s7 = sshll.u32 %s3936_s11, 4  ;;  %s492_s3 = int_to_ptr.vmem [resolvable:$true] %s491_s3  ;;  %s4351_s7 = int_to_ptr.vmem [resolvable:$true] %s513_s7 }
 0x12e   : > { %s3637_s21 = scalar_lea.hbm %s4757_s8, 16 }
 0x12f   : > { %p3638_p1 = scmp.ne.s32.totalorder %s4757_s8, %s3637_s21  ;;  %p3644_p5 = scmp.lt.u32.totalorder %s3637_s21, %s4757_s8 }
 0x131   : > { %p3640_p13 = pnand %p3638_p1, %p4845_p8 }
 0x133   : > { %p3641_p0 = pneg %p3640_p13 }
 0x135   : > { %p3646_p4 = pnand %p3644_p5, %p3641_p0 }
 0x137   : > { %3649 = shalt.err (!%p3646_p4)
}
 0x138   : > { %s3650_s20 = scalar_lea.vmem %s492_s3, 16  ;;  %s3657_s1 = scalar_lea.vmem %s492_s3, 32 }
 0x139   : > { %p3651_p10 = scmp.ne.s32.totalorder %s492_s3, %s3650_s20  ;;  %p3658_p9 = scmp.lt.s32.totalorder %s492_s3, %s492_s3 }
 0x13a   : > { %p3659_p3 = scmp.lt.s32.totalorder %s3657_s1, %s3650_s20 }
 0x13b   : > { %p3653_p2 = pnand %p3651_p10, %p4845_p8 }
 0x13c   : > { %p3660_p11 = por %p3659_p3, %p3658_p9 }
 0x13d   : > { %p3654_p7 = pneg %p3653_p2 }
 0x13f   : > { %p3661_p12 = pnand %p3660_p11, %p3654_p7 }
 0x141   : > { %3664 = shalt.err (!%p3661_p12)
}
 0x142   : > { %3229 = dma.hbm_to_vmem [thread:$0]  (!%p4846_p6), %s4757_s8, 16, %s492_s3, [#allocation16]  }
 0x143   : > { %s4848_s9 = sld [smem:[#allocation54_spill]] }
 0x149   : > { %s3665_s21 = scalar_lea.hbm %s4848_s9, 16 }
 0x14a   : > { %p3666_p1 = scmp.ne.s32.totalorder %s4848_s9, %s3665_s21  ;;  %p3672_p5 = scmp.lt.u32.totalorder %s3665_s21, %s4848_s9 }
 0x14c   : > { %p3668_p13 = pnand %p3666_p1, %p4845_p8 }
 0x14e   : > { %p3669_p0 = pneg %p3668_p13 }
 0x150   : > { %p3674_p4 = pnand %p3672_p5, %p3669_p0 }
 0x152   : > { %3677 = shalt.err (!%p3674_p4)
}
 0x153   : > { %s3678_s3 = scalar_lea.vmem %s4351_s7, 16  ;;  %s3685_s20 = scalar_lea.vmem %s4351_s7, 32 }
 0x154   : > { %p3679_p10 = scmp.ne.s32.totalorder %s4351_s7, %s3678_s3  ;;  %p3686_p9 = scmp.lt.s32.totalorder %s4351_s7, %s4351_s7 }
 0x155   : > { %p3687_p3 = scmp.lt.s32.totalorder %s3685_s20, %s3678_s3 }
 0x156   : > { %p3681_p2 = pnand %p3679_p10, %p4845_p8 }
 0x157   : > { %p3688_p11 = por %p3687_p3, %p3686_p9 }
 0x158   : > { %p3682_p7 = pneg %p3681_p2 }
 0x15a   : > { %p3689_p12 = pnand %p3688_p11, %p3682_p7 }
 0x15c   : > { %3692 = shalt.err (!%p3689_p12)
}
 0x15d   : > { %3235 = dma.hbm_to_vmem [thread:$0]  (!%p4846_p6), %s4848_s9, 16, %s4351_s7, [#allocation19]  }
 0x15e   : > { %s3937_s24 = smov [#allocation23]   ;;  %s3938_s27 = smov [#allocation26]  }
 0x15f   : > { %s537_s11 = sshll.u32 %s3937_s24, 4  ;;  %s561_s21 = sshll.u32 %s3938_s27, 4  ;;  %s538_s11 = int_to_ptr.vmem [resolvable:$true] %s537_s11  ;;  %s4395_s21 = int_to_ptr.vmem [resolvable:$true] %s561_s21 }
 0x160   : > { %s4849_s18 = sld [smem:[#allocation56_spill]] }
 0x166   : > { %s4850_s26 = smov %s4849_s18  ;;  %s3693_s3 = scalar_lea.hbm %s4849_s18, 32 }
 0x167   : > { %p3694_p1 = scmp.ne.s32.totalorder %s4850_s26, %s3693_s3  ;;  %p3700_p5 = scmp.lt.u32.totalorder %s3693_s3, %s4850_s26 }
 0x169   : > { %p3696_p13 = pnand %p3694_p1, %p4845_p8 }
 0x16b   : > { %p3697_p0 = pneg %p3696_p13 }
 0x16d   : > { %p3702_p4 = pnand %p3700_p5, %p3697_p0 }
 0x16f   : > { %3705 = shalt.err (!%p3702_p4)
}
 0x170   : > { %s3706_s23 = scalar_lea.vmem %s538_s11, 32  ;;  %p3714_p9 = scmp.lt.s32.totalorder %s538_s11, %s538_s11 }
 0x171   : > { %p3707_p10 = scmp.ne.s32.totalorder %s538_s11, %s3706_s23  ;;  %p3715_p3 = scmp.lt.s32.totalorder %s3706_s23, %s3706_s23 }
 0x173   : > { %p3709_p2 = pnand %p3707_p10, %p4845_p8  ;;  %p3716_p11 = por %p3715_p3, %p3714_p9 }
 0x175   : > { %p3710_p7 = pneg %p3709_p2 }
 0x177   : > { %p3717_p12 = pnand %p3716_p11, %p3710_p7 }
 0x179   : > { %3720 = shalt.err (!%p3717_p12)
}
 0x17a   : > { %3241 = dma.hbm_to_vmem [thread:$0]  (!%p4846_p6), %s4850_s26, 32, %s538_s11, [#allocation22]  }
 0x17b   : > { %s4851_s15 = sld [smem:[#allocation58_spill]] }
 0x181   : > { %s3721_s18 = scalar_lea.hbm %s4851_s15, 16 }
 0x182   : > { %p3722_p1 = scmp.ne.s32.totalorder %s4851_s15, %s3721_s18  ;;  %p3728_p5 = scmp.lt.u32.totalorder %s3721_s18, %s4851_s15 }
 0x184   : > { %p3724_p13 = pnand %p3722_p1, %p4845_p8 }
 0x186   : > { %p3725_p0 = pneg %p3724_p13 }
 0x188   : > { %p3730_p4 = pnand %p3728_p5, %p3725_p0 }
 0x18a   : > { %3733 = shalt.err (!%p3730_p4)
}
 0x18b   : > { %s3734_s11 = scalar_lea.vmem %s4395_s21, 16  ;;  %s3741_s23 = scalar_lea.vmem %s4395_s21, 32 }
 0x18c   : > { %p3735_p10 = scmp.ne.s32.totalorder %s4395_s21, %s3734_s11  ;;  %p3742_p9 = scmp.lt.s32.totalorder %s4395_s21, %s4395_s21 }
 0x18d   : > { %p3743_p3 = scmp.lt.s32.totalorder %s3741_s23, %s3734_s11 }
 0x18e   : > { %p3737_p2 = pnand %p3735_p10, %p4845_p8 }
 0x18f   : > { %p3744_p11 = por %p3743_p3, %p3742_p9 }
 0x190   : > { %p3738_p7 = pneg %p3737_p2 }
 0x192   : > { %p3745_p12 = pnand %p3744_p11, %p3738_p7 }
 0x194   : > { %3748 = shalt.err (!%p3745_p12)
}
 0x195   : > { %3247 = dma.hbm_to_vmem [thread:$0]  (!%p4846_p6), %s4851_s15, 16, %s4395_s21, [#allocation25]  }
 0x196   : > { %s2499_s28 = sshll.u32 %s4247_s10, 3  ;;  %s2500_s27 = sshll.u32 %s3915_s22, 7 }
 0x197   : > { %s4852_s3 = sld [smem:[#allocation47_spill]]  ;;  %s576_s30 = scalar_lea.vmem [#allocation3], %s2499_s28 }
 0x198   : > { %s584_s1 = sshll.u32 %s576_s30, 4  ;;  %s573_s7 = scalar_lea.sflag [#allocation4], %s4247_s10  ;;  %s585_s1 = int_to_ptr.vmem [resolvable:$true] %s584_s1 }
 0x199   : > { %p4853_p1 = scmp.ne.s32.totalorder %s4841_s14, 0 }
 0x19d   : > { %s4444_s20 = scalar_lea.hbm %s4852_s3, %s2500_s27  ;;  %s3754_s4 = scalar_lea.hbm %s4852_s3, 256 }
 0x19e   : > { %s3749_s11 = scalar_lea.hbm %s4444_s20, 128  ;;  %p3755_p0 = scmp.lt.u32.totalorder %s4444_s20, %s4852_s3 }
 0x19f   : > { %p3750_p8 = scmp.ne.s32.totalorder %s4444_s20, %s3749_s11  ;;  %p3756_p5 = scmp.lt.u32.totalorder %s3754_s4, %s3749_s11 }
 0x1a0   : > { %p3758_p10 = scmp.lt.u32.totalorder %s3749_s11, %s4444_s20 }
 0x1a1   : > { %p3752_p13 = pnand %p3750_p8, %p4853_p1  ;;  %p3757_p4 = por %p3756_p5, %p3755_p0 }
 0x1a3   : > { %p3753_p6 = pneg %p3752_p13  ;;  %p3759_p2 = por %p3758_p10, %p3757_p4 }
 0x1a5   : > { %p3760_p7 = pnand %p3759_p2, %p3753_p6 }
 0x1a7   : > { %3763 = shalt.err (!%p3760_p7)
}
 0x1a8   : > { %s3764_s10 = scalar_lea.vmem %s585_s1, 128  ;;  %s3939_s28 = smov [#allocation3]  }
 0x1a9   : > { %p3765_p9 = scmp.ne.s32.totalorder %s585_s1, %s3764_s10  ;;  %s3769_s25 = sshll.u32 %s3939_s28, 4  ;;  %s3770_s25 = int_to_ptr.vmem [resolvable:$false] %s3769_s25 }
 0x1aa   : > { %s3771_s18 = scalar_lea.vmem %s3770_s25, 256  ;;  %p3772_p12 = scmp.lt.s32.totalorder %s585_s1, %s3770_s25 }
 0x1ab   : > { %p3767_p3 = pnand %p3765_p9, %p4853_p1  ;;  %p3773_p8 = scmp.lt.s32.totalorder %s3771_s18, %s3764_s10 }
 0x1ad   : > { %p3768_p11 = pneg %p3767_p3  ;;  %p3774_p13 = por %p3773_p8, %p3772_p12 }
 0x1af   : > { %p3775_p0 = pnand %p3774_p13, %p3768_p11 }
 0x1b1   : > { %3778 = shalt.err (!%p3775_p0)
}
 0x1b2   : > { %p4854_p5 = scmp.ne.s32.totalorder %s4839_s0, 0  ;;  %s3779_s30 = scalar_lea.hbm %s4307_s12, 1024 }
 0x1b3   : > { %p3780_p6 = scmp.ne.s32.totalorder %s4307_s12, %s3779_s30  ;;  %s3784_s23 = scalar_lea.hbm %s4751_s2, 2048 }
 0x1b4   : > { %3251 = dma.hbm_to_vmem [thread:$0]  (!%p4854_p5), %s4444_s20, 128, %s585_s1, %s573_s7  }
 0x1b5   : > { %p3782_p4 = pnand %p3780_p6, %p4853_p1  ;;  %p3785_p2 = scmp.lt.u32.totalorder %s4307_s12, %s4751_s2 }
 0x1b6   : > { %p3786_p7 = scmp.lt.u32.totalorder %s3784_s23, %s3779_s30  ;;  %p3788_p3 = scmp.lt.u32.totalorder %s3779_s30, %s4307_s12 }
 0x1b7   : > { %p3783_p10 = pneg %p3782_p4 }
 0x1b8   : > { %p3787_p9 = por %p3786_p7, %p3785_p2 }
 0x1ba   : > { %p3789_p11 = por %p3788_p3, %p3787_p9 }
 0x1bc   : > { %p3790_p12 = pnand %p3789_p11, %p3783_p10 }
 0x1be   : > { %3793 = shalt.err (!%p3790_p12)
}
 0x1bf   : > { %s3794_s20 = scalar_lea.vmem %s4311_s16, 1024  ;;  %s3940_s1 = smov [#allocation8]  }
 0x1c0   : > { %p3795_p8 = scmp.ne.s32.totalorder %s4311_s16, %s3794_s20  ;;  %s3799_s7 = sshll.u32 %s3940_s1, 4  ;;  %s3800_s7 = int_to_ptr.vmem [resolvable:$false] %s3799_s7 }
 0x1c1   : > { %s3801_s27 = scalar_lea.vmem %s3800_s7, 2048  ;;  %p3802_p6 = scmp.lt.s32.totalorder %s4311_s16, %s3800_s7 }
 0x1c2   : > { %p3797_p13 = pnand %p3795_p8, %p4853_p1  ;;  %p3803_p4 = scmp.lt.s32.totalorder %s3801_s27, %s3794_s20 }
 0x1c4   : > { %p3798_p0 = pneg %p3797_p13  ;;  %p3804_p2 = por %p3803_p4, %p3802_p6 }
 0x1c6   : > { %p3805_p7 = pnand %p3804_p2, %p3798_p0 }
 0x1c8   : > { %3808 = shalt.err (!%p3805_p7)
}
 0x1c9   : > { %3257 = dma.hbm_to_vmem [thread:$0]  (!%p4854_p5), %s4307_s12, 1024, %s4311_s16, %s4269_s13, %s4829_s5, %s4829_s5, %s4828_s29  }
 0x1ca   : > { %s4855_s14 = sld [smem:[#allocation42_spill]] }
 0x1d0   : > { %p4856_p1 = scmp.ne.s32.totalorder %s4855_s14, 0 }
 0x1d1   : > { %s4492_s10 = sand.u32 (!%p4856_p1), 1, %s3903_s19   ;;  %p4857_p10 = scmp.ne.s32.totalorder (!%p4856_p1), %s4833_s17, 0 }
 0x1d2   : > { %635 = sbr.rel (%p4856_p1) target bundleno = 4591 (0x11ef), region = 80  ;;  %s2508_s28 = sshll.u32 (!%p4856_p1), %s4492_s10, 3 }
 0x1d3   : > { %s638_s25 = scalar_lea.sflag (!%p4856_p1), [#allocation4], %s4492_s10  ;;  %s641_s0 = scalar_lea.vmem (!%p4856_p1), [#allocation3], %s2508_s28 }
 0x1d9   : > { %3862 = dma.done.wait (%p4857_p10), %s638_s25, 128  }
 0x1da   : > { %3864 = vsyncadd (%p4857_p10), %s638_s25, 4294967168  ;;  %s4858_s13 = sld [smem:[#allocation41_spill]]  ;;  %s2509_s5 = sshll.u32 %s4492_s10, 6 }
 0x1db   : > { %s4504_s16 = scalar_lea.vmem [#allocation6], %s2509_s5 }
 0x1e0   : > { %s646_s29 = sand.u32 1, %s4858_s13  }
 0x1e1   : > { %s647_s12 = scalar_lea.sflag [#allocation7], %s646_s29 }
 0x1e2   : > { %3866 = dma.done.wait (%p4857_p10), %s647_s12, 2048  }
 0x1e3   : > { %3868 = vsyncadd (%p4857_p10), %s647_s12, 4294965248  ;;  %s4510_s18 = scalar_lea.vmem [#allocation8], %s2509_s5  ;;  %p4859_p5 = scmp.eq.s32.totalorder %s4858_s13, 0 }
 0x1e5   : > { %3870 = dma.done.wait (%p4859_p5), [#allocation10], 32   ;;  %p4860_p9 = pmov %p4859_p5 }
 0x1e6   : > { %p4861_p3 = pmov %p4859_p5 }
 0x1e7   : > { %3872 = vsyncadd (%p4860_p9), [#allocation10], 4294967264 }
 0x1e8   : > { %3874 = dma.done.wait (%p4861_p3), [#allocation13], 8256   ;;  %p4862_p11 = pmov %p4861_p3 }
 0x1e9   : > { %p4863_p12 = pmov %p4861_p3 }
 0x1ea   : > { %3876 = vsyncadd (%p4862_p11), [#allocation13], 4294959040 }
 0x1eb   : > { %3878 = dma.done.wait (%p4863_p12), [#allocation16], 2064   ;;  %p4864_p8 = pmov %p4861_p3 }
 0x1ec   : > { %p4865_p13 = pmov %p4861_p3 }
 0x1ed   : > { %3880 = vsyncadd (%p4864_p8), [#allocation16], 4294965232 }
 0x1ee   : > { %3882 = dma.done.wait (%p4865_p13), [#allocation19], 32   ;;  %p4866_p0 = pmov %p4861_p3 }
 0x1f0   : > { %3884 = vsyncadd (%p4866_p0), [#allocation19], 4294967264  ;;  %p4867_p6 = pmov %p4866_p0 }
 0x1f1   : > { %p4868_p4 = pmov %p4866_p0 }
 0x1f2   : > { %3886 = dma.done.wait (%p4867_p6), [#allocation22], 4128  }
 0x1f3   : > { %3888 = vsyncadd (%p4868_p4), [#allocation22], 4294963168  ;;  %p4869_p2 = pmov %p4866_p0 }
 0x1f4   : > { %p4870_p7 = pmov %p4866_p0 }
 0x1f5   : > { %3890 = dma.done.wait (%p4869_p2), [#allocation25], 4112  }
 0x1f6   : > { %3892 = vsyncadd (%p4870_p7), [#allocation25], 4294963184  ;;  %v4536_v0 = vld [vmem:[%s641_s0] sm:$0xff]  ;;  %v800_v5 = vld [vmem:[#allocation12] sm:$0xff]  ;;  %v3941_v8 = vmov 0.0|0.0   ;;  %vm3942_vm0 = vmmov 0  }
 0x1f7   : > { %767 = vadd.xlane.f32.xlu0 %v4536_v0  ;;  %v801_v6 = vld [vmem:[#allocation12 + $0x8] sm:$0xff]  ;;  %2943 = vmatprep.subr.bf16.mxu0 %v3941_v8  ;;  %v802_v9 = vld [vmem:[#allocation12 + $0x10] sm:$0xff]  ;;  %v803_v10 = vld [vmem:[#allocation12 + $0x18] sm:$0xff]  ;;  %v3943_v23 = vmov 0.0   ;;  %vm897_vm1 = vcmask 261120   ;;  %vm977_vm5 = vcmask 130048  }
 0x1f8   : > { %v2944_v7 = vpack.c.bf16 %v801_v6, %v800_v5  ;;  %2967 = vmatprep.subr.bf16.mxu1 %v3941_v8  ;;  %v2947_v11 = vpack.c.bf16 %v803_v10, %v802_v9  ;;  %v804_v12 = vld [vmem:[#allocation12 + $0x20] sm:$0xff]  ;;  %v805_v13 = vld [vmem:[#allocation12 + $0x28] sm:$0xff]  ;;  %v806_v15 = vld [vmem:[#allocation12 + $0x30] sm:$0xff]  ;;  %2744 = vmatprep.mubr.msk.f32.mxu0 %vm3942_vm0, %v3943_v23  ;;  %s3944_s17 = smov 64   ;;  %s3945_s30 = smov 32   ;;  %vm1331_vm6 = vcmask 523520  }
 0x1f9   : > { %v2950_v14 = vpack.c.bf16 %v805_v13, %v804_v12  ;;  %v807_v16 = vld [vmem:[#allocation12 + $0x38] sm:$0xff]  ;;  %v808_v18 = vld [vmem:[#allocation12 + $0x40] sm:$0xff]  ;;  %v809_v19 = vld [vmem:[#allocation12 + $0x48] sm:$0xff]  ;;  %2751 = vmatprep.mubr.msk.f32.mxu1 %vm3942_vm0, %v3943_v23  ;;  %vm1601_vm7 = vcmask 785920   ;;  %s3946_s11 = smov 96   ;;  %vm1871_vm8 = vcmask 1048320  }
 0x1fa   : > { %2945 = vmatpush3.bf16.msra.mxu0 %v2944_v7  ;;  %v2953_v17 = vpack.c.bf16 %v807_v16, %v806_v15  ;;  %v2956_v20 = vpack.c.bf16 %v809_v19, %v808_v18  ;;  %v810_v21 = vld [vmem:[#allocation12 + $0x50] sm:$0xff]  ;;  %v811_v22 = vld [vmem:[#allocation12 + $0x58] sm:$0xff]  ;;  %v812_v25 = vld [vmem:[#allocation12 + $0x60] sm:$0xff]  ;;  %s4873_s21 = sld [smem:[#allocation39_spill]]  ;;  %s4874_s23 = sld [smem:[#allocation44_spill]] }
 0x1fb   : > { %2946 = vmatprep.subr.bf16.mxu0 %v3941_v8  ;;  %v2959_v24 = vpack.c.bf16 %v811_v22, %v810_v21  ;;  %v813_v26 = vld [vmem:[#allocation12 + $0x68] sm:$0xff]  ;;  %v814_v28 = vld [vmem:[#allocation12 + $0x70] sm:$0xff]  ;;  %v815_v29 = vld [vmem:[#allocation12 + $0x78] sm:$0xff]  ;;  %s763_s24 = scalar_lea.vmem [#allocation27], %s2508_s28  ;;  %s4875_s27 = sld [smem:[#allocation59_spill]] }
 0x1fc   : > { %v2962_v27 = vpack.c.bf16 %v813_v26, %v812_v25  ;;  %v2965_v30 = vpack.c.bf16 %v815_v29, %v814_v28  ;;  %v893_v31 = vld [vmem:[%s4504_s16] sm:$0xff]  ;;  %v894_v32 = vld [vmem:[%s4504_s16 + $0x8] sm:$0xff]  ;;  %vm4562_vm2 = vmpackc.low %vm897_vm1, %vm897_vm1  ;;  %s2246_s20 = sshll.u32 %s763_s24, 4  ;;  %s2232_s25 = scalar_lea.sflag [#allocation5], %s4492_s10  ;;  %s4702_s20 = int_to_ptr.vmem [resolvable:$true] %s2246_s20 }
 0x1fd   : > { %v2968_v33 = vpack.c.bf16 %v894_v32, %v893_v31  ;;  %v2524_v44 = vld [vmem:[#allocation9] ss:$0 sm:$0xff]  ;;  %v2525_v46 = vld [vmem:[#allocation11] ss:$0 sm:$0xff]  ;;  %v2526_v49 = vld [vmem:[#allocation14] ss:$0 sm:$0xff] }
 0x1fe   : > { %2948 = vmatpush3.bf16.msra.mxu0 %v2947_v11  ;;  %v895_v56 = vld [vmem:[%s4510_s18] sm:$0xff]  ;;  %v896_v57 = vld [vmem:[%s4510_s18 + $0x8] sm:$0xff]  ;;  %v1070_v10 = vld [vmem:[#allocation12 + $0xb0] sm:$0xff]  ;;  %s3809_s0 = scalar_lea.vmem %s4702_s20, 128  ;;  %s3947_s28 = smov [#allocation27]  }
 0x1ff   : > { %2949 = vmatprep.subr.bf16.mxu0 %v3941_v8  ;;  %2970 = vmatpush3.bf16.xpose.msk.msra.mxu1 %vm4562_vm2, %v2968_v33  ;;  %v2972_v58 = vpack.c.bf16 %v896_v57, %v895_v56  ;;  %v1064_v62 = vld [vmem:[#allocation12 + $0x80] sm:$0xff]  ;;  %v1065_v63 = vld [vmem:[#allocation12 + $0x88] sm:$0xff]  ;;  %v1071_v11 = vld [vmem:[#allocation12 + $0xb8] sm:$0xff]  ;;  %p3810_p1 = scmp.ne.s32.totalorder %s4702_s20, %s3809_s0  ;;  %s3813_s13 = sshll.u32 %s3947_s28, 4  ;;  %s3814_s13 = int_to_ptr.vmem [resolvable:$false] %s3813_s13 }
 0x200   : > { %2971 = vmatprep.subr.bf16.mxu1 %v3941_v8  ;;  %v1068_v6 = vld [vmem:[#allocation12 + $0xa0] sm:$0xff]  ;;  %v1069_v7 = vld [vmem:[#allocation12 + $0xa8] sm:$0xff]  ;;  %v2984_v12 = vpack.c.bf16 %v1071_v11, %v1070_v10  ;;  %v1074_v16 = vld [vmem:[#allocation12 + $0xd0] sm:$0xff]  ;;  %s2563_s4 = sshll.u32 %s4873_s21, 7  ;;  %p4876_p10 = scmp.ne.s32.totalorder %s4874_s23, 0 }
 0x201   : > { %v2981_v9 = vpack.c.bf16 %v1069_v7, %v1068_v6  ;;  %v1072_v13 = vld [vmem:[#allocation12 + $0xc0] sm:$0xff]  ;;  %v1078_v22 = vld [vmem:[#allocation12 + $0xf0] sm:$0xff]  ;;  %v1341_v57 = vld [vmem:[#allocation12 + $0x138] sm:$0xff]  ;;  %s4700_s14 = scalar_lea.hbm %s4875_s27, %s2563_s4  ;;  %s3815_s29 = scalar_lea.vmem %s3814_s13, 256 }
 0x202   : > { %2951 = vmatpush3.bf16.msra.mxu0 %v2950_v14  ;;  %v1073_v14 = vld [vmem:[#allocation12 + $0xc8] sm:$0xff]  ;;  %v1076_v19 = vld [vmem:[#allocation12 + $0xe0] sm:$0xff]  ;;  %v1340_v56 = vld [vmem:[#allocation12 + $0x130] sm:$0xff]  ;;  %p3811_p5 = pnand %p3810_p1, %p4876_p10  ;;  %p3816_p3 = scmp.lt.s32.totalorder %s4702_s20, %s3814_s13 }
 0x203   : > { %2952 = vmatprep.subr.bf16.mxu0 %v3941_v8  ;;  %v2987_v15 = vpack.c.bf16 %v1073_v14, %v1072_v13  ;;  %v2532_v26 = vld [vmem:[%s4504_s16 + $0x10] sm:$0xff]  ;;  %v2531_v31 = vld [vmem:[#allocation14 + $0x1] ss:$0 sm:$0xff]  ;;  %v1349_v7 = vld [vmem:[#allocation12 + $0x178] sm:$0xff]  ;;  %p3817_p11 = scmp.lt.s32.totalorder %s3815_s29, %s3809_s0 }
 0x204   : > { %v1348_v6 = vld [vmem:[#allocation12 + $0x170] sm:$0xff]  ;;  %v2541_v10 = vld [vmem:[%s4504_s16 + $0x20] sm:$0xff]  ;;  %v2542_v11 = vld [vmem:[%s4504_s16 + $0x28] sm:$0xff]  ;;  %p3812_p9 = pneg %p3811_p5 }
 0x205   : > { %p3818_p12 = por %p3817_p11, %p3816_p3 }
 0x206   : > { %2954 = vmatpush3.bf16.msra.mxu0 %v2953_v17  ;;  %v1075_v17 = vld [vmem:[#allocation12 + $0xd8] sm:$0xff] }
 0x207   : > { %2955 = vmatprep.subr.bf16.mxu0 %v3941_v8  ;;  %v2990_v18 = vpack.c.bf16 %v1075_v17, %v1074_v16  ;;  %p3819_p8 = pnand %p3818_p12, %p3812_p9 }
 0x20a   : > { %2957 = vmatpush3.bf16.msra.mxu0 %v2956_v20  ;;  %v1077_v20 = vld [vmem:[#allocation12 + $0xe8] sm:$0xff] }
 0x20b   : > { %2958 = vmatprep.subr.bf16.mxu0 %v3941_v8  ;;  %v2993_v21 = vpack.c.bf16 %v1077_v20, %v1076_v19 }
 0x20e   : > { %2960 = vmatpush3.bf16.msra.mxu0 %v2959_v24  ;;  %v1079_v24 = vld [vmem:[#allocation12 + $0xf8] sm:$0xff] }
 0x20f   : > { %2961 = vmatprep.subr.bf16.mxu0 %v3941_v8  ;;  %v2996_v25 = vpack.c.bf16 %v1079_v24, %v1078_v22  ;;  %v2543_v24 = vld [vmem:[%s4510_s18 + $0x20] sm:$0xff] }
 0x212   : > { %2963 = vmatpush3.bf16.msra.mxu0 %v2962_v27  ;;  %v2533_v27 = vld [vmem:[%s4504_s16 + $0x18] sm:$0xff] }
 0x213   : > { %2964 = vmatprep.subr.bf16.mxu0 %v3941_v8  ;;  %v2999_v28 = vpack.c.bf16 %v2533_v27, %v2532_v26 }
 0x216   : > { %2966 = vmatpush3.bf16.msra.mxu0 %v2965_v30 }
 0x217   : > { %3002 = vmatprep.subr.bf16.mxu0 %v3941_v8 }
 0x284   : > { %v768_v1 = vpop.xlane.xlu0 %767 }
 0x285   : > { %v770_v2 = vmul.f32 0.0078125, %v768_v1  ;;  %v2975_v1 = vpack.c.bf16 %v1065_v63, %v1064_v62  ;;  %v1344_v62 = vld [vmem:[#allocation12 + $0x150] sm:$0xff]  ;;  %v1345_v63 = vld [vmem:[#allocation12 + $0x158] sm:$0xff] }
 0x287   : > { %v4540_v3 = vsub.f32 %v4536_v0, %v770_v2  ;;  %v1066_v2 = vld [vmem:[#allocation12 + $0x90] sm:$0xff] }
 0x289   : > { %v772_v4 = vmul.f32 %v4540_v3, %v4540_v3 }
 0x28b   : > { %773 = vadd.xlane.f32.xlu0 %v772_v4 }
 0x318   : > { %v774_v35 = vpop.xlane.xlu0 %773 }
 0x319   : > { %v775_v36 = vmul.f32 0.007874016, %v774_v35 }
 0x31b   : > { %3359 = vrsqrt.f32 %v775_v36  ;;  %vm778_vm3 = vcmp.eq.f32.partialorder %v775_v36, inf  ;;  %v781_v39 = vand.u32 2147483648, %v775_v36  ;;  %vm780_vm4 = vcmp.eq.f32.partialorder %v775_v36, 0.0 }
 0x325   : > { %v3360_v37 = vpop.eup %3359 }
 0x326   : > { %v777_v38 = vmul.f32 %v3360_v37, %v775_v36 }
 0x328   : > { %v779_v40 = vsel %vm778_vm3, %v775_v36, %v777_v38 }
 0x329   : > { %v782_v41 = vsel %vm780_vm4, %v781_v39, %v779_v40  ;;  %v2534_v39 = vld [vmem:[%s4510_s18 + $0x10] sm:$0xff]  ;;  %v2535_v40 = vld [vmem:[%s4510_s18 + $0x18] sm:$0xff] }
 0x32a   : > { %v783_v42 = vadd.f32 1e-06, %v782_v41  ;;  %v3003_v41 = vpack.c.bf16 %v2535_v40, %v2534_v39  ;;  %v1608_v39 = vld [vmem:[#allocation12 + $0x1a0] sm:$0xff]  ;;  %v1609_v40 = vld [vmem:[#allocation12 + $0x1a8] sm:$0xff] }
 0x32c   : > { %3361 = vrcp.f32 %v783_v42 }
 0x336   : > { %v3362_v43 = vpop.eup %3361 }
 0x337   : > { %v785_v45 = vmul.f32 %v3362_v43, %v4540_v3  ;;  %v1067_v3 = vld [vmem:[#allocation12 + $0x98] sm:$0xff] }
 0x338   : > { %v2978_v5 = vpack.c.bf16 %v1067_v3, %v1066_v2  ;;  %v1346_v2 = vld [vmem:[#allocation12 + $0x160] sm:$0xff]  ;;  %v1347_v3 = vld [vmem:[#allocation12 + $0x168] sm:$0xff] }
 0x339   : > { %v792_v47 = vmul.f32 %v2524_v44, %v785_v45  ;;  %v1334_v45 = vld [vmem:[#allocation12 + $0x100] sm:$0xff] }
 0x33b   : > { %v4570_v48 = vadd.f32 %v2525_v46, %v792_v47  ;;  %v1335_v46 = vld [vmem:[#allocation12 + $0x108] sm:$0xff] }
 0x33c   : > { %v3006_v47 = vpack.c.bf16 %v1335_v46, %v1334_v45  ;;  %v1612_v45 = vld [vmem:[#allocation12 + $0x1c0] sm:$0xff]  ;;  %v1613_v46 = vld [vmem:[#allocation12 + $0x1c8] sm:$0xff] }
 0x33d   : > { %2745 = vmatmul.mubr.f32.vlgmr.msra.gmra.mrb[0].mxu0 %v4570_v48 }
 0x33e   : > { %2807 = vmatprep.mubr.msk.f32.mxu0 %vm3942_vm0, %v3943_v23  ;;  %3004 = vmatpush3.bf16.msra.mxu0 %v3003_v41  ;;  %v3043_v41 = vpack.c.bf16 %v1609_v40, %v1608_v39  ;;  %v1883_v39 = vld [vmem:[#allocation15 + $0x48] sm:$0xff] }
 0x33f   : > { %3005 = vmatprep.subr.bf16.mxu0 %v3941_v8 }
 0x410   : > { %v889_v50 = vpop.f32.mrb[0].mxu0 }
 0x411   : > { %v890_v51 = vadd.f32 %v2526_v49, %v889_v50  ;;  %v2746_v52 = vpop.f32.mrb[1].mxu0  ;;  %v1336_v49 = vld [vmem:[#allocation12 + $0x110] sm:$0xff]  ;;  %v1337_v50 = vld [vmem:[#allocation12 + $0x118] sm:$0xff] }
 0x412   : > { %v3009_v52 = vpack.c.bf16 %v1337_v50, %v1336_v49  ;;  %v1614_v49 = vld [vmem:[#allocation12 + $0x1d0] sm:$0xff]  ;;  %v1615_v50 = vld [vmem:[#allocation12 + $0x1d8] sm:$0xff] }
 0x413   : > { %2752 = vmatmul.mubr.msk.f32.vlgmr.msra.gmra.mrb[0].mxu1 %vm897_vm1, %v890_v51 }
 0x414   : > { %2758 = vmatprep.mubr.msk.f32.mxu1 %vm3942_vm0, %v3943_v23  ;;  %2973 = vmatpush3.bf16.msra.mxu1 %v2972_v58  ;;  %v3015_v58 = vpack.c.bf16 %v1341_v57, %v1340_v56  ;;  %v1619_v56 = vld [vmem:[#allocation12 + $0x1f8] sm:$0xff] }
 0x415   : > { %2974 = vmatprep.subr.bf16.mxu1 %v3941_v8 }
 0x4e6   : > { %v973_v53 = vpop.f32.mrb[0].mxu1 }
 0x4e7   : > { %v2753_v54 = vpop.f32.mrb[1].mxu1  ;;  %v978_v55 = vsel %vm977_vm5, %v973_v53, -inf }
 0x4e8   : > { %979 = vmax.xlane.f32.xlu1 %v978_v55  ;;  %v1339_v54 = vld [vmem:[#allocation12 + $0x128] sm:$0xff] }
 0x575   : > { %v980_v59 = vpop.xlane.xlu1 %979 }
 0x576   : > { %v981_v60 = vsub.f32 %v973_v53, %v980_v59  ;;  %v1338_v53 = vld [vmem:[#allocation12 + $0x120] sm:$0xff] }
 0x577   : > { %v3012_v55 = vpack.c.bf16 %v1339_v54, %v1338_v53  ;;  %v1342_v59 = vld [vmem:[#allocation12 + $0x140] sm:$0xff]  ;;  %v1617_v53 = vld [vmem:[#allocation12 + $0x1e8] sm:$0xff] }
 0x578   : > { %v982_v61 = vmul.f32 1.442695, %v981_v60  ;;  %v1343_v60 = vld [vmem:[#allocation12 + $0x148] sm:$0xff] }
 0x57a   : > { %3363 = vpow2.f32 %v982_v61  ;;  %v3018_v61 = vpack.c.bf16 %v1343_v60, %v1342_v59  ;;  %v2551_v59 = vld [vmem:[%s4504_s16 + $0x38] sm:$0xff] }
 0x584   : > { %v4582_v4 = vpop.eup %3363 }
 0x585   : > { %2759 = vmatmul.mubr.msk.f32.vlgmr.msra.gmra.mrb[2].mxu1 %vm977_vm5, %v4582_v4 }
 0x586   : > { %2976 = vmatpush3.bf16.msra.mxu1 %v2975_v1  ;;  %2793 = vmatprep.mubr.msk.f32.mxu1 %vm3942_vm0, %v3943_v23  ;;  %v3021_v1 = vpack.c.bf16 %v1345_v63, %v1344_v62  ;;  %v2549_v63 = vld [vmem:[#allocation14 + $0x3] ss:$0 sm:$0xff] }
 0x587   : > { %2977 = vmatprep.subr.bf16.mxu1 %v3941_v8 }
 0x58a   : > { %2979 = vmatpush3.bf16.msra.mxu1 %v2978_v5  ;;  %v3024_v5 = vpack.c.bf16 %v1347_v3, %v1346_v2 }
 0x58b   : > { %2980 = vmatprep.subr.bf16.mxu1 %v3941_v8 }
 0x58e   : > { %2982 = vmatpush3.bf16.msra.mxu1 %v2981_v9  ;;  %v3027_v9 = vpack.c.bf16 %v1349_v7, %v1348_v6  ;;  %v984_v7 = vsel %vm977_vm5, %v4582_v4, 0.0 }
 0x58f   : > { %2983 = vmatprep.subr.bf16.mxu1 %v3941_v8 }
 0x592   : > { %2985 = vmatpush3.bf16.msra.mxu1 %v2984_v12  ;;  %v3030_v12 = vpack.c.bf16 %v2542_v11, %v2541_v10  ;;  %v2553_v10 = vld [vmem:[%s4510_s18 + $0x38] sm:$0xff] }
 0x593   : > { %2986 = vmatprep.subr.bf16.mxu1 %v3941_v8 }
 0x596   : > { %2988 = vmatpush3.bf16.msra.mxu1 %v2987_v15  ;;  %v2540_v15 = vld [vmem:[#allocation14 + $0x2] ss:$0 sm:$0xff] }
 0x597   : > { %2989 = vmatprep.subr.bf16.mxu1 %v3941_v8 }
 0x59a   : > { %2991 = vmatpush3.bf16.msra.mxu1 %v2990_v18 }
 0x59b   : > { %2992 = vmatprep.subr.bf16.mxu1 %v3941_v8 }
 0x59e   : > { %2994 = vmatpush3.bf16.msra.mxu1 %v2993_v21 }
 0x59f   : > { %2995 = vmatprep.subr.bf16.mxu1 %v3941_v8 }
 0x5a2   : > { %2997 = vmatpush3.bf16.msra.mxu1 %v2996_v25  ;;  %v2544_v25 = vld [vmem:[%s4510_s18 + $0x28] sm:$0xff] }
 0x5a3   : > { %2998 = vmatprep.subr.bf16.mxu1 %v3941_v8  ;;  %v3034_v26 = vpack.c.bf16 %v2544_v25, %v2543_v24 }
 0x5a5   : > { %2794 = vmatmul.mubr.f32.vlgmr.msra.gmra.mrb[4].mxu1 %v4570_v48 }
 0x5a6   : > { %2800 = vmatprep.mubr.msk.f32.mxu1 %vm3942_vm0, %v3943_v23 }
 0x5ab   : > { %3001 = vmatpush3.bf16.xpose.msk.msra.mxu1 %vm4562_vm2, %v2999_v28 }
 0x5ac   : > { %3029 = vmatprep.subr.bf16.mxu1 %v3941_v8 }
 0x658   : > { %v4604_v29 = vpop.f32.mrb[2].mxu1 }
 0x659   : > { %v2760_v30 = vpop.f32.mrb[3].mxu1 }
 0x678   : > { %v1154_v32 = vpop.f32.mrb[4].mxu1 }
 0x679   : > { %v1155_v33 = vadd.f32 %v2531_v31, %v1154_v32  ;;  %v2795_v35 = vpop.f32.mrb[5].mxu1  ;;  %v1604_v31 = vld [vmem:[#allocation12 + $0x180] sm:$0xff]  ;;  %v1605_v32 = vld [vmem:[#allocation12 + $0x188] sm:$0xff] }
 0x67a   : > { %v1606_v35 = vld [vmem:[#allocation12 + $0x190] sm:$0xff] }
 0x67b   : > { %2801 = vmatmul.mubr.msk.f32.vlgmr.msra.gmra.mrb[6].mxu1 %vm897_vm1, %v1155_v33  ;;  %v3037_v33 = vpack.c.bf16 %v1605_v32, %v1604_v31  ;;  %v1877_v32 = vld [vmem:[#allocation15 + $0x18] sm:$0xff] }
 0x67c   : > { %2849 = vmatprep.mubr.msk.f32.mxu1 %vm3942_vm0, %v3943_v23  ;;  %3032 = vmatpush3.bf16.xpose.msk.msra.mxu1 %vm4562_vm2, %v3030_v12 }
 0x67d   : > { %3033 = vmatprep.subr.bf16.mxu1 %v3941_v8 }
 0x74e   : > { %v1239_v36 = vpop.f32.mrb[6].mxu1 }
 0x74f   : > { %v2802_v37 = vpop.f32.mrb[7].mxu1  ;;  %v1243_v38 = vsel %vm977_vm5, %v1239_v36, -inf }
 0x750   : > { %1244 = vmax.xlane.f32.xlu1 %v1243_v38 }
 0x7dd   : > { %v1245_v42 = vpop.xlane.xlu1 %1244 }
 0x7de   : > { %v1246_v43 = vsub.f32 %v1239_v36, %v1245_v42  ;;  %v1607_v36 = vld [vmem:[#allocation12 + $0x198] sm:$0xff]  ;;  %v1610_v42 = vld [vmem:[#allocation12 + $0x1b0] sm:$0xff] }
 0x7df   : > { %v3040_v38 = vpack.c.bf16 %v1607_v36, %v1606_v35  ;;  %v1880_v36 = vld [vmem:[#allocation15 + $0x30] sm:$0xff] }
 0x7e0   : > { %v1247_v44 = vmul.f32 1.442695, %v1246_v43  ;;  %v1611_v43 = vld [vmem:[#allocation12 + $0x1b8] sm:$0xff] }
 0x7e2   : > { %3365 = vpow2.f32 %v1247_v44  ;;  %v3046_v44 = vpack.c.bf16 %v1611_v43, %v1610_v42  ;;  %v1885_v42 = vld [vmem:[#allocation15 + $0x58] sm:$0xff] }
 0x7ec   : > { %v3366_v51 = vpop.eup %3365 }
 0x7ed   : > { %2808 = vmatmul.mubr.msk.f32.vlgmr.msra.gmra.mrb[2].mxu0 %vm977_vm5, %v3366_v51  ;;  %v1249_v22 = vsel %vm977_vm5, %v3366_v51, 0.0  ;;  %v3052_v51 = vpack.c.bf16 %v1615_v50, %v1614_v49  ;;  %v1887_v49 = vld [vmem:[#allocation15 + $0x68] sm:$0xff] }
 0x7ee   : > { %3007 = vmatpush3.bf16.msra.mxu0 %v3006_v47  ;;  %2842 = vmatprep.mubr.msk.f32.mxu0 %vm3942_vm0, %v3943_v23  ;;  %v3049_v47 = vpack.c.bf16 %v1613_v46, %v1612_v45 }
 0x7ef   : > { %3008 = vmatprep.subr.bf16.mxu0 %v3941_v8 }
 0x7f2   : > { %3010 = vmatpush3.bf16.msra.mxu0 %v3009_v52  ;;  %v1616_v52 = vld [vmem:[#allocation12 + $0x1e0] sm:$0xff] }
 0x7f3   : > { %3011 = vmatprep.subr.bf16.mxu0 %v3941_v8  ;;  %v3055_v54 = vpack.c.bf16 %v1617_v53, %v1616_v52  ;;  %v1889_v52 = vld [vmem:[#allocation15 + $0x78] sm:$0xff] }
 0x7f6   : > { %3013 = vmatpush3.bf16.msra.mxu0 %v3012_v55  ;;  %v1618_v55 = vld [vmem:[#allocation12 + $0x1f0] sm:$0xff] }
 0x7f7   : > { %3014 = vmatprep.subr.bf16.mxu0 %v3941_v8  ;;  %v3058_v57 = vpack.c.bf16 %v1619_v56, %v1618_v55 }
 0x7fa   : > { %3016 = vmatpush3.bf16.msra.mxu0 %v3015_v58  ;;  %v2550_v58 = vld [vmem:[%s4504_s16 + $0x30] sm:$0xff] }
 0x7fb   : > { %3017 = vmatprep.subr.bf16.mxu0 %v3941_v8  ;;  %v3061_v60 = vpack.c.bf16 %v2551_v59, %v2550_v58 }
 0x7fe   : > { %3019 = vmatpush3.bf16.msra.mxu0 %v3018_v61 }
 0x7ff   : > { %3020 = vmatprep.subr.bf16.mxu0 %v3941_v8 }
 0x802   : > { %3022 = vmatpush3.bf16.msra.mxu0 %v3021_v1 }
 0x803   : > { %3023 = vmatprep.subr.bf16.mxu0 %v3941_v8 }
 0x806   : > { %3025 = vmatpush3.bf16.msra.mxu0 %v3024_v5 }
 0x807   : > { %3026 = vmatprep.subr.bf16.mxu0 %v3941_v8 }
 0x80a   : > { %3028 = vmatpush3.bf16.msra.mxu0 %v3027_v9  ;;  %v2552_v9 = vld [vmem:[%s4510_s18 + $0x30] sm:$0xff] }
 0x80b   : > { %3064 = vmatprep.subr.bf16.mxu0 %v3941_v8  ;;  %v3065_v11 = vpack.c.bf16 %v2553_v10, %v2552_v9  ;;  %v2004_v9 = vld [vmem:[#allocation21 + $0x10] sm:$0xff] }
 0x80d   : > { %2843 = vmatmul.mubr.f32.vlgmr.msra.gmra.mrb[4].mxu0 %v4570_v48 }
 0x80e   : > { %2905 = vmatprep.mubr.msk.f32.mxu0 %vm3942_vm0, %v3943_v23  ;;  %3066 = vmatpush3.bf16.msra.mxu0 %v3065_v11  ;;  %v2009_v11 = vld [vmem:[#allocation21 + $0x38] sm:$0xff] }
 0x80f   : > { %3067 = vmatprep.subr.bf16.mxu0 %v3941_v8 }
 0x8c0   : > { %v4632_v13 = vpop.f32.mrb[2].mxu0 }
 0x8c1   : > { %v2809_v14 = vpop.f32.mrb[3].mxu0 }
 0x8e0   : > { %v1424_v16 = vpop.f32.mrb[4].mxu0 }
 0x8e1   : > { %v1425_v17 = vadd.f32 %v2540_v15, %v1424_v16  ;;  %v2844_v18 = vpop.f32.mrb[5].mxu0 }
 0x8e3   : > { %2850 = vmatmul.mubr.msk.f32.vlgmr.msra.gmra.mrb[8].mxu1 %vm897_vm1, %v1425_v17 }
 0x8e4   : > { %2856 = vmatprep.mubr.msk.f32.mxu1 %vm3942_vm0, %v3943_v23  ;;  %3035 = vmatpush3.bf16.msra.mxu1 %v3034_v26 }
 0x8e5   : > { %3036 = vmatprep.subr.bf16.mxu1 %v3941_v8 }
 0x9b6   : > { %v1509_v19 = vpop.f32.mrb[8].mxu1 }
 0x9b7   : > { %v2851_v20 = vpop.f32.mrb[9].mxu1  ;;  %v1513_v21 = vsel %vm977_vm5, %v1509_v19, -inf }
 0x9b8   : > { %1514 = vmax.xlane.f32.xlu0 %v1513_v21 }
 0x9bc   : > { %1250 = vadd.xlane.f32.xlu0 %v1249_v22 }
 0xa45   : > { %v1515_v27 = vpop.xlane.xlu0 %1514 }
 0xa46   : > { %v1516_v28 = vsub.f32 %v1509_v19, %v1515_v27  ;;  %v1874_v27 = vld [vmem:[#allocation15] sm:$0xff] }
 0xa48   : > { %v1517_v30 = vmul.f32 1.442695, %v1516_v28  ;;  %v1875_v28 = vld [vmem:[#allocation15 + $0x8] sm:$0xff] }
 0xa49   : > { %v1251_v24 = vpop.xlane.xlu0 %1250  ;;  %v3068_v31 = vpack.c.bf16 %v1875_v28, %v1874_v27  ;;  %v2016_v27 = vld [vmem:[#allocation21 + $0x70] sm:$0xff] }
 0xa4a   : > { %3367 = vpow2.f32 %v1517_v30  ;;  %v1876_v30 = vld [vmem:[#allocation15 + $0x10] sm:$0xff] }
 0xa54   : > { %v3368_v37 = vpop.eup %3367 }
 0xa55   : > { %2857 = vmatmul.mubr.msk.f32.vlgmr.msra.gmra.mrb[10].mxu1 %vm977_vm5, %v3368_v37  ;;  %v1519_v34 = vsel %vm977_vm5, %v3368_v37, 0.0  ;;  %v1881_v37 = vld [vmem:[#allocation15 + $0x38] sm:$0xff] }
 0xa56   : > { %3038 = vmatpush3.bf16.msra.mxu1 %v3037_v33  ;;  %2891 = vmatprep.mubr.msk.f32.mxu1 %vm3942_vm0, %v3943_v23  ;;  %v1878_v33 = vld [vmem:[#allocation15 + $0x20] sm:$0xff] }
 0xa57   : > { %3039 = vmatprep.subr.bf16.mxu1 %v3941_v8 }
 0xa5a   : > { %3041 = vmatpush3.bf16.msra.mxu1 %v3040_v38  ;;  %v1882_v38 = vld [vmem:[#allocation15 + $0x40] sm:$0xff] }
 0xa5b   : > { %3042 = vmatprep.subr.bf16.mxu1 %v3941_v8  ;;  %v3080_v40 = vpack.c.bf16 %v1883_v39, %v1882_v38  ;;  %v2027_v39 = vld [vmem:[#allocation21 + $0xc8] sm:$0xff] }
 0xa5e   : > { %3044 = vmatpush3.bf16.msra.mxu1 %v3043_v41  ;;  %v1884_v41 = vld [vmem:[#allocation15 + $0x50] sm:$0xff] }
 0xa5f   : > { %3045 = vmatprep.subr.bf16.mxu1 %v3941_v8  ;;  %v3083_v43 = vpack.c.bf16 %v1885_v42, %v1884_v41 }
 0xa62   : > { %3047 = vmatpush3.bf16.msra.mxu1 %v3046_v44 }
 0xa63   : > { %3048 = vmatprep.subr.bf16.mxu1 %v3941_v8 }
 0xa66   : > { %3050 = vmatpush3.bf16.msra.mxu1 %v3049_v47  ;;  %v1886_v47 = vld [vmem:[#allocation15 + $0x60] sm:$0xff] }
 0xa67   : > { %3051 = vmatprep.subr.bf16.mxu1 %v3941_v8  ;;  %v3086_v50 = vpack.c.bf16 %v1887_v49, %v1886_v47 }
 0xa6a   : > { %3053 = vmatpush3.bf16.msra.mxu1 %v3052_v51  ;;  %v1888_v51 = vld [vmem:[#allocation15 + $0x70] sm:$0xff] }
 0xa6b   : > { %3054 = vmatprep.subr.bf16.mxu1 %v3941_v8  ;;  %v3089_v53 = vpack.c.bf16 %v1889_v52, %v1888_v51  ;;  %v2032_v51 = vld [vmem:[#allocation21 + $0xf0] sm:$0xff] }
 0xa6e   : > { %3056 = vmatpush3.bf16.msra.mxu1 %v3055_v54 }
 0xa6f   : > { %3057 = vmatprep.subr.bf16.mxu1 %v3941_v8 }
 0xa72   : > { %3059 = vmatpush3.bf16.msra.mxu1 %v3058_v57 }
 0xa73   : > { %3060 = vmatprep.subr.bf16.mxu1 %v3941_v8 }
 0xa75   : > { %2892 = vmatmul.mubr.f32.vlgmr.msra.gmra.mrb[12].mxu1 %v4570_v48 }
 0xa76   : > { %2898 = vmatprep.mubr.msk.f32.mxu1 %vm3942_vm0, %v3943_v23 }
 0xa7b   : > { %3063 = vmatpush3.bf16.xpose.msk.msra.mxu1 %vm4562_vm2, %v3061_v60  ;;  %v2558_v60 = vld [vmem:[#allocation17] ss:$0 sm:$0xff] }
 0xb28   : > { %v1591_v61 = vpop.f32.mrb[10].mxu1 }
 0xb29   : > { %v2858_v62 = vpop.f32.mrb[11].mxu1 }
 0xb48   : > { %v1694_v1 = vpop.f32.mrb[12].mxu1 }
 0xb49   : > { %v1695_v2 = vadd.f32 %v2549_v63, %v1694_v1  ;;  %v2893_v3 = vpop.f32.mrb[13].mxu1 }
 0xb4b   : > { %2899 = vmatmul.mubr.msk.f32.vlgmr.msra.gmra.mrb[14].mxu1 %vm897_vm1, %v1695_v2 }
 0xb4c   : > { %2110 = vmatprep.mubr.f32.mxu1 %v3943_v23 }
 0xc1e   : > { %v1779_v48 = vpop.f32.mrb[14].mxu1 }
 0xc1f   : > { %v2900_v5 = vpop.f32.mrb[15].mxu1  ;;  %v1783_v6 = vsel %vm977_vm5, %v1779_v48, -inf }
 0xc20   : > { %1784 = vmax.xlane.f32.xlu1 %v1783_v6  ;;  %v2003_v5 = vld [vmem:[#allocation21 + $0x8] sm:$0xff]  ;;  %v2005_v6 = vld [vmem:[#allocation21 + $0x18] sm:$0xff] }
 0xc24   : > { %1520 = vadd.xlane.f32.xlu1 %v1519_v34  ;;  %v3091_v34 = vpack.c.bf16 %v2005_v6, %v2003_v5  ;;  %v2123_v6 = vld [vmem:[#allocation24 + $0x20] sm:$0xff] }
 0xc26   : > { %3092 = vmatprep.subr.bf16.mxu1 %v3091_v34  ;;  %v2124_v34 = vld [vmem:[#allocation24 + $0x28] sm:$0xff] }
 0xc28   : > { %985 = vadd.xlane.f32.xlu1 %v984_v7  ;;  %v2002_v7 = vld [vmem:[#allocation21] sm:$0xff] }
 0xc29   : > { %v3093_v10 = vpack.c.bf16 %v2004_v9, %v2002_v7  ;;  %v2141_v7 = vld [vmem:[#allocation24 + $0xb0] sm:$0xff]  ;;  %v2142_v9 = vld [vmem:[#allocation24 + $0xb8] sm:$0xff] }
 0xc2b   : > { %3094 = vmatpush1.bf16.msra.mxu1 %v3093_v10  ;;  %v3133_v10 = vpack.c.bf16 %v2124_v34, %v2123_v6  ;;  %v2561_v6 = vld [vmem:[#allocation26] ss:$0 sm:$0xff] }
 0xcad   : > { %v1785_v12 = vpop.xlane.xlu1 %1784 }
 0xcae   : > { %v1786_v14 = vsub.f32 %v1779_v48, %v1785_v12 }
 0xcb0   : > { %v1787_v15 = vmul.f32 1.442695, %v1786_v14  ;;  %v2006_v14 = vld [vmem:[#allocation21 + $0x20] sm:$0xff] }
 0xcb1   : > { %v1521_v16 = vpop.xlane.xlu1 %1520 }
 0xcb2   : > { %3369 = vpow2.f32 %v1787_v15  ;;  %v2008_v15 = vld [vmem:[#allocation21 + $0x30] sm:$0xff] }
 0xcb3   : > { %3371 = vrcp.f32 %v1521_v16  ;;  %v3097_v16 = vpack.c.bf16 %v2008_v15, %v2006_v14  ;;  %v2143_v14 = vld [vmem:[#allocation24 + $0xc0] sm:$0xff]  ;;  %v2144_v15 = vld [vmem:[#allocation24 + $0xc8] sm:$0xff] }
 0xcb5   : > { %v986_v17 = vpop.xlane.xlu1 %985 }
 0xcb6   : > { %3373 = vrcp.f32 %v986_v17  ;;  %v2011_v17 = vld [vmem:[#allocation21 + $0x48] sm:$0xff] }
 0xcb7   : > { %3375 = vrcp.f32 %v1251_v24  ;;  %v2017_v24 = vld [vmem:[#allocation21 + $0x78] sm:$0xff] }
 0xcbc   : > { %v3370_v18 = vpop.eup %3369 }
 0xcbd   : > { %v3372_v19 = vpop.eup %3371  ;;  %2906 = vmatmul.mubr.msk.f32.vlgmr.msra.gmra.mrb[6].mxu0 %vm977_vm5, %v3370_v18  ;;  %v1789_v4 = vsel %vm977_vm5, %v3370_v18, 0.0  ;;  %v2013_v18 = vld [vmem:[#allocation21 + $0x58] sm:$0xff] }
 0xcbe   : > { %1790 = vadd.xlane.f32.xlu0 %v1789_v4  ;;  %v1596_v20 = vmul.f32 %v3372_v19, %v1591_v61  ;;  %2940 = vmatprep.mubr.msk.f32.mxu0 %vm3942_vm0, %v3943_v23  ;;  %v3071_v23 = vpack.c.bf16 %v1877_v32, %v1876_v30  ;;  %v3099_v19 = vpack.c.bf16 %v2013_v18, %v2011_v17  ;;  %v2010_v4 = vld [vmem:[#allocation21 + $0x40] sm:$0xff]  ;;  %v2019_v30 = vld [vmem:[#allocation21 + $0x88] sm:$0xff] }
 0xcbf   : > { %3069 = vmatpush3.bf16.msra.mxu0 %v3068_v31  ;;  %v2021_v31 = vld [vmem:[#allocation21 + $0x98] sm:$0xff]  ;;  %v3139_v17 = vpack.c.bf16 %v2144_v15, %v2143_v14  ;;  %v2127_v18 = vld [vmem:[#allocation24 + $0x40] sm:$0xff] }
 0xcc0   : > { %v3374_v21 = vpop.eup %3373  ;;  %1598 = vrot.lane.b32.xlu1 %v1596_v20, %s3944_s17  ;;  %3070 = vmatprep.subr.bf16.mxu0 %v3941_v8  ;;  %v2012_v20 = vld [vmem:[#allocation21 + $0x50] sm:$0xff]  ;;  %v3107_v32 = vpack.c.bf16 %v2021_v31, %v2019_v30 }
 0xcc1   : > { %v1061_v22 = vmul.f32 %v3374_v21, %v4604_v29  ;;  %v3376_v25 = vpop.eup %3375  ;;  %v1879_v29 = vld [vmem:[#allocation15 + $0x28] sm:$0xff]  ;;  %v3101_v21 = vpack.c.bf16 %v2012_v20, %v2010_v4  ;;  %v2145_v4 = vld [vmem:[#allocation24 + $0xd0] sm:$0xff]  ;;  %v2146_v20 = vld [vmem:[#allocation24 + $0xd8] sm:$0xff] }
 0xcc2   : > { %v1326_v26 = vmul.f32 %v3376_v25, %v4632_v13  ;;  %v3074_v35 = vpack.c.bf16 %v1879_v29, %v1878_v33  ;;  %v3077_v13 = vpack.c.bf16 %v1881_v37, %v1880_v36  ;;  %v2020_v33 = vld [vmem:[#allocation21 + $0x90] sm:$0xff]  ;;  %v2023_v29 = vld [vmem:[#allocation21 + $0xa8] sm:$0xff]  ;;  %v2025_v36 = vld [vmem:[#allocation21 + $0xb8] sm:$0xff] }
 0xcc3   : > { %1062 = vst.msk [vmem:[#allocation2] sm:$0xff] %vm897_vm1, %v1061_v22  ;;  %3072 = vmatpush3.bf16.msra.mxu0 %v3071_v23  ;;  %v2015_v22 = vld [vmem:[#allocation21 + $0x68] sm:$0xff]  ;;  %v2018_v23 = vld [vmem:[#allocation21 + $0x80] sm:$0xff]  ;;  %v3111_v38 = vpack.c.bf16 %v2025_v36, %v2023_v29 }
 0xcc4   : > { %3073 = vmatprep.subr.bf16.mxu0 %v3941_v8  ;;  %v3103_v25 = vpack.c.bf16 %v2017_v24, %v2015_v22  ;;  %v2022_v37 = vld [vmem:[#allocation21 + $0xa0] sm:$0xff]  ;;  %v3143_v22 = vpack.c.bf16 %v2146_v20, %v2145_v4  ;;  %v2129_v24 = vld [vmem:[#allocation24 + $0x50] sm:$0xff] }
 0xcc7   : > { %3075 = vmatpush3.bf16.msra.mxu0 %v3074_v35  ;;  %v3109_v35 = vpack.c.bf16 %v2020_v33, %v2018_v23 }
 0xcc8   : > { %3076 = vmatprep.subr.bf16.mxu0 %v3941_v8 }
 0xccb   : > { %3078 = vmatpush3.bf16.msra.mxu0 %v3077_v13  ;;  %v2024_v13 = vld [vmem:[#allocation21 + $0xb0] sm:$0xff] }
 0xccc   : > { %3079 = vmatprep.subr.bf16.mxu0 %v3941_v8  ;;  %v3113_v41 = vpack.c.bf16 %v2024_v13, %v2022_v37 }
 0xccf   : > { %3081 = vmatpush3.bf16.msra.mxu0 %v3080_v40  ;;  %v2029_v40 = vld [vmem:[#allocation21 + $0xd8] sm:$0xff] }
 0xcd0   : > { %3082 = vmatprep.subr.bf16.mxu0 %v3941_v8  ;;  %v3115_v42 = vpack.c.bf16 %v2029_v40, %v2027_v39  ;;  %v2560_v40 = vld [vmem:[#allocation20] ss:$0 sm:$0xff] }
 0xcd3   : > { %3084 = vmatpush3.bf16.msra.mxu0 %v3083_v43  ;;  %v2026_v43 = vld [vmem:[#allocation21 + $0xc0] sm:$0xff] }
 0xcd4   : > { %1328 = vrot.lane.b32.xlu0 %v1326_v26, %s3945_s30  ;;  %3085 = vmatprep.subr.bf16.mxu0 %v3941_v8  ;;  %v2014_v26 = vld [vmem:[#allocation21 + $0x60] sm:$0xff] }
 0xcd5   : > { %v3105_v28 = vpack.c.bf16 %v2016_v27, %v2014_v26  ;;  %v2147_v26 = vld [vmem:[#allocation24 + $0xe0] sm:$0xff]  ;;  %v2148_v27 = vld [vmem:[#allocation24 + $0xe8] sm:$0xff] }
 0xcd6   : > { %v3147_v30 = vpack.c.bf16 %v2148_v27, %v2147_v26 }
 0xcd7   : > { %3087 = vmatpush3.bf16.msra.mxu0 %v3086_v50  ;;  %v2030_v50 = vld [vmem:[#allocation21 + $0xe0] sm:$0xff] }
 0xcd8   : > { %3088 = vmatprep.subr.bf16.mxu0 %v3941_v8  ;;  %v3121_v52 = vpack.c.bf16 %v2032_v51, %v2030_v50  ;;  %v2133_v50 = vld [vmem:[#allocation24 + $0x70] sm:$0xff]  ;;  %v2134_v51 = vld [vmem:[#allocation24 + $0x78] sm:$0xff] }
 0xcdb   : > { %3090 = vmatpush3.bf16.msra.mxu0 %v3089_v53  ;;  %v2135_v53 = vld [vmem:[#allocation24 + $0x80] sm:$0xff] }
 0xd32   : > { %v1599_v46 = vpop.permute.xlu1 %1598 }
 0xd4b   : > { %v1791_v44 = vpop.xlane.xlu0 %1790 }
 0xd4c   : > { %3377 = vrcp.f32 %v1791_v44  ;;  %v2028_v44 = vld [vmem:[#allocation21 + $0xd0] sm:$0xff] }
 0xd4d   : > { %v3117_v47 = vpack.c.bf16 %v2028_v44, %v2026_v43  ;;  %v2131_v43 = vld [vmem:[#allocation24 + $0x60] sm:$0xff]  ;;  %v2132_v44 = vld [vmem:[#allocation24 + $0x68] sm:$0xff] }
 0xd4f   : > { %v1329_v45 = vpop.permute.xlu0 %1328 }
 0xd50   : > { %1332 = vst.msk [vmem:[#allocation2] sm:$0xff] %vm1331_vm6, %v1329_v45  ;;  %v2031_v45 = vld [vmem:[#allocation21 + $0xe8] sm:$0xff] }
 0xd51   : > { %1602 = vst.msk [vmem:[#allocation2] sm:$0xff] %vm1601_vm7, %v1599_v46  ;;  %v2033_v46 = vld [vmem:[#allocation21 + $0xf8] sm:$0xff] }
 0xd52   : > { %v3119_v49 = vpack.c.bf16 %v2033_v46, %v2031_v45  ;;  %v3149_v45 = vpack.c.bf16 %v2132_v44, %v2131_v43  ;;  %v2149_v46 = vld [vmem:[#allocation24 + $0xf0] sm:$0xff] }
 0xd56   : > { %v3378_v54 = vpop.eup %3377 }
 0xd90   : > { %v1861_v55 = vpop.f32.mrb[6].mxu0 }
 0xd91   : > { %v1866_v56 = vmul.f32 %v3378_v54, %v1861_v55  ;;  %v2907_v57 = vpop.f32.mrb[7].mxu0  ;;  %v2136_v54 = vld [vmem:[#allocation24 + $0x88] sm:$0xff]  ;;  %v2119_v55 = vld [vmem:[#allocation24] sm:$0xff] }
 0xd92   : > { %v2120_v57 = vld [vmem:[#allocation24 + $0x8] sm:$0xff] }
 0xd93   : > { %1868 = vrot.lane.b32.xlu1 %v1866_v56, %s3946_s11  ;;  %v3123_v56 = vpack.c.bf16 %v2136_v54, %v2135_v53  ;;  %v2036_v53 = vlaneseq }
 0xd95   : > { %3124 = vmatprep.subr.bf16.mxu0 %v3123_v56  ;;  %v2037_v54 = vshrl.u32 %v2036_v53, 7 }
 0xd97   : > { %v2042_v56 = vsub.s32 1, %v2037_v54 }
 0xe05   : > { %v1869_v58 = vpop.permute.xlu1 %1868 }
 0xe06   : > { %1872 = vst.msk [vmem:[#allocation2] sm:$0xff] %vm1871_vm8, %v1869_v58  ;;  %v2137_v58 = vld [vmem:[#allocation24 + $0x90] sm:$0xff] }
 0xe0d   : > { %v1873_v59 = vld [vmem:[#allocation2] sm:$0xff] }
 0xe0e   : > { %2941 = vmatmul.mubr.f32.vlgmr.msra.gmra.mrb[8].mxu0 %v1873_v59  ;;  %v2138_v59 = vld [vmem:[#allocation24 + $0x98] sm:$0xff] }
 0xee1   : > { %v1963_v61 = vpop.f32.mrb[8].mxu0 }
 0xee2   : > { %v1964_v62 = vadd.f32 %v2558_v60, %v1963_v61  ;;  %v2942_v63 = vpop.f32.mrb[9].mxu0  ;;  %v3125_v60 = vpack.c.bf16 %v2120_v57, %v2119_v55  ;;  %v3127_v61 = vpack.c.bf16 %v2138_v59, %v2137_v58  ;;  %v2038_v55 = vsub.s32 0, %v2037_v54 }
 0xee3   : > { %v2122_v63 = vld [vmem:[#allocation24 + $0x18] sm:$0xff] }
 0xee4   : > { %v4684_v1 = vadd.f32 %v1964_v62, %v4536_v0  ;;  %v2007_v0 = vld [vmem:[#allocation21 + $0x28] sm:$0xff]  ;;  %v2121_v62 = vld [vmem:[#allocation24 + $0x10] sm:$0xff]  ;;  %3126 = vmatpush3.bf16.msra.mxu0 %v3125_v60 }
 0xee5   : > { %v3095_v12 = vpack.c.bf16 %v2009_v11, %v2007_v0  ;;  %3128 = vmatprep.subr.bf16.mxu0 %v3127_v61  ;;  %v3135_v0 = vpack.c.bf16 %v2142_v9, %v2141_v7  ;;  %v2125_v11 = vld [vmem:[#allocation24 + $0x30] sm:$0xff] }
 0xee6   : > { %1970 = vadd.xlane.f32.xlu1 %v4684_v1 }
 0xee7   : > { %3096 = vmatprep.subr.bf16.mxu1 %v3095_v12  ;;  %v2126_v12 = vld [vmem:[#allocation24 + $0x38] sm:$0xff] }
 0xee8   : > { %3098 = vmatpush1.bf16.msra.mxu1 %v3097_v16  ;;  %v3137_v16 = vpack.c.bf16 %v2126_v12, %v2125_v11 }
 0xee9   : > { %3100 = vmatprep.subr.bf16.mxu1 %v3099_v19  ;;  %v2128_v19 = vld [vmem:[#allocation24 + $0x48] sm:$0xff] }
 0xeec   : > { %3102 = vmatpush1.bf16.msra.mxu1 %v3101_v21  ;;  %v3141_v21 = vpack.c.bf16 %v2128_v19, %v2127_v18 }
 0xeed   : > { %3104 = vmatprep.subr.bf16.mxu1 %v3103_v25  ;;  %v2130_v25 = vld [vmem:[#allocation24 + $0x58] sm:$0xff] }
 0xef0   : > { %3106 = vmatpush1.bf16.msra.mxu1 %v3105_v28  ;;  %v3145_v28 = vpack.c.bf16 %v2130_v25, %v2129_v24 }
 0xef1   : > { %3108 = vmatprep.subr.bf16.mxu1 %v3107_v32 }
 0xef4   : > { %3110 = vmatpush1.bf16.msra.mxu1 %v3109_v35 }
 0xef5   : > { %3112 = vmatprep.subr.bf16.mxu1 %v3111_v38  ;;  %v2559_v38 = vld [vmem:[#allocation18] ss:$0 sm:$0xff] }
 0xef8   : > { %3114 = vmatpush1.bf16.msra.mxu1 %v3113_v41 }
 0xef9   : > { %3116 = vmatprep.subr.bf16.mxu1 %v3115_v42 }
 0xefc   : > { %3118 = vmatpush1.bf16.msra.mxu1 %v3117_v47  ;;  %v2150_v47 = vld [vmem:[#allocation24 + $0xf8] sm:$0xff] }
 0xefd   : > { %3120 = vmatprep.subr.bf16.mxu1 %v3119_v49  ;;  %v3151_v49 = vpack.c.bf16 %v2150_v47, %v2149_v46 }
 0xf00   : > { %3122 = vmatpush1.bf16.msra.mxu1 %v3121_v52  ;;  %v3153_v52 = vpack.c.bf16 %v2134_v51, %v2133_v50 }
 0xf73   : > { %v1971_v8 = vpop.xlane.xlu1 %1970 }
 0xf74   : > { %v1972_v2 = vmul.f32 0.0078125, %v1971_v8  ;;  %v2139_v8 = vld [vmem:[#allocation24 + $0xa0] sm:$0xff] }
 0xf76   : > { %v4688_v3 = vsub.f32 %v4684_v1, %v1972_v2  ;;  %v2140_v2 = vld [vmem:[#allocation24 + $0xa8] sm:$0xff] }
 0xf77   : > { %v3131_v5 = vpack.c.bf16 %v2140_v2, %v2139_v8 }
 0xf78   : > { %v1974_v48 = vmul.f32 %v4688_v3, %v4688_v3 }
 0xf7a   : > { %1975 = vadd.xlane.f32.xlu0 %v1974_v48  ;;  %v3129_v48 = vpack.c.bf16 %v2122_v63, %v2121_v62 }
 0xf7c   : > { %3130 = vmatpush3.bf16.msra.mxu0 %v3129_v48 }
 0xf7d   : > { %3132 = vmatprep.subr.bf16.mxu0 %v3131_v5 }
 0xf80   : > { %3134 = vmatpush3.bf16.msra.mxu0 %v3133_v10 }
 0xf81   : > { %3136 = vmatprep.subr.bf16.mxu0 %v3135_v0 }
 0xf84   : > { %3138 = vmatpush3.bf16.msra.mxu0 %v3137_v16 }
 0xf85   : > { %3140 = vmatprep.subr.bf16.mxu0 %v3139_v17 }
 0xf88   : > { %3142 = vmatpush3.bf16.msra.mxu0 %v3141_v21 }
 0xf89   : > { %3144 = vmatprep.subr.bf16.mxu0 %v3143_v22 }
 0xf8c   : > { %3146 = vmatpush3.bf16.msra.mxu0 %v3145_v28 }
 0xf8d   : > { %3148 = vmatprep.subr.bf16.mxu0 %v3147_v30 }
 0xf90   : > { %3150 = vmatpush3.bf16.msra.mxu0 %v3149_v45 }
 0xf91   : > { %3152 = vmatprep.subr.bf16.mxu0 %v3151_v49 }
 0xf94   : > { %3154 = vmatpush3.bf16.msra.mxu0 %v3153_v52 }
0x1007   : > { %v1976_v31 = vpop.xlane.xlu0 %1975 }
0x1008   : > { %v1977_v32 = vmul.f32 0.007874016, %v1976_v31 }
0x100a   : > { %3379 = vrsqrt.f32 %v1977_v32  ;;  %vm1980_vm9 = vcmp.eq.f32.partialorder %v1977_v32, inf  ;;  %v1983_v29 = vand.u32 2147483648, %v1977_v32  ;;  %vm1982_vm10 = vcmp.eq.f32.partialorder %v1977_v32, 0.0 }
0x1014   : > { %v3380_v23 = vpop.eup %3379 }
0x1015   : > { %v1979_v33 = vmul.f32 %v3380_v23, %v1977_v32 }
0x1017   : > { %v1981_v35 = vsel %vm1980_vm9, %v1977_v32, %v1979_v33 }
0x1018   : > { %v1984_v36 = vsel %vm1982_vm10, %v1983_v29, %v1981_v35 }
0x1019   : > { %v1985_v37 = vadd.f32 1e-06, %v1984_v36 }
0x101b   : > { %3381 = vrcp.f32 %v1985_v37 }
0x1025   : > { %v3382_v13 = vpop.eup %3381 }
0x1026   : > { %v1987_v39 = vmul.f32 %v3382_v13, %v4688_v3  ;;  %v2034_v3 = vld [vmem:[#allocation23] sm:$0x3] }
0x1027   : > { %v2039_v57 = vrot.slane %v2034_v3, %v2038_v55  ;;  %v2043_v58 = vrot.slane %v2034_v3, %v2042_v56 }
0x1028   : > { %v1994_v41 = vmul.f32 %v2559_v38, %v1987_v39 }
0x102a   : > { %v2001_v42 = vadd.f32 %v2560_v40, %v1994_v41 }
0x102c   : > { %2111 = vmatmul.mubr.f32.vlgmr.msra.gmra.mrb[16].mxu1 %v2001_v42 }
0x10ff   : > { %v2112_v59 = vpop.f32.mrb[16].mxu1 }
0x1100   : > { %v2113_v60 = vadd.f32 %v2112_v59, %v2039_v57  ;;  %v2114_v61 = vpop.f32.mrb[17].mxu1 }
0x1101   : > { %v2115_v62 = vadd.f32 %v2114_v61, %v2043_v58 }
0x1102   : > { %v2117_v8 = vmax.f32 %v2113_v60, 0.0 }
0x1103   : > { %v2118_v63 = vmax.f32 %v2115_v62, 0.0 }
0x1105   : > { %2215 = vmatprep.mubr.f32.mxu0 %v2118_v63 }
0x1106   : > { %2216 = vmatmul.mubr.f32.vlgmr.msra.gmra.mrb[10].mxu0 %v2117_v8 }
0x11d9   : > { %v2709_v2 = vpop.f32.mrb[10].mxu0 }
0x11da   : > { %v2710_v48 = vpop.f32.mrb[11].mxu0 }
0x11db   : > { %v2711_v5 = vadd.f32 %v2710_v48, %v2709_v2 }
0x11dd   : > { %v2221_v34 = vadd.f32 %v2711_v5, %v4684_v1 }
0x11df   : > { %v2229_v7 = vadd.f32 %v2561_v6, %v2221_v34 }
0x11e1   : > { %2230 = vst [vmem:[%s763_s24] sm:$0xff] %v2229_v7 }
0x11e2   : > { %3822 = shalt.err (!%p3819_p8)
}
0x11e3   : > { %s3823_s10 = scalar_lea.hbm %s4700_s14, 128  ;;  %s3827_s16 = scalar_lea.hbm %s4875_s27, 256 }
0x11e4   : > { %p3824_p13 = scmp.ne.s32.totalorder %s4700_s14, %s3823_s10  ;;  %p3828_p4 = scmp.lt.u32.totalorder %s4700_s14, %s4875_s27 }
0x11e5   : > { %p3829_p2 = scmp.lt.u32.totalorder %s3827_s16, %s3823_s10  ;;  %p3831_p1 = scmp.lt.u32.totalorder %s3823_s10, %s4700_s14 }
0x11e6   : > { %p3825_p0 = pnand %p3824_p13, %p4876_p10 }
0x11e7   : > { %p3830_p7 = por %p3829_p2, %p3828_p4 }
0x11e8   : > { %p3826_p6 = pneg %p3825_p0 }
0x11e9   : > { %p3832_p5 = por %p3831_p1, %p3830_p7 }
0x11eb   : > { %p3833_p9 = pnand %p3832_p5, %p3826_p6 }
0x11ed   : > { %3836 = shalt.err (!%p3833_p9)
}
0x11ee   : > { %3209 = dma.vmem_to_hbm [thread:$0]  (%p4876_p10), %s4702_s20, 128, %s4700_s14, %s2232_s25  }
0x11ef PF: > { %s4877_s30 = sld [smem:[#allocation37_spill]]  ;;  %s4878_s11 = sld [smem:[#allocation46_spill]] }
0x11f0   : > { %s4879_s21 = sld [smem:[#allocation40_spill]] }
0x11f5   : > { %s2258_s4 = sand.u32 1, %s4877_s30   ;;  %p4880_p3 = scmp.ne.s32.totalorder %s4878_s11, 0 }
0x11f6   : > { %p4881_p11 = scmp.ge.s32.totalorder %s4879_s21, 2  ;;  %s2259_s24 = scalar_lea.sflag [#allocation5], %s2258_s4 }
0x11f8   : > { %p3259_p12 = pnand %p4881_p11, %p4880_p3 }
0x11fa   : > { %3894 = dma.done.wait (!%p3259_p12), %s2259_s24, 128  }
0x11fb   : > { %3896 = vsyncadd (!%p3259_p12), %s2259_s24, 4294967168  ;;  %s40_s23 = sadd.s32 1, %s4879_s21   ;;  %s4882_s1 = sld [smem:[#allocation38_spill]] }
0x11fc   : > { %p37_p8 = scmp.ge.s32.totalorder %s40_s23, 4   ;;  %s4883_s20 = sld [smem:[#allocation45_spill]] }
0x11fd   : > { %s4884_s7 = sld [smem:[#allocation43_spill]]  ;;  %s4885_s18 = smov %s3903_s19 }
0x11fe   : > { %s4887_s21 = smov %s3915_s22  ;;  %39 = sbr.rel (!%p37_p8) target bundleno = 28 (0x1c), region = 209 }
0x1201   : > { %s4886_s19 = smov %s4882_s1 }
0x1203   : > { %s4888_s22 = smov %s4884_s7 }
0x1205   :  { %2264 = vsyncpa [#allocation4], 1 }
0x1206   :  { %2266 = vsyncpa [#allocation4 + $0x1], 1 }
0x1207   :  { %2267 = vsyncpa [#allocation7], 1 }
0x1208   :  { %2269 = vsyncpa [#allocation7 + $0x1], 1 }
0x1209   :  { %2270 = vsyncpa [#allocation10], 1 }
0x120a   :  { %2271 = vsyncpa [#allocation13], 1 }
0x120b   :  { %2272 = vsyncpa [#allocation16], 1 }
0x120c   :  { %2273 = vsyncpa [#allocation19], 1 }
0x120d   :  { %2274 = vsyncpa [#allocation22], 1 }
0x120e   :  { %2275 = vsyncpa [#allocation25], 1 }
0x120f   :  { %2276 = vsyncpa [#allocation5], 1 }
0x1210   :  { %2278 = vsyncpa [#allocation5 + $0x1], 1 }

</bundles_post_ra>
